<compile_context>
chip_gen: v7x
topology: tpu7x:2x2x1
jax: 0.10.0
libtpu: 0.0.40
codegen_flags: <defaults>
</compile_context>

<pallas_src>
import functools

import jax
import jax.numpy as jnp
from jax.experimental import pallas as pl
from jax.experimental.pallas import tpu as pltpu

IN_C, OUT_C, K = 3, 6, 3


def _conv2d_kernel(x_ref, w_ref, b_ref, o_ref, *, C, O, W, KH, KW, HoW):
    # x_ref: (N, C, H*W + KW - 1)  f32, VMEM  (flattened spatial, zero padded)
    # w_ref: (O*C*KH*KW,)          f32, SMEM  (flattened OIHW weights)
    # b_ref: (O,)                  f32, SMEM
    # o_ref: (N, O, Ho*W)          f32, VMEM  (lane-dense flat output slab)
    N = x_ref.shape[0]
    x = x_ref[...]  # load the whole (tiny) input into vregs once

    # Bias-initialized accumulators, one per output channel (~2 vregs each).
    accs = [jnp.full((N, HoW), b_ref[o], dtype=jnp.float32) for o in range(O)]

    # Taps outermost: each shifted window is built exactly once (C*KH*KW = 27
    # slices total).  The (kh, kw) shift is folded into one flat lane offset,
    # so there is no per-tap lane-narrowing slice; the wrap-around columns it
    # produces are dropped once, in the wrapper, after the single store.
    for c in range(C):
        for kh in range(KH):
            for kw in range(KW):
                off = kh * W + kw
                patch = x[:, c, off:off + HoW]            # (N, Ho*W)
                for o in range(O):
                    w_s = w_ref[((o * C + c) * KH + kh) * KW + kw]
                    accs[o] = accs[o] + patch * w_s

    # Single contiguous, lane-dense store of the whole output block.
    o_ref[...] = jnp.stack(accs, axis=1).astype(o_ref.dtype)


def conv2d_pallas(x, w, b):
    """Valid 2D convolution, stride 1, NCHW input / OIHW weights (nn.Conv2d)."""
    N, C, H, W = x.shape
    O, Ci, KH, KW = w.shape
    assert C == Ci
    Ho, Wo = H - KH + 1, W - KW + 1
    HoW = Ho * W

    # Lane-dense presentation: flatten spatial dims; pad by KW-1 so every flat
    # window slice [off : off + Ho*W] (off = kh*W + kw) stays in bounds.
    x_flat = jnp.pad(x.reshape(N, C, H * W), ((0, 0), (0, 0), (0, KW - 1)))
    w_flat = w.reshape(-1)  # each filter tap becomes a cheap scalar SMEM read

    kernel = functools.partial(
        _conv2d_kernel, C=C, O=O, W=W, KH=KH, KW=KW, HoW=HoW)

    out_flat = pl.pallas_call(
        kernel,
        out_shape=jax.ShapeDtypeStruct((N, O, HoW), x.dtype),
        in_specs=[
            pl.BlockSpec(memory_space=pltpu.MemorySpace.VMEM),
            pl.BlockSpec(memory_space=pltpu.MemorySpace.SMEM),
            pl.BlockSpec(memory_space=pltpu.MemorySpace.SMEM),
        ],
        out_specs=pl.BlockSpec(memory_space=pltpu.MemorySpace.VMEM),
    )(x_flat, w_flat, b)

    # Wrapper-side layout plumbing only: un-flatten rows (width W) and drop
    # the KW-1 wrap-around columns -> (N, O, Ho, Wo).
    return out_flat.reshape(N, O, Ho, W)[:, :, :, :Wo]


def init_params(key):
    """Deterministic Conv2d(3, 6, 3) parameters (PyTorch-style uniform init)."""
    kw_key, kb_key = jax.random.split(key)
    fan_in = IN_C * K * K
    bound = 1.0 / jnp.sqrt(fan_in)
    w = jax.random.uniform(kw_key, (OUT_C, IN_C, K, K), jnp.float32, -bound, bound)
    b = jax.random.uniform(kb_key, (OUT_C,), jnp.float32, -bound, bound)
    return w, b


if __name__ == "__main__":
    key = jax.random.PRNGKey(0)
    k_x, k_p = jax.random.split(key)

    # Small deterministic input consistent with the module: N=2, C=3, 16x16.
    x = jax.random.normal(k_x, (2, IN_C, 16, 16), dtype=jnp.float32)
    w, b = init_params(k_p)

    out = conv2d_pallas(x, w, b)
    out = jax.block_until_ready(out)

    # Reference check against XLA's conv (same NCHW/OIHW semantics as PyTorch).
    ref = jax.lax.conv_general_dilated(
        x, w, window_strides=(1, 1), padding="VALID",
        dimension_numbers=("NCHW", "OIHW", "NCHW"),
    ) + b[None, :, None, None]

    assert out.shape == (2, OUT_C, 14, 14), out.shape
    assert jnp.allclose(out, ref, atol=1e-5, rtol=1e-5), "mismatch vs reference conv"

    print("KERNEL_OK")
</pallas_src>

<mosaic_0001>
module attributes {stable_mosaic.version = 11 : i64} {
  func.func @_conv2d_kernel(%arg0: memref<2x3x258xf32, #tpu.memory_space<vmem>>, %arg1: memref<162xf32, #tpu.memory_space<smem>>, %arg2: memref<6xf32, #tpu.memory_space<smem>>, %arg3: memref<2x6x224xf32, #tpu.memory_space<vmem>>) attributes {dimension_semantics = [], scalar_prefetch = 0 : i64, scratch_operands = 0 : i64, tpu.core_type = #tpu.core_type<tc>} {
    %c0 = arith.constant 0 : index
    %c0_0 = arith.constant 0 : index
    %c0_1 = arith.constant 0 : index
    %0 = vector.load %arg0[%c0, %c0_0, %c0_1] : memref<2x3x258xf32, #tpu.memory_space<vmem>>, vector<2x3x258xf32>
    %c0_2 = arith.constant 0 : index
    %1 = memref.load %arg2[%c0_2] : memref<6xf32, #tpu.memory_space<smem>>
    %2 = vector.broadcast %1 : f32 to vector<2x224xf32>
    %c1 = arith.constant 1 : index
    %3 = memref.load %arg2[%c1] : memref<6xf32, #tpu.memory_space<smem>>
    %4 = vector.broadcast %3 : f32 to vector<2x224xf32>
    %c2 = arith.constant 2 : index
    %5 = memref.load %arg2[%c2] : memref<6xf32, #tpu.memory_space<smem>>
    %6 = vector.broadcast %5 : f32 to vector<2x224xf32>
    %c3 = arith.constant 3 : index
    %7 = memref.load %arg2[%c3] : memref<6xf32, #tpu.memory_space<smem>>
    %8 = vector.broadcast %7 : f32 to vector<2x224xf32>
    %c4 = arith.constant 4 : index
    %9 = memref.load %arg2[%c4] : memref<6xf32, #tpu.memory_space<smem>>
    %10 = vector.broadcast %9 : f32 to vector<2x224xf32>
    %c5 = arith.constant 5 : index
    %11 = memref.load %arg2[%c5] : memref<6xf32, #tpu.memory_space<smem>>
    %12 = vector.broadcast %11 : f32 to vector<2x224xf32>
    %13 = vector.extract_strided_slice %0 {offsets = [0, 0, 0], sizes = [2, 1, 224], strides = [1, 1, 1]} : vector<2x3x258xf32> to vector<2x1x224xf32>
    %14 = vector.shape_cast %13 : vector<2x1x224xf32> to vector<2x224xf32>
    %c0_3 = arith.constant 0 : index
    %15 = memref.load %arg1[%c0_3] : memref<162xf32, #tpu.memory_space<smem>>
    %16 = vector.broadcast %15 : f32 to vector<2x224xf32>
    %17 = arith.mulf %14, %16 : vector<2x224xf32>
    %18 = arith.addf %2, %17 : vector<2x224xf32>
    %c27 = arith.constant 27 : index
    %19 = memref.load %arg1[%c27] : memref<162xf32, #tpu.memory_space<smem>>
    %20 = vector.broadcast %19 : f32 to vector<2x224xf32>
    %21 = arith.mulf %14, %20 : vector<2x224xf32>
    %22 = arith.addf %4, %21 : vector<2x224xf32>
    %c54 = arith.constant 54 : index
    %23 = memref.load %arg1[%c54] : memref<162xf32, #tpu.memory_space<smem>>
    %24 = vector.broadcast %23 : f32 to vector<2x224xf32>
    %25 = arith.mulf %14, %24 : vector<2x224xf32>
    %26 = arith.addf %6, %25 : vector<2x224xf32>
    %c81 = arith.constant 81 : index
    %27 = memref.load %arg1[%c81] : memref<162xf32, #tpu.memory_space<smem>>
    %28 = vector.broadcast %27 : f32 to vector<2x224xf32>
    %29 = arith.mulf %14, %28 : vector<2x224xf32>
    %30 = arith.addf %8, %29 : vector<2x224xf32>
    %c108 = arith.constant 108 : index
    %31 = memref.load %arg1[%c108] : memref<162xf32, #tpu.memory_space<smem>>
    %32 = vector.broadcast %31 : f32 to vector<2x224xf32>
    %33 = arith.mulf %14, %32 : vector<2x224xf32>
    %34 = arith.addf %10, %33 : vector<2x224xf32>
    %c135 = arith.constant 135 : index
    %35 = memref.load %arg1[%c135] : memref<162xf32, #tpu.memory_space<smem>>
    %36 = vector.broadcast %35 : f32 to vector<2x224xf32>
    %37 = arith.mulf %14, %36 : vector<2x224xf32>
    %38 = arith.addf %12, %37 : vector<2x224xf32>
    %39 = vector.extract_strided_slice %0 {offsets = [0, 0, 1], sizes = [2, 1, 224], strides = [1, 1, 1]} : vector<2x3x258xf32> to vector<2x1x224xf32>
    %40 = vector.shape_cast %39 : vector<2x1x224xf32> to vector<2x224xf32>
    %c1_4 = arith.constant 1 : index
    %41 = memref.load %arg1[%c1_4] : memref<162xf32, #tpu.memory_space<smem>>
    %42 = vector.broadcast %41 : f32 to vector<2x224xf32>
    %43 = arith.mulf %40, %42 : vector<2x224xf32>
    %44 = arith.addf %18, %43 : vector<2x224xf32>
    %c28 = arith.constant 28 : index
    %45 = memref.load %arg1[%c28] : memref<162xf32, #tpu.memory_space<smem>>
    %46 = vector.broadcast %45 : f32 to vector<2x224xf32>
    %47 = arith.mulf %40, %46 : vector<2x224xf32>
    %48 = arith.addf %22, %47 : vector<2x224xf32>
    %c55 = arith.constant 55 : index
    %49 = memref.load %arg1[%c55] : memref<162xf32, #tpu.memory_space<smem>>
    %50 = vector.broadcast %49 : f32 to vector<2x224xf32>
    %51 = arith.mulf %40, %50 : vector<2x224xf32>
    %52 = arith.addf %26, %51 : vector<2x224xf32>
    %c82 = arith.constant 82 : index
    %53 = memref.load %arg1[%c82] : memref<162xf32, #tpu.memory_space<smem>>
    %54 = vector.broadcast %53 : f32 to vector<2x224xf32>
    %55 = arith.mulf %40, %54 : vector<2x224xf32>
    %56 = arith.addf %30, %55 : vector<2x224xf32>
    %c109 = arith.constant 109 : index
    %57 = memref.load %arg1[%c109] : memref<162xf32, #tpu.memory_space<smem>>
    %58 = vector.broadcast %57 : f32 to vector<2x224xf32>
    %59 = arith.mulf %40, %58 : vector<2x224xf32>
    %60 = arith.addf %34, %59 : vector<2x224xf32>
    %c136 = arith.constant 136 : index
    %61 = memref.load %arg1[%c136] : memref<162xf32, #tpu.memory_space<smem>>
    %62 = vector.broadcast %61 : f32 to vector<2x224xf32>
    %63 = arith.mulf %40, %62 : vector<2x224xf32>
    %64 = arith.addf %38, %63 : vector<2x224xf32>
    %65 = vector.extract_strided_slice %0 {offsets = [0, 0, 2], sizes = [2, 1, 224], strides = [1, 1, 1]} : vector<2x3x258xf32> to vector<2x1x224xf32>
    %66 = vector.shape_cast %65 : vector<2x1x224xf32> to vector<2x224xf32>
    %c2_5 = arith.constant 2 : index
    %67 = memref.load %arg1[%c2_5] : memref<162xf32, #tpu.memory_space<smem>>
    %68 = vector.broadcast %67 : f32 to vector<2x224xf32>
    %69 = arith.mulf %66, %68 : vector<2x224xf32>
    %70 = arith.addf %44, %69 : vector<2x224xf32>
    %c29 = arith.constant 29 : index
    %71 = memref.load %arg1[%c29] : memref<162xf32, #tpu.memory_space<smem>>
    %72 = vector.broadcast %71 : f32 to vector<2x224xf32>
    %73 = arith.mulf %66, %72 : vector<2x224xf32>
    %74 = arith.addf %48, %73 : vector<2x224xf32>
    %c56 = arith.constant 56 : index
    %75 = memref.load %arg1[%c56] : memref<162xf32, #tpu.memory_space<smem>>
    %76 = vector.broadcast %75 : f32 to vector<2x224xf32>
    %77 = arith.mulf %66, %76 : vector<2x224xf32>
    %78 = arith.addf %52, %77 : vector<2x224xf32>
    %c83 = arith.constant 83 : index
    %79 = memref.load %arg1[%c83] : memref<162xf32, #tpu.memory_space<smem>>
    %80 = vector.broadcast %79 : f32 to vector<2x224xf32>
    %81 = arith.mulf %66, %80 : vector<2x224xf32>
    %82 = arith.addf %56, %81 : vector<2x224xf32>
    %c110 = arith.constant 110 : index
    %83 = memref.load %arg1[%c110] : memref<162xf32, #tpu.memory_space<smem>>
    %84 = vector.broadcast %83 : f32 to vector<2x224xf32>
    %85 = arith.mulf %66, %84 : vector<2x224xf32>
    %86 = arith.addf %60, %85 : vector<2x224xf32>
    %c137 = arith.constant 137 : index
    %87 = memref.load %arg1[%c137] : memref<162xf32, #tpu.memory_space<smem>>
    %88 = vector.broadcast %87 : f32 to vector<2x224xf32>
    %89 = arith.mulf %66, %88 : vector<2x224xf32>
    %90 = arith.addf %64, %89 : vector<2x224xf32>
    %91 = vector.extract_strided_slice %0 {offsets = [0, 0, 16], sizes = [2, 1, 224], strides = [1, 1, 1]} : vector<2x3x258xf32> to vector<2x1x224xf32>
    %92 = vector.shape_cast %91 : vector<2x1x224xf32> to vector<2x224xf32>
    %c3_6 = arith.constant 3 : index
    %93 = memref.load %arg1[%c3_6] : memref<162xf32, #tpu.memory_space<smem>>
    %94 = vector.broadcast %93 : f32 to vector<2x224xf32>
    %95 = arith.mulf %92, %94 : vector<2x224xf32>
    %96 = arith.addf %70, %95 : vector<2x224xf32>
    %c30 = arith.constant 30 : index
    %97 = memref.load %arg1[%c30] : memref<162xf32, #tpu.memory_space<smem>>
    %98 = vector.broadcast %97 : f32 to vector<2x224xf32>
    %99 = arith.mulf %92, %98 : vector<2x224xf32>
    %100 = arith.addf %74, %99 : vector<2x224xf32>
    %c57 = arith.constant 57 : index
    %101 = memref.load %arg1[%c57] : memref<162xf32, #tpu.memory_space<smem>>
    %102 = vector.broadcast %101 : f32 to vector<2x224xf32>
    %103 = arith.mulf %92, %102 : vector<2x224xf32>
    %104 = arith.addf %78, %103 : vector<2x224xf32>
    %c84 = arith.constant 84 : index
    %105 = memref.load %arg1[%c84] : memref<162xf32, #tpu.memory_space<smem>>
    %106 = vector.broadcast %105 : f32 to vector<2x224xf32>
    %107 = arith.mulf %92, %106 : vector<2x224xf32>
    %108 = arith.addf %82, %107 : vector<2x224xf32>
    %c111 = arith.constant 111 : index
    %109 = memref.load %arg1[%c111] : memref<162xf32, #tpu.memory_space<smem>>
    %110 = vector.broadcast %109 : f32 to vector<2x224xf32>
    %111 = arith.mulf %92, %110 : vector<2x224xf32>
    %112 = arith.addf %86, %111 : vector<2x224xf32>
    %c138 = arith.constant 138 : index
    %113 = memref.load %arg1[%c138] : memref<162xf32, #tpu.memory_space<smem>>
    %114 = vector.broadcast %113 : f32 to vector<2x224xf32>
    %115 = arith.mulf %92, %114 : vector<2x224xf32>
    %116 = arith.addf %90, %115 : vector<2x224xf32>
    %117 = vector.extract_strided_slice %0 {offsets = [0, 0, 17], sizes = [2, 1, 224], strides = [1, 1, 1]} : vector<2x3x258xf32> to vector<2x1x224xf32>
    %118 = vector.shape_cast %117 : vector<2x1x224xf32> to vector<2x224xf32>
    %c4_7 = arith.constant 4 : index
    %119 = memref.load %arg1[%c4_7] : memref<162xf32, #tpu.memory_space<smem>>
    %120 = vector.broadcast %119 : f32 to vector<2x224xf32>
    %121 = arith.mulf %118, %120 : vector<2x224xf32>
    %122 = arith.addf %96, %121 : vector<2x224xf32>
    %c31 = arith.constant 31 : index
    %123 = memref.load %arg1[%c31] : memref<162xf32, #tpu.memory_space<smem>>
    %124 = vector.broadcast %123 : f32 to vector<2x224xf32>
    %125 = arith.mulf %118, %124 : vector<2x224xf32>
    %126 = arith.addf %100, %125 : vector<2x224xf32>
    %c58 = arith.constant 58 : index
    %127 = memref.load %arg1[%c58] : memref<162xf32, #tpu.memory_space<smem>>
    %128 = vector.broadcast %127 : f32 to vector<2x224xf32>
    %129 = arith.mulf %118, %128 : vector<2x224xf32>
    %130 = arith.addf %104, %129 : vector<2x224xf32>
    %c85 = arith.constant 85 : index
    %131 = memref.load %arg1[%c85] : memref<162xf32, #tpu.memory_space<smem>>
    %132 = vector.broadcast %131 : f32 to vector<2x224xf32>
    %133 = arith.mulf %118, %132 : vector<2x224xf32>
    %134 = arith.addf %108, %133 : vector<2x224xf32>
    %c112 = arith.constant 112 : index
    %135 = memref.load %arg1[%c112] : memref<162xf32, #tpu.memory_space<smem>>
    %136 = vector.broadcast %135 : f32 to vector<2x224xf32>
    %137 = arith.mulf %118, %136 : vector<2x224xf32>
    %138 = arith.addf %112, %137 : vector<2x224xf32>
    %c139 = arith.constant 139 : index
    %139 = memref.load %arg1[%c139] : memref<162xf32, #tpu.memory_space<smem>>
    %140 = vector.broadcast %139 : f32 to vector<2x224xf32>
    %141 = arith.mulf %118, %140 : vector<2x224xf32>
    %142 = arith.addf %116, %141 : vector<2x224xf32>
    %143 = vector.extract_strided_slice %0 {offsets = [0, 0, 18], sizes = [2, 1, 224], strides = [1, 1, 1]} : vector<2x3x258xf32> to vector<2x1x224xf32>
    %144 = vector.shape_cast %143 : vector<2x1x224xf32> to vector<2x224xf32>
    %c5_8 = arith.constant 5 : index
    %145 = memref.load %arg1[%c5_8] : memref<162xf32, #tpu.memory_space<smem>>
    %146 = vector.broadcast %145 : f32 to vector<2x224xf32>
    %147 = arith.mulf %144, %146 : vector<2x224xf32>
    %148 = arith.addf %122, %147 : vector<2x224xf32>
    %c32 = arith.constant 32 : index
    %149 = memref.load %arg1[%c32] : memref<162xf32, #tpu.memory_space<smem>>
    %150 = vector.broadcast %149 : f32 to vector<2x224xf32>
    %151 = arith.mulf %144, %150 : vector<2x224xf32>
    %152 = arith.addf %126, %151 : vector<2x224xf32>
    %c59 = arith.constant 59 : index
    %153 = memref.load %arg1[%c59] : memref<162xf32, #tpu.memory_space<smem>>
    %154 = vector.broadcast %153 : f32 to vector<2x224xf32>
    %155 = arith.mulf %144, %154 : vector<2x224xf32>
    %156 = arith.addf %130, %155 : vector<2x224xf32>
    %c86 = arith.constant 86 : index
    %157 = memref.load %arg1[%c86] : memref<162xf32, #tpu.memory_space<smem>>
    %158 = vector.broadcast %157 : f32 to vector<2x224xf32>
    %159 = arith.mulf %144, %158 : vector<2x224xf32>
    %160 = arith.addf %134, %159 : vector<2x224xf32>
    %c113 = arith.constant 113 : index
    %161 = memref.load %arg1[%c113] : memref<162xf32, #tpu.memory_space<smem>>
    %162 = vector.broadcast %161 : f32 to vector<2x224xf32>
    %163 = arith.mulf %144, %162 : vector<2x224xf32>
    %164 = arith.addf %138, %163 : vector<2x224xf32>
    %c140 = arith.constant 140 : index
    %165 = memref.load %arg1[%c140] : memref<162xf32, #tpu.memory_space<smem>>
    %166 = vector.broadcast %165 : f32 to vector<2x224xf32>
    %167 = arith.mulf %144, %166 : vector<2x224xf32>
    %168 = arith.addf %142, %167 : vector<2x224xf32>
    %169 = vector.extract_strided_slice %0 {offsets = [0, 0, 32], sizes = [2, 1, 224], strides = [1, 1, 1]} : vector<2x3x258xf32> to vector<2x1x224xf32>
    %170 = vector.shape_cast %169 : vector<2x1x224xf32> to vector<2x224xf32>
    %c6 = arith.constant 6 : index
    %171 = memref.load %arg1[%c6] : memref<162xf32, #tpu.memory_space<smem>>
    %172 = vector.broadcast %171 : f32 to vector<2x224xf32>
    %173 = arith.mulf %170, %172 : vector<2x224xf32>
    %174 = arith.addf %148, %173 : vector<2x224xf32>
    %c33 = arith.constant 33 : index
    %175 = memref.load %arg1[%c33] : memref<162xf32, #tpu.memory_space<smem>>
    %176 = vector.broadcast %175 : f32 to vector<2x224xf32>
    %177 = arith.mulf %170, %176 : vector<2x224xf32>
    %178 = arith.addf %152, %177 : vector<2x224xf32>
    %c60 = arith.constant 60 : index
    %179 = memref.load %arg1[%c60] : memref<162xf32, #tpu.memory_space<smem>>
    %180 = vector.broadcast %179 : f32 to vector<2x224xf32>
    %181 = arith.mulf %170, %180 : vector<2x224xf32>
    %182 = arith.addf %156, %181 : vector<2x224xf32>
    %c87 = arith.constant 87 : index
    %183 = memref.load %arg1[%c87] : memref<162xf32, #tpu.memory_space<smem>>
    %184 = vector.broadcast %183 : f32 to vector<2x224xf32>
    %185 = arith.mulf %170, %184 : vector<2x224xf32>
    %186 = arith.addf %160, %185 : vector<2x224xf32>
    %c114 = arith.constant 114 : index
    %187 = memref.load %arg1[%c114] : memref<162xf32, #tpu.memory_space<smem>>
    %188 = vector.broadcast %187 : f32 to vector<2x224xf32>
    %189 = arith.mulf %170, %188 : vector<2x224xf32>
    %190 = arith.addf %164, %189 : vector<2x224xf32>
    %c141 = arith.constant 141 : index
    %191 = memref.load %arg1[%c141] : memref<162xf32, #tpu.memory_space<smem>>
    %192 = vector.broadcast %191 : f32 to vector<2x224xf32>
    %193 = arith.mulf %170, %192 : vector<2x224xf32>
    %194 = arith.addf %168, %193 : vector<2x224xf32>
    %195 = vector.extract_strided_slice %0 {offsets = [0, 0, 33], sizes = [2, 1, 224], strides = [1, 1, 1]} : vector<2x3x258xf32> to vector<2x1x224xf32>
    %196 = vector.shape_cast %195 : vector<2x1x224xf32> to vector<2x224xf32>
    %c7 = arith.constant 7 : index
    %197 = memref.load %arg1[%c7] : memref<162xf32, #tpu.memory_space<smem>>
    %198 = vector.broadcast %197 : f32 to vector<2x224xf32>
    %199 = arith.mulf %196, %198 : vector<2x224xf32>
    %200 = arith.addf %174, %199 : vector<2x224xf32>
    %c34 = arith.constant 34 : index
    %201 = memref.load %arg1[%c34] : memref<162xf32, #tpu.memory_space<smem>>
    %202 = vector.broadcast %201 : f32 to vector<2x224xf32>
    %203 = arith.mulf %196, %202 : vector<2x224xf32>
    %204 = arith.addf %178, %203 : vector<2x224xf32>
    %c61 = arith.constant 61 : index
    %205 = memref.load %arg1[%c61] : memref<162xf32, #tpu.memory_space<smem>>
    %206 = vector.broadcast %205 : f32 to vector<2x224xf32>
    %207 = arith.mulf %196, %206 : vector<2x224xf32>
    %208 = arith.addf %182, %207 : vector<2x224xf32>
    %c88 = arith.constant 88 : index
    %209 = memref.load %arg1[%c88] : memref<162xf32, #tpu.memory_space<smem>>
    %210 = vector.broadcast %209 : f32 to vector<2x224xf32>
    %211 = arith.mulf %196, %210 : vector<2x224xf32>
    %212 = arith.addf %186, %211 : vector<2x224xf32>
    %c115 = arith.constant 115 : index
    %213 = memref.load %arg1[%c115] : memref<162xf32, #tpu.memory_space<smem>>
    %214 = vector.broadcast %213 : f32 to vector<2x224xf32>
    %215 = arith.mulf %196, %214 : vector<2x224xf32>
    %216 = arith.addf %190, %215 : vector<2x224xf32>
    %c142 = arith.constant 142 : index
    %217 = memref.load %arg1[%c142] : memref<162xf32, #tpu.memory_space<smem>>
    %218 = vector.broadcast %217 : f32 to vector<2x224xf32>
    %219 = arith.mulf %196, %218 : vector<2x224xf32>
    %220 = arith.addf %194, %219 : vector<2x224xf32>
    %221 = vector.extract_strided_slice %0 {offsets = [0, 0, 34], sizes = [2, 1, 224], strides = [1, 1, 1]} : vector<2x3x258xf32> to vector<2x1x224xf32>
    %222 = vector.shape_cast %221 : vector<2x1x224xf32> to vector<2x224xf32>
    %c8 = arith.constant 8 : index
    %223 = memref.load %arg1[%c8] : memref<162xf32, #tpu.memory_space<smem>>
    %224 = vector.broadcast %223 : f32 to vector<2x224xf32>
    %225 = arith.mulf %222, %224 : vector<2x224xf32>
    %226 = arith.addf %200, %225 : vector<2x224xf32>
    %c35 = arith.constant 35 : index
    %227 = memref.load %arg1[%c35] : memref<162xf32, #tpu.memory_space<smem>>
    %228 = vector.broadcast %227 : f32 to vector<2x224xf32>
    %229 = arith.mulf %222, %228 : vector<2x224xf32>
    %230 = arith.addf %204, %229 : vector<2x224xf32>
    %c62 = arith.constant 62 : index
    %231 = memref.load %arg1[%c62] : memref<162xf32, #tpu.memory_space<smem>>
    %232 = vector.broadcast %231 : f32 to vector<2x224xf32>
    %233 = arith.mulf %222, %232 : vector<2x224xf32>
    %234 = arith.addf %208, %233 : vector<2x224xf32>
    %c89 = arith.constant 89 : index
    %235 = memref.load %arg1[%c89] : memref<162xf32, #tpu.memory_space<smem>>
    %236 = vector.broadcast %235 : f32 to vector<2x224xf32>
    %237 = arith.mulf %222, %236 : vector<2x224xf32>
    %238 = arith.addf %212, %237 : vector<2x224xf32>
    %c116 = arith.constant 116 : index
    %239 = memref.load %arg1[%c116] : memref<162xf32, #tpu.memory_space<smem>>
    %240 = vector.broadcast %239 : f32 to vector<2x224xf32>
    %241 = arith.mulf %222, %240 : vector<2x224xf32>
    %242 = arith.addf %216, %241 : vector<2x224xf32>
    %c143 = arith.constant 143 : index
    %243 = memref.load %arg1[%c143] : memref<162xf32, #tpu.memory_space<smem>>
    %244 = vector.broadcast %243 : f32 to vector<2x224xf32>
    %245 = arith.mulf %222, %244 : vector<2x224xf32>
    %246 = arith.addf %220, %245 : vector<2x224xf32>
    %247 = vector.extract_strided_slice %0 {offsets = [0, 1, 0], sizes = [2, 1, 224], strides = [1, 1, 1]} : vector<2x3x258xf32> to vector<2x1x224xf32>
    %248 = vector.shape_cast %247 : vector<2x1x224xf32> to vector<2x224xf32>
    %c9 = arith.constant 9 : index
    %249 = memref.load %arg1[%c9] : memref<162xf32, #tpu.memory_space<smem>>
    %250 = vector.broadcast %249 : f32 to vector<2x224xf32>
    %251 = arith.mulf %248, %250 : vector<2x224xf32>
    %252 = arith.addf %226, %251 : vector<2x224xf32>
    %c36 = arith.constant 36 : index
    %253 = memref.load %arg1[%c36] : memref<162xf32, #tpu.memory_space<smem>>
    %254 = vector.broadcast %253 : f32 to vector<2x224xf32>
    %255 = arith.mulf %248, %254 : vector<2x224xf32>
    %256 = arith.addf %230, %255 : vector<2x224xf32>
    %c63 = arith.constant 63 : index
    %257 = memref.load %arg1[%c63] : memref<162xf32, #tpu.memory_space<smem>>
    %258 = vector.broadcast %257 : f32 to vector<2x224xf32>
    %259 = arith.mulf %248, %258 : vector<2x224xf32>
    %260 = arith.addf %234, %259 : vector<2x224xf32>
    %c90 = arith.constant 90 : index
    %261 = memref.load %arg1[%c90] : memref<162xf32, #tpu.memory_space<smem>>
    %262 = vector.broadcast %261 : f32 to vector<2x224xf32>
    %263 = arith.mulf %248, %262 : vector<2x224xf32>
    %264 = arith.addf %238, %263 : vector<2x224xf32>
    %c117 = arith.constant 117 : index
    %265 = memref.load %arg1[%c117] : memref<162xf32, #tpu.memory_space<smem>>
    %266 = vector.broadcast %265 : f32 to vector<2x224xf32>
    %267 = arith.mulf %248, %266 : vector<2x224xf32>
    %268 = arith.addf %242, %267 : vector<2x224xf32>
    %c144 = arith.constant 144 : index
    %269 = memref.load %arg1[%c144] : memref<162xf32, #tpu.memory_space<smem>>
    %270 = vector.broadcast %269 : f32 to vector<2x224xf32>
    %271 = arith.mulf %248, %270 : vector<2x224xf32>
    %272 = arith.addf %246, %271 : vector<2x224xf32>
    %273 = vector.extract_strided_slice %0 {offsets = [0, 1, 1], sizes = [2, 1, 224], strides = [1, 1, 1]} : vector<2x3x258xf32> to vector<2x1x224xf32>
    %274 = vector.shape_cast %273 : vector<2x1x224xf32> to vector<2x224xf32>
    %c10 = arith.constant 10 : index
    %275 = memref.load %arg1[%c10] : memref<162xf32, #tpu.memory_space<smem>>
    %276 = vector.broadcast %275 : f32 to vector<2x224xf32>
    %277 = arith.mulf %274, %276 : vector<2x224xf32>
    %278 = arith.addf %252, %277 : vector<2x224xf32>
    %c37 = arith.constant 37 : index
    %279 = memref.load %arg1[%c37] : memref<162xf32, #tpu.memory_space<smem>>
    %280 = vector.broadcast %279 : f32 to vector<2x224xf32>
    %281 = arith.mulf %274, %280 : vector<2x224xf32>
    %282 = arith.addf %256, %281 : vector<2x224xf32>
    %c64 = arith.constant 64 : index
    %283 = memref.load %arg1[%c64] : memref<162xf32, #tpu.memory_space<smem>>
    %284 = vector.broadcast %283 : f32 to vector<2x224xf32>
    %285 = arith.mulf %274, %284 : vector<2x224xf32>
    %286 = arith.addf %260, %285 : vector<2x224xf32>
    %c91 = arith.constant 91 : index
    %287 = memref.load %arg1[%c91] : memref<162xf32, #tpu.memory_space<smem>>
    %288 = vector.broadcast %287 : f32 to vector<2x224xf32>
    %289 = arith.mulf %274, %288 : vector<2x224xf32>
    %290 = arith.addf %264, %289 : vector<2x224xf32>
    %c118 = arith.constant 118 : index
    %291 = memref.load %arg1[%c118] : memref<162xf32, #tpu.memory_space<smem>>
    %292 = vector.broadcast %291 : f32 to vector<2x224xf32>
    %293 = arith.mulf %274, %292 : vector<2x224xf32>
    %294 = arith.addf %268, %293 : vector<2x224xf32>
    %c145 = arith.constant 145 : index
    %295 = memref.load %arg1[%c145] : memref<162xf32, #tpu.memory_space<smem>>
    %296 = vector.broadcast %295 : f32 to vector<2x224xf32>
    %297 = arith.mulf %274, %296 : vector<2x224xf32>
    %298 = arith.addf %272, %297 : vector<2x224xf32>
    %299 = vector.extract_strided_slice %0 {offsets = [0, 1, 2], sizes = [2, 1, 224], strides = [1, 1, 1]} : vector<2x3x258xf32> to vector<2x1x224xf32>
    %300 = vector.shape_cast %299 : vector<2x1x224xf32> to vector<2x224xf32>
    %c11 = arith.constant 11 : index
    %301 = memref.load %arg1[%c11] : memref<162xf32, #tpu.memory_space<smem>>
    %302 = vector.broadcast %301 : f32 to vector<2x224xf32>
    %303 = arith.mulf %300, %302 : vector<2x224xf32>
    %304 = arith.addf %278, %303 : vector<2x224xf32>
    %c38 = arith.constant 38 : index
    %305 = memref.load %arg1[%c38] : memref<162xf32, #tpu.memory_space<smem>>
    %306 = vector.broadcast %305 : f32 to vector<2x224xf32>
    %307 = arith.mulf %300, %306 : vector<2x224xf32>
    %308 = arith.addf %282, %307 : vector<2x224xf32>
    %c65 = arith.constant 65 : index
    %309 = memref.load %arg1[%c65] : memref<162xf32, #tpu.memory_space<smem>>
    %310 = vector.broadcast %309 : f32 to vector<2x224xf32>
    %311 = arith.mulf %300, %310 : vector<2x224xf32>
    %312 = arith.addf %286, %311 : vector<2x224xf32>
    %c92 = arith.constant 92 : index
    %313 = memref.load %arg1[%c92] : memref<162xf32, #tpu.memory_space<smem>>
    %314 = vector.broadcast %313 : f32 to vector<2x224xf32>
    %315 = arith.mulf %300, %314 : vector<2x224xf32>
    %316 = arith.addf %290, %315 : vector<2x224xf32>
    %c119 = arith.constant 119 : index
    %317 = memref.load %arg1[%c119] : memref<162xf32, #tpu.memory_space<smem>>
    %318 = vector.broadcast %317 : f32 to vector<2x224xf32>
    %319 = arith.mulf %300, %318 : vector<2x224xf32>
    %320 = arith.addf %294, %319 : vector<2x224xf32>
    %c146 = arith.constant 146 : index
    %321 = memref.load %arg1[%c146] : memref<162xf32, #tpu.memory_space<smem>>
    %322 = vector.broadcast %321 : f32 to vector<2x224xf32>
    %323 = arith.mulf %300, %322 : vector<2x224xf32>
    %324 = arith.addf %298, %323 : vector<2x224xf32>
    %325 = vector.extract_strided_slice %0 {offsets = [0, 1, 16], sizes = [2, 1, 224], strides = [1, 1, 1]} : vector<2x3x258xf32> to vector<2x1x224xf32>
    %326 = vector.shape_cast %325 : vector<2x1x224xf32> to vector<2x224xf32>
    %c12 = arith.constant 12 : index
    %327 = memref.load %arg1[%c12] : memref<162xf32, #tpu.memory_space<smem>>
    %328 = vector.broadcast %327 : f32 to vector<2x224xf32>
    %329 = arith.mulf %326, %328 : vector<2x224xf32>
    %330 = arith.addf %304, %329 : vector<2x224xf32>
    %c39 = arith.constant 39 : index
    %331 = memref.load %arg1[%c39] : memref<162xf32, #tpu.memory_space<smem>>
    %332 = vector.broadcast %331 : f32 to vector<2x224xf32>
    %333 = arith.mulf %326, %332 : vector<2x224xf32>
    %334 = arith.addf %308, %333 : vector<2x224xf32>
    %c66 = arith.constant 66 : index
    %335 = memref.load %arg1[%c66] : memref<162xf32, #tpu.memory_space<smem>>
    %336 = vector.broadcast %335 : f32 to vector<2x224xf32>
    %337 = arith.mulf %326, %336 : vector<2x224xf32>
    %338 = arith.addf %312, %337 : vector<2x224xf32>
    %c93 = arith.constant 93 : index
    %339 = memref.load %arg1[%c93] : memref<162xf32, #tpu.memory_space<smem>>
    %340 = vector.broadcast %339 : f32 to vector<2x224xf32>
    %341 = arith.mulf %326, %340 : vector<2x224xf32>
    %342 = arith.addf %316, %341 : vector<2x224xf32>
    %c120 = arith.constant 120 : index
    %343 = memref.load %arg1[%c120] : memref<162xf32, #tpu.memory_space<smem>>
    %344 = vector.broadcast %343 : f32 to vector<2x224xf32>
    %345 = arith.mulf %326, %344 : vector<2x224xf32>
    %346 = arith.addf %320, %345 : vector<2x224xf32>
    %c147 = arith.constant 147 : index
    %347 = memref.load %arg1[%c147] : memref<162xf32, #tpu.memory_space<smem>>
    %348 = vector.broadcast %347 : f32 to vector<2x224xf32>
    %349 = arith.mulf %326, %348 : vector<2x224xf32>
    %350 = arith.addf %324, %349 : vector<2x224xf32>
    %351 = vector.extract_strided_slice %0 {offsets = [0, 1, 17], sizes = [2, 1, 224], strides = [1, 1, 1]} : vector<2x3x258xf32> to vector<2x1x224xf32>
    %352 = vector.shape_cast %351 : vector<2x1x224xf32> to vector<2x224xf32>
    %c13 = arith.constant 13 : index
    %353 = memref.load %arg1[%c13] : memref<162xf32, #tpu.memory_space<smem>>
    %354 = vector.broadcast %353 : f32 to vector<2x224xf32>
    %355 = arith.mulf %352, %354 : vector<2x224xf32>
    %356 = arith.addf %330, %355 : vector<2x224xf32>
    %c40 = arith.constant 40 : index
    %357 = memref.load %arg1[%c40] : memref<162xf32, #tpu.memory_space<smem>>
    %358 = vector.broadcast %357 : f32 to vector<2x224xf32>
    %359 = arith.mulf %352, %358 : vector<2x224xf32>
    %360 = arith.addf %334, %359 : vector<2x224xf32>
    %c67 = arith.constant 67 : index
    %361 = memref.load %arg1[%c67] : memref<162xf32, #tpu.memory_space<smem>>
    %362 = vector.broadcast %361 : f32 to vector<2x224xf32>
    %363 = arith.mulf %352, %362 : vector<2x224xf32>
    %364 = arith.addf %338, %363 : vector<2x224xf32>
    %c94 = arith.constant 94 : index
    %365 = memref.load %arg1[%c94] : memref<162xf32, #tpu.memory_space<smem>>
    %366 = vector.broadcast %365 : f32 to vector<2x224xf32>
    %367 = arith.mulf %352, %366 : vector<2x224xf32>
    %368 = arith.addf %342, %367 : vector<2x224xf32>
    %c121 = arith.constant 121 : index
    %369 = memref.load %arg1[%c121] : memref<162xf32, #tpu.memory_space<smem>>
    %370 = vector.broadcast %369 : f32 to vector<2x224xf32>
    %371 = arith.mulf %352, %370 : vector<2x224xf32>
    %372 = arith.addf %346, %371 : vector<2x224xf32>
    %c148 = arith.constant 148 : index
    %373 = memref.load %arg1[%c148] : memref<162xf32, #tpu.memory_space<smem>>
    %374 = vector.broadcast %373 : f32 to vector<2x224xf32>
    %375 = arith.mulf %352, %374 : vector<2x224xf32>
    %376 = arith.addf %350, %375 : vector<2x224xf32>
    %377 = vector.extract_strided_slice %0 {offsets = [0, 1, 18], sizes = [2, 1, 224], strides = [1, 1, 1]} : vector<2x3x258xf32> to vector<2x1x224xf32>
    %378 = vector.shape_cast %377 : vector<2x1x224xf32> to vector<2x224xf32>
    %c14 = arith.constant 14 : index
    %379 = memref.load %arg1[%c14] : memref<162xf32, #tpu.memory_space<smem>>
    %380 = vector.broadcast %379 : f32 to vector<2x224xf32>
    %381 = arith.mulf %378, %380 : vector<2x224xf32>
    %382 = arith.addf %356, %381 : vector<2x224xf32>
    %c41 = arith.constant 41 : index
    %383 = memref.load %arg1[%c41] : memref<162xf32, #tpu.memory_space<smem>>
    %384 = vector.broadcast %383 : f32 to vector<2x224xf32>
    %385 = arith.mulf %378, %384 : vector<2x224xf32>
    %386 = arith.addf %360, %385 : vector<2x224xf32>
    %c68 = arith.constant 68 : index
    %387 = memref.load %arg1[%c68] : memref<162xf32, #tpu.memory_space<smem>>
    %388 = vector.broadcast %387 : f32 to vector<2x224xf32>
    %389 = arith.mulf %378, %388 : vector<2x224xf32>
    %390 = arith.addf %364, %389 : vector<2x224xf32>
    %c95 = arith.constant 95 : index
    %391 = memref.load %arg1[%c95] : memref<162xf32, #tpu.memory_space<smem>>
    %392 = vector.broadcast %391 : f32 to vector<2x224xf32>
    %393 = arith.mulf %378, %392 : vector<2x224xf32>
    %394 = arith.addf %368, %393 : vector<2x224xf32>
    %c122 = arith.constant 122 : index
    %395 = memref.load %arg1[%c122] : memref<162xf32, #tpu.memory_space<smem>>
    %396 = vector.broadcast %395 : f32 to vector<2x224xf32>
    %397 = arith.mulf %378, %396 : vector<2x224xf32>
    %398 = arith.addf %372, %397 : vector<2x224xf32>
    %c149 = arith.constant 149 : index
    %399 = memref.load %arg1[%c149] : memref<162xf32, #tpu.memory_space<smem>>
    %400 = vector.broadcast %399 : f32 to vector<2x224xf32>
    %401 = arith.mulf %378, %400 : vector<2x224xf32>
    %402 = arith.addf %376, %401 : vector<2x224xf32>
    %403 = vector.extract_strided_slice %0 {offsets = [0, 1, 32], sizes = [2, 1, 224], strides = [1, 1, 1]} : vector<2x3x258xf32> to vector<2x1x224xf32>
    %404 = vector.shape_cast %403 : vector<2x1x224xf32> to vector<2x224xf32>
    %c15 = arith.constant 15 : index
    %405 = memref.load %arg1[%c15] : memref<162xf32, #tpu.memory_space<smem>>
    %406 = vector.broadcast %405 : f32 to vector<2x224xf32>
    %407 = arith.mulf %404, %406 : vector<2x224xf32>
    %408 = arith.addf %382, %407 : vector<2x224xf32>
    %c42 = arith.constant 42 : index
    %409 = memref.load %arg1[%c42] : memref<162xf32, #tpu.memory_space<smem>>
    %410 = vector.broadcast %409 : f32 to vector<2x224xf32>
    %411 = arith.mulf %404, %410 : vector<2x224xf32>
    %412 = arith.addf %386, %411 : vector<2x224xf32>
    %c69 = arith.constant 69 : index
    %413 = memref.load %arg1[%c69] : memref<162xf32, #tpu.memory_space<smem>>
    %414 = vector.broadcast %413 : f32 to vector<2x224xf32>
    %415 = arith.mulf %404, %414 : vector<2x224xf32>
    %416 = arith.addf %390, %415 : vector<2x224xf32>
    %c96 = arith.constant 96 : index
    %417 = memref.load %arg1[%c96] : memref<162xf32, #tpu.memory_space<smem>>
    %418 = vector.broadcast %417 : f32 to vector<2x224xf32>
    %419 = arith.mulf %404, %418 : vector<2x224xf32>
    %420 = arith.addf %394, %419 : vector<2x224xf32>
    %c123 = arith.constant 123 : index
    %421 = memref.load %arg1[%c123] : memref<162xf32, #tpu.memory_space<smem>>
    %422 = vector.broadcast %421 : f32 to vector<2x224xf32>
    %423 = arith.mulf %404, %422 : vector<2x224xf32>
    %424 = arith.addf %398, %423 : vector<2x224xf32>
    %c150 = arith.constant 150 : index
    %425 = memref.load %arg1[%c150] : memref<162xf32, #tpu.memory_space<smem>>
    %426 = vector.broadcast %425 : f32 to vector<2x224xf32>
    %427 = arith.mulf %404, %426 : vector<2x224xf32>
    %428 = arith.addf %402, %427 : vector<2x224xf32>
    %429 = vector.extract_strided_slice %0 {offsets = [0, 1, 33], sizes = [2, 1, 224], strides = [1, 1, 1]} : vector<2x3x258xf32> to vector<2x1x224xf32>
    %430 = vector.shape_cast %429 : vector<2x1x224xf32> to vector<2x224xf32>
    %c16 = arith.constant 16 : index
    %431 = memref.load %arg1[%c16] : memref<162xf32, #tpu.memory_space<smem>>
    %432 = vector.broadcast %431 : f32 to vector<2x224xf32>
    %433 = arith.mulf %430, %432 : vector<2x224xf32>
    %434 = arith.addf %408, %433 : vector<2x224xf32>
    %c43 = arith.constant 43 : index
    %435 = memref.load %arg1[%c43] : memref<162xf32, #tpu.memory_space<smem>>
    %436 = vector.broadcast %435 : f32 to vector<2x224xf32>
    %437 = arith.mulf %430, %436 : vector<2x224xf32>
    %438 = arith.addf %412, %437 : vector<2x224xf32>
    %c70 = arith.constant 70 : index
    %439 = memref.load %arg1[%c70] : memref<162xf32, #tpu.memory_space<smem>>
    %440 = vector.broadcast %439 : f32 to vector<2x224xf32>
    %441 = arith.mulf %430, %440 : vector<2x224xf32>
    %442 = arith.addf %416, %441 : vector<2x224xf32>
    %c97 = arith.constant 97 : index
    %443 = memref.load %arg1[%c97] : memref<162xf32, #tpu.memory_space<smem>>
    %444 = vector.broadcast %443 : f32 to vector<2x224xf32>
    %445 = arith.mulf %430, %444 : vector<2x224xf32>
    %446 = arith.addf %420, %445 : vector<2x224xf32>
    %c124 = arith.constant 124 : index
    %447 = memref.load %arg1[%c124] : memref<162xf32, #tpu.memory_space<smem>>
    %448 = vector.broadcast %447 : f32 to vector<2x224xf32>
    %449 = arith.mulf %430, %448 : vector<2x224xf32>
    %450 = arith.addf %424, %449 : vector<2x224xf32>
    %c151 = arith.constant 151 : index
    %451 = memref.load %arg1[%c151] : memref<162xf32, #tpu.memory_space<smem>>
    %452 = vector.broadcast %451 : f32 to vector<2x224xf32>
    %453 = arith.mulf %430, %452 : vector<2x224xf32>
    %454 = arith.addf %428, %453 : vector<2x224xf32>
    %455 = vector.extract_strided_slice %0 {offsets = [0, 1, 34], sizes = [2, 1, 224], strides = [1, 1, 1]} : vector<2x3x258xf32> to vector<2x1x224xf32>
    %456 = vector.shape_cast %455 : vector<2x1x224xf32> to vector<2x224xf32>
    %c17 = arith.constant 17 : index
    %457 = memref.load %arg1[%c17] : memref<162xf32, #tpu.memory_space<smem>>
    %458 = vector.broadcast %457 : f32 to vector<2x224xf32>
    %459 = arith.mulf %456, %458 : vector<2x224xf32>
    %460 = arith.addf %434, %459 : vector<2x224xf32>
    %c44 = arith.constant 44 : index
    %461 = memref.load %arg1[%c44] : memref<162xf32, #tpu.memory_space<smem>>
    %462 = vector.broadcast %461 : f32 to vector<2x224xf32>
    %463 = arith.mulf %456, %462 : vector<2x224xf32>
    %464 = arith.addf %438, %463 : vector<2x224xf32>
    %c71 = arith.constant 71 : index
    %465 = memref.load %arg1[%c71] : memref<162xf32, #tpu.memory_space<smem>>
    %466 = vector.broadcast %465 : f32 to vector<2x224xf32>
    %467 = arith.mulf %456, %466 : vector<2x224xf32>
    %468 = arith.addf %442, %467 : vector<2x224xf32>
    %c98 = arith.constant 98 : index
    %469 = memref.load %arg1[%c98] : memref<162xf32, #tpu.memory_space<smem>>
    %470 = vector.broadcast %469 : f32 to vector<2x224xf32>
    %471 = arith.mulf %456, %470 : vector<2x224xf32>
    %472 = arith.addf %446, %471 : vector<2x224xf32>
    %c125 = arith.constant 125 : index
    %473 = memref.load %arg1[%c125] : memref<162xf32, #tpu.memory_space<smem>>
    %474 = vector.broadcast %473 : f32 to vector<2x224xf32>
    %475 = arith.mulf %456, %474 : vector<2x224xf32>
    %476 = arith.addf %450, %475 : vector<2x224xf32>
    %c152 = arith.constant 152 : index
    %477 = memref.load %arg1[%c152] : memref<162xf32, #tpu.memory_space<smem>>
    %478 = vector.broadcast %477 : f32 to vector<2x224xf32>
    %479 = arith.mulf %456, %478 : vector<2x224xf32>
    %480 = arith.addf %454, %479 : vector<2x224xf32>
    %481 = vector.extract_strided_slice %0 {offsets = [0, 2, 0], sizes = [2, 1, 224], strides = [1, 1, 1]} : vector<2x3x258xf32> to vector<2x1x224xf32>
    %482 = vector.shape_cast %481 : vector<2x1x224xf32> to vector<2x224xf32>
    %c18 = arith.constant 18 : index
    %483 = memref.load %arg1[%c18] : memref<162xf32, #tpu.memory_space<smem>>
    %484 = vector.broadcast %483 : f32 to vector<2x224xf32>
    %485 = arith.mulf %482, %484 : vector<2x224xf32>
    %486 = arith.addf %460, %485 : vector<2x224xf32>
    %c45 = arith.constant 45 : index
    %487 = memref.load %arg1[%c45] : memref<162xf32, #tpu.memory_space<smem>>
    %488 = vector.broadcast %487 : f32 to vector<2x224xf32>
    %489 = arith.mulf %482, %488 : vector<2x224xf32>
    %490 = arith.addf %464, %489 : vector<2x224xf32>
    %c72 = arith.constant 72 : index
    %491 = memref.load %arg1[%c72] : memref<162xf32, #tpu.memory_space<smem>>
    %492 = vector.broadcast %491 : f32 to vector<2x224xf32>
    %493 = arith.mulf %482, %492 : vector<2x224xf32>
    %494 = arith.addf %468, %493 : vector<2x224xf32>
    %c99 = arith.constant 99 : index
    %495 = memref.load %arg1[%c99] : memref<162xf32, #tpu.memory_space<smem>>
    %496 = vector.broadcast %495 : f32 to vector<2x224xf32>
    %497 = arith.mulf %482, %496 : vector<2x224xf32>
    %498 = arith.addf %472, %497 : vector<2x224xf32>
    %c126 = arith.constant 126 : index
    %499 = memref.load %arg1[%c126] : memref<162xf32, #tpu.memory_space<smem>>
    %500 = vector.broadcast %499 : f32 to vector<2x224xf32>
    %501 = arith.mulf %482, %500 : vector<2x224xf32>
    %502 = arith.addf %476, %501 : vector<2x224xf32>
    %c153 = arith.constant 153 : index
    %503 = memref.load %arg1[%c153] : memref<162xf32, #tpu.memory_space<smem>>
    %504 = vector.broadcast %503 : f32 to vector<2x224xf32>
    %505 = arith.mulf %482, %504 : vector<2x224xf32>
    %506 = arith.addf %480, %505 : vector<2x224xf32>
    %507 = vector.extract_strided_slice %0 {offsets = [0, 2, 1], sizes = [2, 1, 224], strides = [1, 1, 1]} : vector<2x3x258xf32> to vector<2x1x224xf32>
    %508 = vector.shape_cast %507 : vector<2x1x224xf32> to vector<2x224xf32>
    %c19 = arith.constant 19 : index
    %509 = memref.load %arg1[%c19] : memref<162xf32, #tpu.memory_space<smem>>
    %510 = vector.broadcast %509 : f32 to vector<2x224xf32>
    %511 = arith.mulf %508, %510 : vector<2x224xf32>
    %512 = arith.addf %486, %511 : vector<2x224xf32>
    %c46 = arith.constant 46 : index
    %513 = memref.load %arg1[%c46] : memref<162xf32, #tpu.memory_space<smem>>
    %514 = vector.broadcast %513 : f32 to vector<2x224xf32>
    %515 = arith.mulf %508, %514 : vector<2x224xf32>
    %516 = arith.addf %490, %515 : vector<2x224xf32>
    %c73 = arith.constant 73 : index
    %517 = memref.load %arg1[%c73] : memref<162xf32, #tpu.memory_space<smem>>
    %518 = vector.broadcast %517 : f32 to vector<2x224xf32>
    %519 = arith.mulf %508, %518 : vector<2x224xf32>
    %520 = arith.addf %494, %519 : vector<2x224xf32>
    %c100 = arith.constant 100 : index
    %521 = memref.load %arg1[%c100] : memref<162xf32, #tpu.memory_space<smem>>
    %522 = vector.broadcast %521 : f32 to vector<2x224xf32>
    %523 = arith.mulf %508, %522 : vector<2x224xf32>
    %524 = arith.addf %498, %523 : vector<2x224xf32>
    %c127 = arith.constant 127 : index
    %525 = memref.load %arg1[%c127] : memref<162xf32, #tpu.memory_space<smem>>
    %526 = vector.broadcast %525 : f32 to vector<2x224xf32>
    %527 = arith.mulf %508, %526 : vector<2x224xf32>
    %528 = arith.addf %502, %527 : vector<2x224xf32>
    %c154 = arith.constant 154 : index
    %529 = memref.load %arg1[%c154] : memref<162xf32, #tpu.memory_space<smem>>
    %530 = vector.broadcast %529 : f32 to vector<2x224xf32>
    %531 = arith.mulf %508, %530 : vector<2x224xf32>
    %532 = arith.addf %506, %531 : vector<2x224xf32>
    %533 = vector.extract_strided_slice %0 {offsets = [0, 2, 2], sizes = [2, 1, 224], strides = [1, 1, 1]} : vector<2x3x258xf32> to vector<2x1x224xf32>
    %534 = vector.shape_cast %533 : vector<2x1x224xf32> to vector<2x224xf32>
    %c20 = arith.constant 20 : index
    %535 = memref.load %arg1[%c20] : memref<162xf32, #tpu.memory_space<smem>>
    %536 = vector.broadcast %535 : f32 to vector<2x224xf32>
    %537 = arith.mulf %534, %536 : vector<2x224xf32>
    %538 = arith.addf %512, %537 : vector<2x224xf32>
    %c47 = arith.constant 47 : index
    %539 = memref.load %arg1[%c47] : memref<162xf32, #tpu.memory_space<smem>>
    %540 = vector.broadcast %539 : f32 to vector<2x224xf32>
    %541 = arith.mulf %534, %540 : vector<2x224xf32>
    %542 = arith.addf %516, %541 : vector<2x224xf32>
    %c74 = arith.constant 74 : index
    %543 = memref.load %arg1[%c74] : memref<162xf32, #tpu.memory_space<smem>>
    %544 = vector.broadcast %543 : f32 to vector<2x224xf32>
    %545 = arith.mulf %534, %544 : vector<2x224xf32>
    %546 = arith.addf %520, %545 : vector<2x224xf32>
    %c101 = arith.constant 101 : index
    %547 = memref.load %arg1[%c101] : memref<162xf32, #tpu.memory_space<smem>>
    %548 = vector.broadcast %547 : f32 to vector<2x224xf32>
    %549 = arith.mulf %534, %548 : vector<2x224xf32>
    %550 = arith.addf %524, %549 : vector<2x224xf32>
    %c128 = arith.constant 128 : index
    %551 = memref.load %arg1[%c128] : memref<162xf32, #tpu.memory_space<smem>>
    %552 = vector.broadcast %551 : f32 to vector<2x224xf32>
    %553 = arith.mulf %534, %552 : vector<2x224xf32>
    %554 = arith.addf %528, %553 : vector<2x224xf32>
    %c155 = arith.constant 155 : index
    %555 = memref.load %arg1[%c155] : memref<162xf32, #tpu.memory_space<smem>>
    %556 = vector.broadcast %555 : f32 to vector<2x224xf32>
    %557 = arith.mulf %534, %556 : vector<2x224xf32>
    %558 = arith.addf %532, %557 : vector<2x224xf32>
    %559 = vector.extract_strided_slice %0 {offsets = [0, 2, 16], sizes = [2, 1, 224], strides = [1, 1, 1]} : vector<2x3x258xf32> to vector<2x1x224xf32>
    %560 = vector.shape_cast %559 : vector<2x1x224xf32> to vector<2x224xf32>
    %c21 = arith.constant 21 : index
    %561 = memref.load %arg1[%c21] : memref<162xf32, #tpu.memory_space<smem>>
    %562 = vector.broadcast %561 : f32 to vector<2x224xf32>
    %563 = arith.mulf %560, %562 : vector<2x224xf32>
    %564 = arith.addf %538, %563 : vector<2x224xf32>
    %c48 = arith.constant 48 : index
    %565 = memref.load %arg1[%c48] : memref<162xf32, #tpu.memory_space<smem>>
    %566 = vector.broadcast %565 : f32 to vector<2x224xf32>
    %567 = arith.mulf %560, %566 : vector<2x224xf32>
    %568 = arith.addf %542, %567 : vector<2x224xf32>
    %c75 = arith.constant 75 : index
    %569 = memref.load %arg1[%c75] : memref<162xf32, #tpu.memory_space<smem>>
    %570 = vector.broadcast %569 : f32 to vector<2x224xf32>
    %571 = arith.mulf %560, %570 : vector<2x224xf32>
    %572 = arith.addf %546, %571 : vector<2x224xf32>
    %c102 = arith.constant 102 : index
    %573 = memref.load %arg1[%c102] : memref<162xf32, #tpu.memory_space<smem>>
    %574 = vector.broadcast %573 : f32 to vector<2x224xf32>
    %575 = arith.mulf %560, %574 : vector<2x224xf32>
    %576 = arith.addf %550, %575 : vector<2x224xf32>
    %c129 = arith.constant 129 : index
    %577 = memref.load %arg1[%c129] : memref<162xf32, #tpu.memory_space<smem>>
    %578 = vector.broadcast %577 : f32 to vector<2x224xf32>
    %579 = arith.mulf %560, %578 : vector<2x224xf32>
    %580 = arith.addf %554, %579 : vector<2x224xf32>
    %c156 = arith.constant 156 : index
    %581 = memref.load %arg1[%c156] : memref<162xf32, #tpu.memory_space<smem>>
    %582 = vector.broadcast %581 : f32 to vector<2x224xf32>
    %583 = arith.mulf %560, %582 : vector<2x224xf32>
    %584 = arith.addf %558, %583 : vector<2x224xf32>
    %585 = vector.extract_strided_slice %0 {offsets = [0, 2, 17], sizes = [2, 1, 224], strides = [1, 1, 1]} : vector<2x3x258xf32> to vector<2x1x224xf32>
    %586 = vector.shape_cast %585 : vector<2x1x224xf32> to vector<2x224xf32>
    %c22 = arith.constant 22 : index
    %587 = memref.load %arg1[%c22] : memref<162xf32, #tpu.memory_space<smem>>
    %588 = vector.broadcast %587 : f32 to vector<2x224xf32>
    %589 = arith.mulf %586, %588 : vector<2x224xf32>
    %590 = arith.addf %564, %589 : vector<2x224xf32>
    %c49 = arith.constant 49 : index
    %591 = memref.load %arg1[%c49] : memref<162xf32, #tpu.memory_space<smem>>
    %592 = vector.broadcast %591 : f32 to vector<2x224xf32>
    %593 = arith.mulf %586, %592 : vector<2x224xf32>
    %594 = arith.addf %568, %593 : vector<2x224xf32>
    %c76 = arith.constant 76 : index
    %595 = memref.load %arg1[%c76] : memref<162xf32, #tpu.memory_space<smem>>
    %596 = vector.broadcast %595 : f32 to vector<2x224xf32>
    %597 = arith.mulf %586, %596 : vector<2x224xf32>
    %598 = arith.addf %572, %597 : vector<2x224xf32>
    %c103 = arith.constant 103 : index
    %599 = memref.load %arg1[%c103] : memref<162xf32, #tpu.memory_space<smem>>
    %600 = vector.broadcast %599 : f32 to vector<2x224xf32>
    %601 = arith.mulf %586, %600 : vector<2x224xf32>
    %602 = arith.addf %576, %601 : vector<2x224xf32>
    %c130 = arith.constant 130 : index
    %603 = memref.load %arg1[%c130] : memref<162xf32, #tpu.memory_space<smem>>
    %604 = vector.broadcast %603 : f32 to vector<2x224xf32>
    %605 = arith.mulf %586, %604 : vector<2x224xf32>
    %606 = arith.addf %580, %605 : vector<2x224xf32>
    %c157 = arith.constant 157 : index
    %607 = memref.load %arg1[%c157] : memref<162xf32, #tpu.memory_space<smem>>
    %608 = vector.broadcast %607 : f32 to vector<2x224xf32>
    %609 = arith.mulf %586, %608 : vector<2x224xf32>
    %610 = arith.addf %584, %609 : vector<2x224xf32>
    %611 = vector.extract_strided_slice %0 {offsets = [0, 2, 18], sizes = [2, 1, 224], strides = [1, 1, 1]} : vector<2x3x258xf32> to vector<2x1x224xf32>
    %612 = vector.shape_cast %611 : vector<2x1x224xf32> to vector<2x224xf32>
    %c23 = arith.constant 23 : index
    %613 = memref.load %arg1[%c23] : memref<162xf32, #tpu.memory_space<smem>>
    %614 = vector.broadcast %613 : f32 to vector<2x224xf32>
    %615 = arith.mulf %612, %614 : vector<2x224xf32>
    %616 = arith.addf %590, %615 : vector<2x224xf32>
    %c50 = arith.constant 50 : index
    %617 = memref.load %arg1[%c50] : memref<162xf32, #tpu.memory_space<smem>>
    %618 = vector.broadcast %617 : f32 to vector<2x224xf32>
    %619 = arith.mulf %612, %618 : vector<2x224xf32>
    %620 = arith.addf %594, %619 : vector<2x224xf32>
    %c77 = arith.constant 77 : index
    %621 = memref.load %arg1[%c77] : memref<162xf32, #tpu.memory_space<smem>>
    %622 = vector.broadcast %621 : f32 to vector<2x224xf32>
    %623 = arith.mulf %612, %622 : vector<2x224xf32>
    %624 = arith.addf %598, %623 : vector<2x224xf32>
    %c104 = arith.constant 104 : index
    %625 = memref.load %arg1[%c104] : memref<162xf32, #tpu.memory_space<smem>>
    %626 = vector.broadcast %625 : f32 to vector<2x224xf32>
    %627 = arith.mulf %612, %626 : vector<2x224xf32>
    %628 = arith.addf %602, %627 : vector<2x224xf32>
    %c131 = arith.constant 131 : index
    %629 = memref.load %arg1[%c131] : memref<162xf32, #tpu.memory_space<smem>>
    %630 = vector.broadcast %629 : f32 to vector<2x224xf32>
    %631 = arith.mulf %612, %630 : vector<2x224xf32>
    %632 = arith.addf %606, %631 : vector<2x224xf32>
    %c158 = arith.constant 158 : index
    %633 = memref.load %arg1[%c158] : memref<162xf32, #tpu.memory_space<smem>>
    %634 = vector.broadcast %633 : f32 to vector<2x224xf32>
    %635 = arith.mulf %612, %634 : vector<2x224xf32>
    %636 = arith.addf %610, %635 : vector<2x224xf32>
    %637 = vector.extract_strided_slice %0 {offsets = [0, 2, 32], sizes = [2, 1, 224], strides = [1, 1, 1]} : vector<2x3x258xf32> to vector<2x1x224xf32>
    %638 = vector.shape_cast %637 : vector<2x1x224xf32> to vector<2x224xf32>
    %c24 = arith.constant 24 : index
    %639 = memref.load %arg1[%c24] : memref<162xf32, #tpu.memory_space<smem>>
    %640 = vector.broadcast %639 : f32 to vector<2x224xf32>
    %641 = arith.mulf %638, %640 : vector<2x224xf32>
    %642 = arith.addf %616, %641 : vector<2x224xf32>
    %c51 = arith.constant 51 : index
    %643 = memref.load %arg1[%c51] : memref<162xf32, #tpu.memory_space<smem>>
    %644 = vector.broadcast %643 : f32 to vector<2x224xf32>
    %645 = arith.mulf %638, %644 : vector<2x224xf32>
    %646 = arith.addf %620, %645 : vector<2x224xf32>
    %c78 = arith.constant 78 : index
    %647 = memref.load %arg1[%c78] : memref<162xf32, #tpu.memory_space<smem>>
    %648 = vector.broadcast %647 : f32 to vector<2x224xf32>
    %649 = arith.mulf %638, %648 : vector<2x224xf32>
    %650 = arith.addf %624, %649 : vector<2x224xf32>
    %c105 = arith.constant 105 : index
    %651 = memref.load %arg1[%c105] : memref<162xf32, #tpu.memory_space<smem>>
    %652 = vector.broadcast %651 : f32 to vector<2x224xf32>
    %653 = arith.mulf %638, %652 : vector<2x224xf32>
    %654 = arith.addf %628, %653 : vector<2x224xf32>
    %c132 = arith.constant 132 : index
    %655 = memref.load %arg1[%c132] : memref<162xf32, #tpu.memory_space<smem>>
    %656 = vector.broadcast %655 : f32 to vector<2x224xf32>
    %657 = arith.mulf %638, %656 : vector<2x224xf32>
    %658 = arith.addf %632, %657 : vector<2x224xf32>
    %c159 = arith.constant 159 : index
    %659 = memref.load %arg1[%c159] : memref<162xf32, #tpu.memory_space<smem>>
    %660 = vector.broadcast %659 : f32 to vector<2x224xf32>
    %661 = arith.mulf %638, %660 : vector<2x224xf32>
    %662 = arith.addf %636, %661 : vector<2x224xf32>
    %663 = vector.extract_strided_slice %0 {offsets = [0, 2, 33], sizes = [2, 1, 224], strides = [1, 1, 1]} : vector<2x3x258xf32> to vector<2x1x224xf32>
    %664 = vector.shape_cast %663 : vector<2x1x224xf32> to vector<2x224xf32>
    %c25 = arith.constant 25 : index
    %665 = memref.load %arg1[%c25] : memref<162xf32, #tpu.memory_space<smem>>
    %666 = vector.broadcast %665 : f32 to vector<2x224xf32>
    %667 = arith.mulf %664, %666 : vector<2x224xf32>
    %668 = arith.addf %642, %667 : vector<2x224xf32>
    %c52 = arith.constant 52 : index
    %669 = memref.load %arg1[%c52] : memref<162xf32, #tpu.memory_space<smem>>
    %670 = vector.broadcast %669 : f32 to vector<2x224xf32>
    %671 = arith.mulf %664, %670 : vector<2x224xf32>
    %672 = arith.addf %646, %671 : vector<2x224xf32>
    %c79 = arith.constant 79 : index
    %673 = memref.load %arg1[%c79] : memref<162xf32, #tpu.memory_space<smem>>
    %674 = vector.broadcast %673 : f32 to vector<2x224xf32>
    %675 = arith.mulf %664, %674 : vector<2x224xf32>
    %676 = arith.addf %650, %675 : vector<2x224xf32>
    %c106 = arith.constant 106 : index
    %677 = memref.load %arg1[%c106] : memref<162xf32, #tpu.memory_space<smem>>
    %678 = vector.broadcast %677 : f32 to vector<2x224xf32>
    %679 = arith.mulf %664, %678 : vector<2x224xf32>
    %680 = arith.addf %654, %679 : vector<2x224xf32>
    %c133 = arith.constant 133 : index
    %681 = memref.load %arg1[%c133] : memref<162xf32, #tpu.memory_space<smem>>
    %682 = vector.broadcast %681 : f32 to vector<2x224xf32>
    %683 = arith.mulf %664, %682 : vector<2x224xf32>
    %684 = arith.addf %658, %683 : vector<2x224xf32>
    %c160 = arith.constant 160 : index
    %685 = memref.load %arg1[%c160] : memref<162xf32, #tpu.memory_space<smem>>
    %686 = vector.broadcast %685 : f32 to vector<2x224xf32>
    %687 = arith.mulf %664, %686 : vector<2x224xf32>
    %688 = arith.addf %662, %687 : vector<2x224xf32>
    %689 = vector.extract_strided_slice %0 {offsets = [0, 2, 34], sizes = [2, 1, 224], strides = [1, 1, 1]} : vector<2x3x258xf32> to vector<2x1x224xf32>
    %690 = vector.shape_cast %689 : vector<2x1x224xf32> to vector<2x224xf32>
    %c26 = arith.constant 26 : index
    %691 = memref.load %arg1[%c26] : memref<162xf32, #tpu.memory_space<smem>>
    %692 = vector.broadcast %691 : f32 to vector<2x224xf32>
    %693 = arith.mulf %690, %692 : vector<2x224xf32>
    %694 = arith.addf %668, %693 : vector<2x224xf32>
    %c53 = arith.constant 53 : index
    %695 = memref.load %arg1[%c53] : memref<162xf32, #tpu.memory_space<smem>>
    %696 = vector.broadcast %695 : f32 to vector<2x224xf32>
    %697 = arith.mulf %690, %696 : vector<2x224xf32>
    %698 = arith.addf %672, %697 : vector<2x224xf32>
    %c80 = arith.constant 80 : index
    %699 = memref.load %arg1[%c80] : memref<162xf32, #tpu.memory_space<smem>>
    %700 = vector.broadcast %699 : f32 to vector<2x224xf32>
    %701 = arith.mulf %690, %700 : vector<2x224xf32>
    %702 = arith.addf %676, %701 : vector<2x224xf32>
    %c107 = arith.constant 107 : index
    %703 = memref.load %arg1[%c107] : memref<162xf32, #tpu.memory_space<smem>>
    %704 = vector.broadcast %703 : f32 to vector<2x224xf32>
    %705 = arith.mulf %690, %704 : vector<2x224xf32>
    %706 = arith.addf %680, %705 : vector<2x224xf32>
    %c134 = arith.constant 134 : index
    %707 = memref.load %arg1[%c134] : memref<162xf32, #tpu.memory_space<smem>>
    %708 = vector.broadcast %707 : f32 to vector<2x224xf32>
    %709 = arith.mulf %690, %708 : vector<2x224xf32>
    %710 = arith.addf %684, %709 : vector<2x224xf32>
    %c161 = arith.constant 161 : index
    %711 = memref.load %arg1[%c161] : memref<162xf32, #tpu.memory_space<smem>>
    %712 = vector.broadcast %711 : f32 to vector<2x224xf32>
    %713 = arith.mulf %690, %712 : vector<2x224xf32>
    %714 = arith.addf %688, %713 : vector<2x224xf32>
    %715 = vector.shape_cast %694 : vector<2x224xf32> to vector<2x1x224xf32>
    %716 = vector.shape_cast %698 : vector<2x224xf32> to vector<2x1x224xf32>
    %717 = vector.shape_cast %702 : vector<2x224xf32> to vector<2x1x224xf32>
    %718 = vector.shape_cast %706 : vector<2x224xf32> to vector<2x1x224xf32>
    %719 = vector.shape_cast %710 : vector<2x224xf32> to vector<2x1x224xf32>
    %720 = vector.shape_cast %714 : vector<2x224xf32> to vector<2x1x224xf32>
    %721 = tpu.concatenate %715, %716, %717, %718, %719, %720 in 1 : vector<2x1x224xf32>, vector<2x1x224xf32>, vector<2x1x224xf32>, vector<2x1x224xf32>, vector<2x1x224xf32>, vector<2x1x224xf32> -> vector<2x6x224xf32>
    %c0_9 = arith.constant 0 : index
    %c0_10 = arith.constant 0 : index
    %c0_11 = arith.constant 0 : index
    %722 = vector.load %arg3[%c0_9, %c0_10, %c0_11] : memref<2x6x224xf32, #tpu.memory_space<vmem>>, vector<2x6x224xf32>
    tpu.vector_store %arg3[%c0_9, %c0_10, %c0_11], %721 {strides = array<i32>} : memref<2x6x224xf32, #tpu.memory_space<vmem>>, vector<2x6x224xf32>,
    return
  }
}

</mosaic_0001>

<bundles_post_ra>
// kernel: tpu_custom_call.1
= control target key start
LH: loop header
LB: loop body
LE: loop exit
PB: predicated region body
PF: predicated region fallthrough
CT: control target
= control target key end

     0   :  { %8 = vsyncpa [#allocation3], 0  ;;  %s8180_s0 = inlined_call_operand.vmem [shape: f32[2,3,258], index: 0, kind: input, shape index: {}]   ;;  %s8181_s1 = inlined_call_operand.vmem [shape: f32[162], index: 1, kind: input, shape index: {}]   ;;  %s8182_s2 = inlined_call_operand.vmem [shape: f32[6], index: 2, kind: input, shape index: {}]   ;;  %s8183_s3 = inlined_call_operand.vmem [shape: f32[2,6,224], index: 3, kind: output, shape index: {}]  }
   0x1   :  { %s18_s14 = sshll.u32 %s8181_s1, 4  ;;  %s19_s14 = int_to_ptr.vmem [resolvable:$true] %s18_s14 }
   0x2   :  { %9 = vsyncpa [#allocation5], 0  ;;  %s28_s17 = sshll.u32 %s8182_s2, 4  ;;  %s4393_s18 = scalar_lea.vmem %s19_s14, 32  ;;  %s29_s17 = int_to_ptr.vmem [resolvable:$true] %s28_s17 }
   0x3   :  { %p4394_p0 = scmp.ne.s32.totalorder %s19_s14, %s4393_s18  ;;  %p4398_p1 = scmp.lt.s32.totalorder %s19_s14, %s19_s14 }
   0x4   :  { %p4399_p2 = scmp.lt.s32.totalorder %s4393_s18, %s4393_s18 }
   0x6   :  { %p4400_p3 = por %p4399_p2, %p4398_p1 }
   0x8   :  { %p4401_p4 = pnand %p4400_p3, %p4394_p0 }
   0xa   :  { %4404 = shalt.err (!%p4401_p4)
}
   0xb   :  { %s4421_s19 = smov [#allocation2]   ;;  %s4405_s20 = scalar_lea.vmem %s29_s17, 16 }
   0xc   :  { %21 = dma.vmem_to_smem %s19_s14, 32, %s4421_s19, [#allocation3]  }
   0xd   :  { %p4406_p5 = scmp.ne.s32.totalorder %s29_s17, %s4405_s20  ;;  %p4410_p6 = scmp.lt.s32.totalorder %s29_s17, %s29_s17 }
   0xe   :  { %p4411_p7 = scmp.lt.s32.totalorder %s4405_s20, %s4405_s20 }
  0x10   :  { %p4412_p8 = por %p4411_p7, %p4410_p6 }
  0x12   :  { %p4413_p9 = pnand %p4412_p8, %p4406_p5 }
  0x14   :  { %4416 = shalt.err (!%p4413_p9)
}
  0x15   :  { %s4422_s1 = smov [#allocation4]  }
  0x16   :  { %31 = dma.vmem_to_smem %s29_s17, 16, %s4422_s1, [#allocation5]  }
  0x17   :  { %4417 = dma.done.wait [#allocation3], 32  }
  0x18   :  { %4418 = vsyncadd [#allocation3], 4294967264 }
  0x19   :  { %4419 = dma.done.wait [#allocation5], 16  }
  0x1a   :  { %4420 = vsyncadd [#allocation5], 4294967280 }
  0x1b   :  { %38 = sfence }
  0x1c   :  { %s3950_s2 = sld [smem:[#allocation2 + $0x1c]]  ;;  %s3949_s21 = sld [smem:[#allocation2 + $0x1]]  ;;  %v4460_v0 = vld [vmem:[%s8180_s0] sm:$0x77]  ;;  %v4465_v1 = vld [vmem:[%s8180_s0 + $0xc] sm:$0x77] }
  0x1d   :  { %s3951_s22 = sld [smem:[#allocation2 + $0x37]]  ;;  %s3952_s27 = sld [smem:[#allocation2 + $0x52]]  ;;  %vm103_vm0 = vcmask 1039360   ;;  %vm212_vm1 = vcmask 1031168   ;;  %vm321_vm2 = vcmask 916480   ;;  %vm430_vm3 = vcmask 908288  }
  0x1e   :  { %s4423_s28 = smov 127   ;;  %s3953_s29 = sld [smem:[#allocation2 + $0x6d]]  ;;  %vm539_vm4 = vcmask 900096   ;;  %vm648_vm5 = vcmask 785408   ;;  %vm767_vm6 = vcmask 1043456   ;;  %vm769_vm7 = vcmask 777216  }
  0x1f   :  { %s3954_s30 = sld [smem:[#allocation2 + $0x88]]  ;;  %s3955_s4 = sld [smem:[#allocation2 + $0x2]]  ;;  %vm950_vm8 = vcmask 769024   ;;  %vm3904_vm9 = vcmask 1040384   ;;  %vm3909_vm10 = vcmask 1041408   ;;  %vm3914_vm11 = vcmask 1042432  }
  0x20   :  { %s3956_s5 = sld [smem:[#allocation2 + $0x1d]]  ;;  %s3957_s6 = sld [smem:[#allocation2 + $0x38]]  ;;  %vm3923_vm12 = vcmask 1044480   ;;  %vm3929_vm13 = vcmask 783360  }
  0x21   :  { %s3958_s7 = sld [smem:[#allocation2 + $0x53]]  ;;  %s4424_s8 = smov 126  }
  0x22   :  { %v111_v2 = vstv %s3950_s2  ;;  %v92_v3 = vstv %s3949_s21  ;;  %s3959_s9 = sld [smem:[#allocation2 + $0x6e]]  ;;  %s3960_s10 = sld [smem:[#allocation2 + $0x89]] }
  0x23   :  { %v112_v4 = vmul.f32 %v111_v2, %v4460_v0  ;;  %v93_v5 = vmul.f32 %v92_v3, %v4460_v0  ;;  %v113_v6 = vmul.f32 %v111_v2, %v4465_v1  ;;  %v94_v7 = vmul.f32 %v92_v3, %v4465_v1  ;;  %s3961_s11 = sld [smem:[#allocation2 + $0x3]]  ;;  %s3962_s12 = sld [smem:[#allocation2 + $0x1e]] }
  0x24   :  { %v129_v8 = vstv %s3951_s22  ;;  %v147_v11 = vstv %s3952_s27  ;;  %v165_v14 = vstv %s3953_s29  ;;  %s3963_s13 = sld [smem:[#allocation2 + $0x39]]  ;;  %s3964_s14 = sld [smem:[#allocation2 + $0x54]] }
  0x25   :  { %116 = vrot.lane.b32.xlu1 %v112_v4, %s4423_s28  ;;  %97 = vrot.lane.b32.xlu0 %v93_v5, %s4423_s28  ;;  %v131_v9 = vmul.f32 %v129_v8, %v4465_v1  ;;  %v130_v10 = vmul.f32 %v129_v8, %v4460_v0  ;;  %v149_v12 = vmul.f32 %v147_v11, %v4465_v1  ;;  %v183_v17 = vstv %s3954_s30  ;;  %s4425_s15 = smov 112   ;;  %s3965_s16 = sld [smem:[#allocation2 + $0x6f]] }
  0x26   :  { %v148_v13 = vmul.f32 %v147_v11, %v4460_v0  ;;  %v167_v15 = vmul.f32 %v165_v14, %v4465_v1  ;;  %v166_v16 = vmul.f32 %v165_v14, %v4460_v0  ;;  %v185_v18 = vmul.f32 %v183_v17, %v4465_v1  ;;  %s3966_s17 = sld [smem:[#allocation2 + $0x8a]]  ;;  %s3967_s18 = sld [smem:[#allocation2 + $0x4]] }
  0x27   :  { %v184_v19 = vmul.f32 %v183_v17, %v4460_v0  ;;  %v201_v20 = vstv %s3955_s4  ;;  %v220_v23 = vstv %s3956_s5  ;;  %v238_v26 = vstv %s3957_s6  ;;  %s3968_s19 = sld [smem:[#allocation2 + $0x1f]]  ;;  %s3969_s20 = sld [smem:[#allocation2 + $0x3a]] }
  0x28   :  { %v203_v21 = vmul.f32 %v201_v20, %v4465_v1  ;;  %v202_v22 = vmul.f32 %v201_v20, %v4460_v0  ;;  %v222_v24 = vmul.f32 %v220_v23, %v4465_v1  ;;  %v221_v25 = vmul.f32 %v220_v23, %v4460_v0  ;;  %s3970_s1 = sld [smem:[#allocation2 + $0x55]]  ;;  %s4426_s2 = smov 111  }
  0x29   :  { %118 = vrot.lane.b32.xlu1 %v113_v6, %s4423_s28  ;;  %99 = vrot.lane.b32.xlu0 %v94_v7, %s4423_s28  ;;  %v240_v27 = vmul.f32 %v238_v26, %v4465_v1  ;;  %v239_v28 = vmul.f32 %v238_v26, %v4460_v0  ;;  %v256_v29 = vstv %s3958_s7  ;;  %v274_v32 = vstv %s3959_s9  ;;  %s3971_s21 = sld [smem:[#allocation2 + $0x70]]  ;;  %s3972_s22 = sld [smem:[#allocation2 + $0x8b]] }
  0x2a   :  { %v258_v30 = vmul.f32 %v256_v29, %v4465_v1  ;;  %v257_v31 = vmul.f32 %v256_v29, %v4460_v0  ;;  %v276_v33 = vmul.f32 %v274_v32, %v4465_v1  ;;  %v275_v34 = vmul.f32 %v274_v32, %v4460_v0  ;;  %s3973_s23 = sld [smem:[#allocation2 + $0x5]]  ;;  %s3974_s24 = sld [smem:[#allocation2 + $0x20]] }
  0x2b   :  { %v292_v35 = vstv %s3960_s10  ;;  %v310_v38 = vstv %s3961_s11  ;;  %v329_v41 = vstv %s3962_s12  ;;  %v347_v44 = vstv %s3963_s13  ;;  %s3975_s25 = sld [smem:[#allocation2 + $0x3b]]  ;;  %s3976_s26 = sld [smem:[#allocation2 + $0x56]] }
  0x2c   :  { %v294_v36 = vmul.f32 %v292_v35, %v4465_v1  ;;  %v293_v37 = vmul.f32 %v292_v35, %v4460_v0  ;;  %v312_v39 = vmul.f32 %v310_v38, %v4465_v1  ;;  %v311_v40 = vmul.f32 %v310_v38, %v4460_v0  ;;  %s4427_s27 = smov 110   ;;  %s3977_s29 = sld [smem:[#allocation2 + $0x71]] }
  0x2d   :  { %136 = vrot.lane.b32.xlu1 %v131_v9, %s4423_s28  ;;  %134 = vrot.lane.b32.xlu0 %v130_v10, %s4423_s28  ;;  %v331_v42 = vmul.f32 %v329_v41, %v4465_v1  ;;  %v330_v43 = vmul.f32 %v329_v41, %v4460_v0  ;;  %v349_v45 = vmul.f32 %v347_v44, %v4465_v1  ;;  %v365_v47 = vstv %s3964_s14  ;;  %s3978_s30 = sld [smem:[#allocation2 + $0x8c]]  ;;  %s3979_s4 = sld [smem:[#allocation2 + $0x6]] }
  0x2e   :  { %v348_v46 = vmul.f32 %v347_v44, %v4460_v0  ;;  %v367_v48 = vmul.f32 %v365_v47, %v4465_v1  ;;  %v366_v49 = vmul.f32 %v365_v47, %v4460_v0  ;;  %v383_v50 = vstv %s3965_s16  ;;  %s3980_s5 = sld [smem:[#allocation2 + $0x21]]  ;;  %s3981_s6 = sld [smem:[#allocation2 + $0x3c]] }
  0x2f   :  { %v385_v51 = vmul.f32 %v383_v50, %v4465_v1  ;;  %v384_v52 = vmul.f32 %v383_v50, %v4460_v0  ;;  %v401_v53 = vstv %s3966_s17  ;;  %v419_v56 = vstv %s3967_s18  ;;  %s3982_s7 = sld [smem:[#allocation2 + $0x57]]  ;;  %s4428_s9 = smov 96  }
  0x30   :  { %v403_v54 = vmul.f32 %v401_v53, %v4465_v1  ;;  %v402_v55 = vmul.f32 %v401_v53, %v4460_v0  ;;  %v421_v57 = vmul.f32 %v419_v56, %v4465_v1  ;;  %v420_v58 = vmul.f32 %v419_v56, %v4460_v0  ;;  %s3983_s10 = sld [smem:[#allocation2 + $0x72]]  ;;  %s3984_s11 = sld [smem:[#allocation2 + $0x8d]] }
  0x31   :  { %154 = vrot.lane.b32.xlu1 %v149_v12, %s4423_s28  ;;  %152 = vrot.lane.b32.xlu0 %v148_v13, %s4423_s28  ;;  %v438_v59 = vstv %s3968_s19  ;;  %v456_v62 = vstv %s3969_s20  ;;  %s3985_s12 = sld [smem:[#allocation2 + $0x7]]  ;;  %s3986_s16 = sld [smem:[#allocation2 + $0x22]] }
  0x32   :  { %v440_v60 = vmul.f32 %v438_v59, %v4465_v1  ;;  %v439_v61 = vmul.f32 %v438_v59, %v4460_v0  ;;  %v458_v63 = vmul.f32 %v456_v62, %v4465_v1  ;;  %v457_v2 = vmul.f32 %v456_v62, %v4460_v0  ;;  %s4429_s19 = smov 95   ;;  %s3987_s20 = sld [smem:[#allocation2 + $0x3d]] }
  0x33   :  { %v474_v3 = vstv %s3970_s1  ;;  %v492_v6 = vstv %s3971_s21  ;;  %v510_v9 = vstv %s3972_s22  ;;  %v528_v12 = vstv %s3973_s23  ;;  %s3988_s1 = sld [smem:[#allocation2 + $0x58]]  ;;  %s3989_s21 = sld [smem:[#allocation2 + $0x73]] }
  0x34   :  { %v476_v4 = vmul.f32 %v474_v3, %v4465_v1  ;;  %v475_v5 = vmul.f32 %v474_v3, %v4460_v0  ;;  %v494_v7 = vmul.f32 %v492_v6, %v4465_v1  ;;  %v493_v8 = vmul.f32 %v492_v6, %v4460_v0  ;;  %s3990_s22 = sld [smem:[#allocation2 + $0x8e]]  ;;  %s3991_s23 = sld [smem:[#allocation2 + $0x8]] }
  0x35   :  { %172 = vrot.lane.b32.xlu1 %v167_v15, %s4423_s28  ;;  %170 = vrot.lane.b32.xlu0 %v166_v16, %s4423_s28  ;;  %v512_v10 = vmul.f32 %v510_v9, %v4465_v1  ;;  %v511_v11 = vmul.f32 %v510_v9, %v4460_v0  ;;  %v530_v13 = vmul.f32 %v528_v12, %v4465_v1  ;;  %v547_v15 = vstv %s3974_s24  ;;  %s3992_s24 = sld [smem:[#allocation2 + $0x23]]  ;;  %s4036_s14 = sld [smem:[#allocation2 + $0x26]] }
  0x36   :  { %v529_v14 = vmul.f32 %v528_v12, %v4460_v0  ;;  %v549_v16 = vmul.f32 %v547_v15, %v4465_v1  ;;  %v548_v17 = vmul.f32 %v547_v15, %v4460_v0  ;;  %v656_v35 = vstv %s3980_s5  ;;  %s4015_s5 = sld [smem:[#allocation2 + $0xa]]  ;;  %s4033_s13 = sld [smem:[#allocation2 + $0xb]] }
  0x37   :  { %v658_v38 = vmul.f32 %v656_v35, %v4465_v1  ;;  %v710_v50 = vstv %s3983_s10  ;;  %v778_v9 = vstv %s3986_s16  ;;  %s4024_s10 = sld [smem:[#allocation2 + $0x5b]]  ;;  %s4039_s16 = sld [smem:[#allocation2 + $0x41]] }
  0x38   :  { %v712_v53 = vmul.f32 %v710_v50, %v4465_v1  ;;  %s4042_s17 = sld [smem:[#allocation2 + $0x5c]]  ;;  %s4045_s18 = sld [smem:[#allocation2 + $0x77]] }
  0x39   :  { %190 = vrot.lane.b32.xlu1 %v185_v18, %s4423_s28  ;;  %188 = vrot.lane.b32.xlu0 %v184_v19, %s4423_s28  ;;  %v565_v18 = vstv %s3975_s25  ;;  %s4430_s25 = smov 94  }
  0x3a   :  { %v567_v19 = vmul.f32 %v565_v18, %v4465_v1  ;;  %v566_v20 = vmul.f32 %v565_v18, %v4460_v0  ;;  %v808_v18 = vstv %s3987_s20  ;;  %s4901_s20 = sld [smem:[#allocation2 + $0x92]] }
  0x3d   :  { %208 = vrot.lane.b32.xlu1 %v203_v21, %s4424_s8  ;;  %206 = vrot.lane.b32.xlu0 %v202_v22, %s4424_s8  ;;  %v583_v21 = vstv %s3976_s26  ;;  %s3993_s26 = sld [smem:[#allocation2 + $0x3e]] }
  0x3e   :  { %v585_v22 = vmul.f32 %v583_v21, %v4465_v1  ;;  %v584_v23 = vmul.f32 %v583_v21, %v4460_v0 }
  0x41   :  { %227 = vrot.lane.b32.xlu1 %v222_v24, %s4424_s8  ;;  %225 = vrot.lane.b32.xlu0 %v221_v25, %s4424_s8  ;;  %v601_v24 = vstv %s3977_s29  ;;  %s3994_s29 = sld [smem:[#allocation2 + $0x59]] }
  0x42   :  { %v603_v25 = vmul.f32 %v601_v24, %v4465_v1  ;;  %v602_v26 = vmul.f32 %v601_v24, %v4460_v0 }
  0x45   :  { %245 = vrot.lane.b32.xlu1 %v240_v27, %s4424_s8  ;;  %243 = vrot.lane.b32.xlu0 %v239_v28, %s4424_s8  ;;  %v619_v27 = vstv %s3978_s30  ;;  %s3995_s30 = sld [smem:[#allocation2 + $0x74]] }
  0x46   :  { %v621_v28 = vmul.f32 %v619_v27, %v4465_v1  ;;  %v620_v29 = vmul.f32 %v619_v27, %v4460_v0  ;;  %v838_v27 = vstv %s3988_s1  ;;  %s4051_s1 = sld [smem:[#allocation2 + $0xc]] }
  0x49   :  { %263 = vrot.lane.b32.xlu1 %v258_v30, %s4424_s8  ;;  %261 = vrot.lane.b32.xlu0 %v257_v31, %s4424_s8  ;;  %v637_v30 = vstv %s3979_s4  ;;  %s3996_s4 = sld [smem:[#allocation2 + $0x8f]] }
  0x4d   :  { %281 = vrot.lane.b32.xlu1 %v276_v33, %s4424_s8  ;;  %279 = vrot.lane.b32.xlu0 %v275_v34, %s4424_s8  ;;  %v639_v33 = vmul.f32 %v637_v30, %v4465_v1  ;;  %v638_v34 = vmul.f32 %v637_v30, %v4460_v0 }
  0x51   :  { %299 = vrot.lane.b32.xlu1 %v294_v36, %s4424_s8  ;;  %297 = vrot.lane.b32.xlu0 %v293_v37, %s4424_s8 }
  0x55   :  { %317 = vrot.lane.b32.xlu1 %v312_v39, %s4425_s15  ;;  %315 = vrot.lane.b32.xlu0 %v311_v40, %s4425_s15  ;;  %v657_v39 = vmul.f32 %v656_v35, %v4460_v0  ;;  %v674_v40 = vstv %s3981_s6  ;;  %s4018_s6 = sld [smem:[#allocation2 + $0x25]] }
  0x56   :  { %v675_v44 = vmul.f32 %v674_v40, %v4460_v0 }
  0x59   :  { %336 = vrot.lane.b32.xlu1 %v331_v42, %s4425_s15  ;;  %334 = vrot.lane.b32.xlu0 %v330_v43, %s4425_s15  ;;  %v676_v43 = vmul.f32 %v674_v40, %v4465_v1  ;;  %v868_v40 = vstv %s3989_s21  ;;  %s4054_s21 = sld [smem:[#allocation2 + $0x27]] }
  0x5d   :  { %354 = vrot.lane.b32.xlu1 %v349_v45, %s4425_s15  ;;  %352 = vrot.lane.b32.xlu0 %v348_v46, %s4425_s15  ;;  %v692_v45 = vstv %s3982_s7  ;;  %s4021_s7 = sld [smem:[#allocation2 + $0x40]] }
  0x61   :  { %372 = vrot.lane.b32.xlu1 %v367_v48, %s4425_s15  ;;  %370 = vrot.lane.b32.xlu0 %v366_v49, %s4425_s15  ;;  %v694_v48 = vmul.f32 %v692_v45, %v4465_v1  ;;  %v693_v49 = vmul.f32 %v692_v45, %v4460_v0 }
  0x65   :  { %390 = vrot.lane.b32.xlu1 %v385_v51, %s4425_s15  ;;  %388 = vrot.lane.b32.xlu0 %v384_v52, %s4425_s15 }
  0x69   :  { %408 = vrot.lane.b32.xlu1 %v403_v54, %s4425_s15  ;;  %406 = vrot.lane.b32.xlu0 %v402_v55, %s4425_s15  ;;  %v711_v54 = vmul.f32 %v710_v50, %v4460_v0  ;;  %v728_v55 = vstv %s3984_s11  ;;  %s4027_s11 = sld [smem:[#allocation2 + $0x76]] }
  0x6a   :  { %v729_v59 = vmul.f32 %v728_v55, %v4460_v0 }
  0x6d   :  { %426 = vrot.lane.b32.xlu1 %v421_v57, %s4426_s2  ;;  %424 = vrot.lane.b32.xlu0 %v420_v58, %s4426_s2  ;;  %v730_v58 = vmul.f32 %v728_v55, %v4465_v1  ;;  %v898_v55 = vstv %s3990_s22  ;;  %s5074_s22 = sld [smem:[#allocation2 + $0x1b]] }
  0x71   :  { %445 = vrot.lane.b32.xlu1 %v440_v60, %s4426_s2  ;;  %443 = vrot.lane.b32.xlu0 %v439_v61, %s4426_s2  ;;  %v4636_v60 = vld [vmem:[%s8180_s0 + $0x8] sm:$0x7]  ;;  %v746_v61 = vstv %s3985_s12  ;;  %s4030_s12 = sld [smem:[#allocation2 + $0x91]] }
  0x72   :  { %v747_v3 = vmul.f32 %v746_v61, %v4460_v0  ;;  %v780_v12 = vmul.f32 %v778_v9, %v4636_v60  ;;  %v810_v21 = vmul.f32 %v808_v18, %v4636_v60  ;;  %v840_v30 = vmul.f32 %v838_v27, %v4636_v60 }
  0x73   :  { %v870_v45 = vmul.f32 %v868_v40, %v4636_v60 }
  0x75   :  { %463 = vrot.lane.b32.xlu1 %v458_v63, %s4426_s2  ;;  %461 = vrot.lane.b32.xlu0 %v457_v2, %s4426_s2  ;;  %v748_v2 = vmul.f32 %v746_v61, %v4636_v60 }
  0x79   :  { %481 = vrot.lane.b32.xlu1 %v476_v4, %s4426_s2  ;;  %479 = vrot.lane.b32.xlu0 %v475_v5, %s4426_s2  ;;  %v4649_v4 = vld [vmem:[%s8180_s0 + $0x14] sm:$0x7] }
  0x7d   :  { %499 = vrot.lane.b32.xlu1 %v494_v7, %s4426_s2  ;;  %497 = vrot.lane.b32.xlu0 %v493_v8, %s4426_s2  ;;  %v750_v7 = vmul.f32 %v746_v61, %v4649_v4  ;;  %v749_v8 = vmul.f32 %v746_v61, %v4465_v1  ;;  %v900_v61 = vmul.f32 %v898_v55, %v4636_v60 }
  0x81   :  { %517 = vrot.lane.b32.xlu1 %v512_v10, %s4426_s2  ;;  %515 = vrot.lane.b32.xlu0 %v511_v11, %s4426_s2 }
  0x85   :  { %535 = vrot.lane.b32.xlu1 %v530_v13, %s4427_s27  ;;  %533 = vrot.lane.b32.xlu0 %v529_v14, %s4427_s27  ;;  %v779_v13 = vmul.f32 %v778_v9, %v4460_v0 }
  0x89   :  { %554 = vrot.lane.b32.xlu1 %v549_v16, %s4427_s27  ;;  %552 = vrot.lane.b32.xlu0 %v548_v17, %s4427_s27  ;;  %v782_v16 = vmul.f32 %v778_v9, %v4649_v4  ;;  %v781_v17 = vmul.f32 %v778_v9, %v4465_v1  ;;  %v901_v9 = vmul.f32 %v898_v55, %v4465_v1 }
  0x8d   :  { %572 = vrot.lane.b32.xlu1 %v567_v19, %s4427_s27  ;;  %570 = vrot.lane.b32.xlu0 %v566_v20, %s4427_s27 }
  0x91   :  { %590 = vrot.lane.b32.xlu1 %v585_v22, %s4427_s27  ;;  %588 = vrot.lane.b32.xlu0 %v584_v23, %s4427_s27  ;;  %v809_v22 = vmul.f32 %v808_v18, %v4460_v0 }
  0x95   :  { %608 = vrot.lane.b32.xlu1 %v603_v25, %s4427_s27  ;;  %606 = vrot.lane.b32.xlu0 %v602_v26, %s4427_s27  ;;  %v812_v25 = vmul.f32 %v808_v18, %v4649_v4  ;;  %v811_v26 = vmul.f32 %v808_v18, %v4465_v1 }
  0x97   :  { %v4585_v31 = vpop.permute.xlu1 %116  ;;  %v4587_v32 = vpop.permute.xlu0 %97 }
  0x99   :  { %626 = vrot.lane.b32.xlu1 %v621_v28, %s4427_s27  ;;  %624 = vrot.lane.b32.xlu0 %v620_v29, %s4427_s27 }
  0x9b   :  { %v4593_v36 = vpop.permute.xlu1 %118  ;;  %v4595_v37 = vpop.permute.xlu0 %99 }
  0x9d   :  { %644 = vrot.lane.b32.xlu1 %v639_v33, %s4428_s9  ;;  %642 = vrot.lane.b32.xlu0 %v638_v34, %s4428_s9  ;;  %v839_v33 = vmul.f32 %v838_v27, %v4460_v0 }
  0x9f   :  { %v4601_v41 = vpop.permute.xlu1 %136  ;;  %v4603_v42 = vpop.permute.xlu0 %134 }
  0xa1   :  { %663 = vrot.lane.b32.xlu1 %v658_v38, %s4428_s9  ;;  %661 = vrot.lane.b32.xlu0 %v657_v39, %s4428_s9  ;;  %v842_v38 = vmul.f32 %v838_v27, %v4649_v4  ;;  %v841_v39 = vmul.f32 %v838_v27, %v4465_v1  ;;  %v959_v27 = vstv %s3992_s24  ;;  %s5083_s24 = sld [smem:[#allocation2]] }
  0xa3   :  { %v4609_v46 = vpop.permute.xlu1 %154  ;;  %v4611_v47 = vpop.permute.xlu0 %152 }
  0xa5   :  { %681 = vrot.lane.b32.xlu1 %v676_v43, %s4428_s9  ;;  %679 = vrot.lane.b32.xlu0 %v675_v44, %s4428_s9 }
  0xa7   :  { %v4617_v51 = vpop.permute.xlu1 %172  ;;  %v4619_v52 = vpop.permute.xlu0 %170 }
  0xa9   :  { %699 = vrot.lane.b32.xlu1 %v694_v48, %s4428_s9  ;;  %697 = vrot.lane.b32.xlu0 %v693_v49, %s4428_s9  ;;  %v869_v48 = vmul.f32 %v868_v40, %v4460_v0 }
  0xab   :  { %v4625_v56 = vpop.permute.xlu1 %190  ;;  %v4627_v57 = vpop.permute.xlu0 %188 }
  0xad   :  { %717 = vrot.lane.b32.xlu1 %v712_v53, %s4428_s9  ;;  %715 = vrot.lane.b32.xlu0 %v711_v54, %s4428_s9  ;;  %v872_v53 = vmul.f32 %v868_v40, %v4649_v4  ;;  %v871_v54 = vmul.f32 %v868_v40, %v4465_v1 }
  0xaf   :  { %v4638_v62 = vpop.permute.xlu1 %208  ;;  %v4640_v63 = vpop.permute.xlu0 %206 }
  0xb1   :  { %735 = vrot.lane.b32.xlu1 %v730_v58, %s4428_s9  ;;  %733 = vrot.lane.b32.xlu0 %v729_v59, %s4428_s9 }
  0xb3   :  { %v4651_v5 = vpop.permute.xlu1 %227  ;;  %v4653_v6 = vpop.permute.xlu0 %225 }
  0xb5   :  { %757 = vrot.lane.b32.xlu1 %v748_v2, %s4429_s19  ;;  %755 = vrot.lane.b32.xlu0 %v747_v3, %s4429_s19  ;;  %v899_v2 = vmul.f32 %v898_v55, %v4460_v0 }
  0xb7   :  { %v4659_v10 = vpop.permute.xlu1 %245  ;;  %v4661_v11 = vpop.permute.xlu0 %243 }
  0xb9   :  { %761 = vrot.lane.b32.xlu1 %v750_v7, %s4429_s19  ;;  %759 = vrot.lane.b32.xlu0 %v749_v8, %s4429_s19  ;;  %v902_v8 = vmul.f32 %v898_v55, %v4649_v4 }
  0xbb   :  { %v4667_v14 = vpop.permute.xlu1 %263  ;;  %v4669_v15 = vpop.permute.xlu0 %261 }
  0xbd   :  { %789 = vrot.lane.b32.xlu1 %v780_v12, %s4429_s19  ;;  %787 = vrot.lane.b32.xlu0 %v779_v13, %s4429_s19  ;;  %v928_v12 = vstv %s3991_s23  ;;  %s5081_s23 = sld [smem:[#allocation2 + $0x2a]] }
  0xbe   :  { %v929_v18 = vmul.f32 %v928_v12, %v4460_v0 }
  0xbf   :  { %v4675_v19 = vpop.permute.xlu1 %281  ;;  %v4677_v20 = vpop.permute.xlu0 %279 }
  0xc1   :  { %793 = vrot.lane.b32.xlu1 %v782_v16, %s4429_s19  ;;  %791 = vrot.lane.b32.xlu0 %v781_v17, %s4429_s19  ;;  %v930_v17 = vmul.f32 %v928_v12, %v4636_v60 }
  0xc3   :  { %v4683_v23 = vpop.permute.xlu1 %299  ;;  %v4685_v24 = vpop.permute.xlu0 %297 }
  0xc5   :  { %819 = vrot.lane.b32.xlu1 %v810_v21, %s4429_s19  ;;  %817 = vrot.lane.b32.xlu0 %v809_v22, %s4429_s19 }
  0xc7   :  { %v4691_v28 = vpop.permute.xlu1 %317  ;;  %v4693_v29 = vpop.permute.xlu0 %315 }
  0xc9   :  { %823 = vrot.lane.b32.xlu1 %v812_v25, %s4429_s19  ;;  %821 = vrot.lane.b32.xlu0 %v811_v26, %s4429_s19  ;;  %v932_v25 = vmul.f32 %v928_v12, %v4649_v4  ;;  %v931_v26 = vmul.f32 %v928_v12, %v4465_v1 }
  0xcb   :  { %v4699_v34 = vpop.permute.xlu1 %336  ;;  %v4701_v35 = vpop.permute.xlu0 %334 }
  0xcd   :  { %849 = vrot.lane.b32.xlu1 %v840_v30, %s4429_s19  ;;  %847 = vrot.lane.b32.xlu0 %v839_v33, %s4429_s19 }
  0xcf   :  { %v4707_v43 = vpop.permute.xlu1 %354  ;;  %v4709_v44 = vpop.permute.xlu0 %352 }
  0xd1   :  { %853 = vrot.lane.b32.xlu1 %v842_v38, %s4429_s19  ;;  %851 = vrot.lane.b32.xlu0 %v841_v39, %s4429_s19  ;;  %v961_v38 = vmul.f32 %v959_v27, %v4636_v60  ;;  %v960_v39 = vmul.f32 %v959_v27, %v4460_v0 }
  0xd3   :  { %v4715_v49 = vpop.permute.xlu1 %372  ;;  %v4717_v50 = vpop.permute.xlu0 %370 }
  0xd4   :  { %8380 = vst [vmem:[#allocation8_spill] sm:$0xff] %v4715_v49  ;;  %8381 = vst [vmem:[#allocation9_spill] sm:$0xff] %v4717_v50 }
  0xd5   :  { %879 = vrot.lane.b32.xlu1 %v870_v45, %s4429_s19  ;;  %877 = vrot.lane.b32.xlu0 %v869_v48, %s4429_s19  ;;  %v963_v48 = vmul.f32 %v959_v27, %v4649_v4 }
  0xd7   :  { %v4723_v58 = vpop.permute.xlu1 %390  ;;  %v4725_v59 = vpop.permute.xlu0 %388 }
  0xd8   :  { %8382 = vst [vmem:[#allocation10_spill] sm:$0xff] %v4723_v58  ;;  %8383 = vst [vmem:[#allocation11_spill] sm:$0xff] %v4725_v59 }
  0xd9   :  { %883 = vrot.lane.b32.xlu1 %v872_v53, %s4429_s19  ;;  %881 = vrot.lane.b32.xlu0 %v871_v54, %s4429_s19  ;;  %v962_v53 = vmul.f32 %v959_v27, %v4465_v1  ;;  %v989_v54 = vstv %s3993_s26  ;;  %s5089_s26 = sld [smem:[#allocation4 + $0x1]] }
  0xdb   :  { %v4731_v3 = vpop.permute.xlu1 %408  ;;  %v4733_v7 = vpop.permute.xlu0 %406 }
  0xdc   :  { %8384 = vst [vmem:[#allocation12_spill] sm:$0xff] %v4731_v3  ;;  %8385 = vst [vmem:[#allocation13_spill] sm:$0xff] %v4733_v7  ;;  %v101_v3 = vrot.slane %v4587_v32, 4 }
  0xdd   :  { %909 = vrot.lane.b32.xlu1 %v900_v61, %s4429_s19  ;;  %907 = vrot.lane.b32.xlu0 %v899_v2, %s4429_s19  ;;  %v991_v2 = vmul.f32 %v989_v54, %v4636_v60 }
  0xdf   :  { %v4739_v13 = vpop.permute.xlu1 %426  ;;  %v4741_v16 = vpop.permute.xlu0 %424 }
  0xe0   :  { %8386 = vst [vmem:[#allocation14_spill] sm:$0xff] %v4739_v13  ;;  %8387 = vst [vmem:[#allocation15_spill] sm:$0xff] %v4741_v16 }
  0xe1   :  { %913 = vrot.lane.b32.xlu1 %v902_v8, %s4429_s19  ;;  %911 = vrot.lane.b32.xlu0 %v901_v9, %s4429_s19  ;;  %v990_v8 = vmul.f32 %v989_v54, %v4460_v0 }
  0xe3   :  { %v4747_v21 = vpop.permute.xlu1 %445  ;;  %v4749_v22 = vpop.permute.xlu0 %443 }
  0xe4   :  { %8388 = vst [vmem:[#allocation16_spill] sm:$0xff] %v4747_v21  ;;  %8389 = vst [vmem:[#allocation17_spill] sm:$0xff] %v4749_v22 }
  0xe5   :  { %939 = vrot.lane.b32.xlu1 %v930_v17, %s4430_s25  ;;  %937 = vrot.lane.b32.xlu0 %v929_v18, %s4430_s25  ;;  %v993_v17 = vmul.f32 %v989_v54, %v4649_v4  ;;  %v992_v18 = vmul.f32 %v989_v54, %v4465_v1 }
  0xe7   :  { %v4755_v30 = vpop.permute.xlu1 %463  ;;  %v4757_v33 = vpop.permute.xlu0 %461 }
  0xe8   :  { %8390 = vst [vmem:[#allocation18_spill] sm:$0xff] %v4755_v30  ;;  %8391 = vst [vmem:[#allocation19_spill] sm:$0xff] %v4757_v33 }
  0xe9   :  { %943 = vrot.lane.b32.xlu1 %v932_v25, %s4430_s25  ;;  %941 = vrot.lane.b32.xlu0 %v931_v26, %s4430_s25  ;;  %v1019_v25 = vstv %s3994_s29  ;;  %s4057_s29 = sld [smem:[#allocation2 + $0x42]] }
  0xea   :  { %v1023_v54 = vmul.f32 %v1019_v25, %v4649_v4 }
  0xeb   :  { %v4763_v40 = vpop.permute.xlu1 %481  ;;  %v4765_v45 = vpop.permute.xlu0 %479 }
  0xec   :  { %8392 = vst [vmem:[#allocation20_spill] sm:$0xff] %v4763_v40  ;;  %8393 = vst [vmem:[#allocation21_spill] sm:$0xff] %v4765_v45 }
  0xed   :  { %970 = vrot.lane.b32.xlu1 %v961_v38, %s4430_s25  ;;  %968 = vrot.lane.b32.xlu0 %v960_v39, %s4430_s25  ;;  %v1021_v38 = vmul.f32 %v1019_v25, %v4636_v60  ;;  %v1020_v39 = vmul.f32 %v1019_v25, %v4460_v0 }
  0xef   :  { %v4771_v55 = vpop.permute.xlu1 %499  ;;  %v4773_v61 = vpop.permute.xlu0 %497 }
  0xf0   :  { %8394 = vst [vmem:[#allocation22_spill] sm:$0xff] %v4771_v55  ;;  %8395 = vst [vmem:[#allocation23_spill] sm:$0xff] %v4773_v61 }
  0xf1   :  { %974 = vrot.lane.b32.xlu1 %v963_v48, %s4430_s25  ;;  %972 = vrot.lane.b32.xlu0 %v962_v53, %s4430_s25 }
  0xf3   :  { %v4779_v9 = vpop.permute.xlu1 %517  ;;  %v4781_v12 = vpop.permute.xlu0 %515 }
  0xf4   :  { %8396 = vst [vmem:[#allocation24_spill] sm:$0xff] %v4779_v9  ;;  %8397 = vst [vmem:[#allocation25_spill] sm:$0xff] %v4781_v12 }
  0xf5   :  { %1000 = vrot.lane.b32.xlu1 %v991_v2, %s4430_s25  ;;  %998 = vrot.lane.b32.xlu0 %v990_v8, %s4430_s25  ;;  %v1022_v2 = vmul.f32 %v1019_v25, %v4465_v1  ;;  %v1049_v8 = vstv %s3995_s30  ;;  %s4060_s30 = sld [smem:[#allocation2 + $0x5d]] }
  0xf6   :  { %v1053_v25 = vmul.f32 %v1049_v8, %v4649_v4 }
  0xf7   :  { %v4787_v26 = vpop.permute.xlu1 %535  ;;  %v4789_v27 = vpop.permute.xlu0 %533 }
  0xf8   :  { %8398 = vst [vmem:[#allocation26_spill] sm:$0xff] %v4787_v26  ;;  %8399 = vst [vmem:[#allocation27_spill] sm:$0xff] %v4789_v27 }
  0xf9   :  { %1004 = vrot.lane.b32.xlu1 %v993_v17, %s4430_s25  ;;  %1002 = vrot.lane.b32.xlu0 %v992_v18, %s4430_s25 }
  0xfb   :  { %v4795_v48 = vpop.permute.xlu1 %554  ;;  %v4797_v53 = vpop.permute.xlu0 %552 }
  0xfc   :  { %8400 = vst [vmem:[#allocation28_spill] sm:$0xff] %v4795_v48  ;;  %8401 = vst [vmem:[#allocation29_spill] sm:$0xff] %v4797_v53  ;;  %v1051_v53 = vmul.f32 %v1049_v8, %v4636_v60 }
  0xfd   :  { %1030 = vrot.lane.b32.xlu1 %v1021_v38, %s4430_s25  ;;  %1028 = vrot.lane.b32.xlu0 %v1020_v39, %s4430_s25  ;;  %v1050_v38 = vmul.f32 %v1049_v8, %v4460_v0 }
  0xff   :  { %v4803_v17 = vpop.permute.xlu1 %572  ;;  %v4805_v18 = vpop.permute.xlu0 %570 }
 0x100   :  { %8402 = vst [vmem:[#allocation30_spill] sm:$0xff] %v4803_v17  ;;  %8403 = vst [vmem:[#allocation31_spill] sm:$0xff] %v4805_v18  ;;  %v1052_v18 = vmul.f32 %v1049_v8, %v4465_v1 }
 0x101   :  { %1034 = vrot.lane.b32.xlu1 %v1023_v54, %s4430_s25  ;;  %1032 = vrot.lane.b32.xlu0 %v1022_v2, %s4430_s25  ;;  %v1079_v54 = vstv %s3996_s4  ;;  %s4063_s4 = sld [smem:[#allocation2 + $0x78]] }
 0x102   :  { %v1083_v8 = vmul.f32 %v1079_v54, %v4649_v4 }
 0x103   :  { %v4811_v39 = vpop.permute.xlu1 %590  ;;  %v4813_v48 = vpop.permute.xlu0 %588 }
 0x104   :  { %8404 = vst [vmem:[#allocation32_spill] sm:$0xff] %v4811_v39  ;;  %8405 = vst [vmem:[#allocation33_spill] sm:$0xff] %v4813_v48  ;;  %v1081_v48 = vmul.f32 %v1079_v54, %v4636_v60  ;;  %v1193_v39 = vstv %s4015_s5  ;;  %s4066_s5 = sld [smem:[#allocation2 + $0x93]] }
 0x105   :  { %1060 = vrot.lane.b32.xlu1 %v1051_v53, %s4430_s25  ;;  %1058 = vrot.lane.b32.xlu0 %v1050_v38, %s4430_s25  ;;  %v1080_v53 = vmul.f32 %v1079_v54, %v4460_v0  ;;  %v1194_v60 = vmul.f32 %v1193_v39, %v4460_v0 }
 0x107   :  { %v4819_v2 = vpop.permute.xlu1 %608  ;;  %v4821_v17 = vpop.permute.xlu0 %606 }
 0x108   :  { %8406 = vst [vmem:[#allocation34_spill] sm:$0xff] %v4819_v2  ;;  %8407 = vst [vmem:[#allocation35_spill] sm:$0xff] %v4821_v17  ;;  %v1215_v17 = vstv %s4018_s6  ;;  %s4069_s6 = sld [smem:[#allocation2 + $0xd]] }
 0x109   :  { %1064 = vrot.lane.b32.xlu1 %v1053_v25, %s4430_s25  ;;  %1062 = vrot.lane.b32.xlu0 %v1052_v18, %s4430_s25  ;;  %v1082_v25 = vmul.f32 %v1079_v54, %v4465_v1  ;;  %v1195_v18 = vmul.f32 %v1193_v39, %v4465_v1  ;;  %v1216_v54 = vmul.f32 %v1215_v17, %v4460_v0 }
 0x10b   :  { %v4827_v38 = vpop.permute.xlu1 %626  ;;  %v4829_v27 = vpop.permute.xlu0 %624  ;;  %v4017_v4 = vrot.slane %v1195_v18, 9 }
 0x10c   :  { %8408 = vst [vmem:[#allocation36_spill] sm:$0xff] %v4827_v38  ;;  %8409 = vst [vmem:[#allocation37_spill] sm:$0xff] %v4829_v27  ;;  %v1237_v27 = vstv %s4021_s7  ;;  %s4072_s7 = sld [smem:[#allocation2 + $0x28]] }
 0x10d   :  { %1090 = vrot.lane.b32.xlu1 %v1081_v48, %s4430_s25  ;;  %1088 = vrot.lane.b32.xlu0 %v1080_v53, %s4430_s25  ;;  %v4016_v48 = vrot.slane %v1194_v60, 9  ;;  %v1217_v53 = vmul.f32 %v1215_v17, %v4465_v1  ;;  %v1238_v18 = vmul.f32 %v1237_v27, %v4460_v0  ;;  %v1259_v60 = vstv %s4024_s10  ;;  %s4075_s10 = sld [smem:[#allocation2 + $0x43]] }
 0x10f   :  { %v4837_v2 = vpop.permute.xlu1 %644  ;;  %v4839_v26 = vpop.permute.xlu0 %642 }
 0x110   :  { %8410 = vst [vmem:[#allocation38_spill] sm:$0xff] %v4837_v2  ;;  %8411 = vst [vmem:[#allocation39_spill] sm:$0xff] %v4839_v26  ;;  %v4020_v26 = vrot.slane %v1217_v53, 9  ;;  %v1260_v53 = vmul.f32 %v1259_v60, %v4460_v0 }
 0x111   :  { %1094 = vrot.lane.b32.xlu1 %v1083_v8, %s4430_s25  ;;  %1092 = vrot.lane.b32.xlu0 %v1082_v25, %s4430_s25  ;;  %v4019_v8 = vrot.slane %v1216_v54, 9  ;;  %v1239_v25 = vmul.f32 %v1237_v27, %v4465_v1  ;;  %v1281_v54 = vstv %s4027_s11  ;;  %s4078_s11 = sld [smem:[#allocation2 + $0x5e]] }
 0x113   :  { %v4845_v38 = vpop.permute.xlu1 %663  ;;  %v4847_v39 = vpop.permute.xlu0 %661 }
 0x114   :  { %8412 = vst [vmem:[#allocation40_spill] sm:$0xff] %v4845_v38  ;;  %8413 = vst [vmem:[#allocation41_spill] sm:$0xff] %v4847_v39  ;;  %v4023_v39 = vrot.slane %v1239_v25, 9  ;;  %v1282_v25 = vmul.f32 %v1281_v54, %v4460_v0 }
 0x115   :  { %1204 = vrot.lane.b32.xlu1 %v4017_v4, %s4423_s28  ;;  %1202 = vrot.lane.b32.xlu0 %v4016_v48, %s4423_s28  ;;  %v4022_v4 = vrot.slane %v1238_v18, 9  ;;  %v1261_v48 = vmul.f32 %v1259_v60, %v4465_v1  ;;  %v1303_v18 = vstv %s4030_s12  ;;  %s4081_s12 = sld [smem:[#allocation2 + $0x79]] }
 0x117   :  { %v4853_v2 = vpop.permute.xlu1 %681  ;;  %v4855_v17 = vpop.permute.xlu0 %679 }
 0x118   :  { %8414 = vst [vmem:[#allocation42_spill] sm:$0xff] %v4853_v2  ;;  %8415 = vst [vmem:[#allocation43_spill] sm:$0xff] %v4855_v17  ;;  %v4026_v17 = vrot.slane %v1261_v48, 9  ;;  %v1304_v48 = vmul.f32 %v1303_v18, %v4460_v0 }
 0x119   :  { %1226 = vrot.lane.b32.xlu1 %v4020_v26, %s4423_s28  ;;  %1224 = vrot.lane.b32.xlu0 %v4019_v8, %s4423_s28  ;;  %v4025_v26 = vrot.slane %v1260_v53, 9  ;;  %v1283_v8 = vmul.f32 %v1281_v54, %v4465_v1  ;;  %v1325_v53 = vstv %s4033_s13  ;;  %s4084_s13 = sld [smem:[#allocation2 + $0x94]] }
 0x11b   :  { %v4861_v38 = vpop.permute.xlu1 %699  ;;  %v4863_v27 = vpop.permute.xlu0 %697 }
 0x11c   :  { %8416 = vst [vmem:[#allocation44_spill] sm:$0xff] %v4861_v38  ;;  %8417 = vst [vmem:[#allocation45_spill] sm:$0xff] %v4863_v27  ;;  %v4029_v27 = vrot.slane %v1283_v8, 9  ;;  %v1326_v8 = vmul.f32 %v1325_v53, %v4460_v0 }
 0x11d   :  { %1248 = vrot.lane.b32.xlu1 %v4023_v39, %s4423_s28  ;;  %1246 = vrot.lane.b32.xlu0 %v4022_v4, %s4423_s28  ;;  %v4028_v39 = vrot.slane %v1282_v25, 9  ;;  %v1305_v4 = vmul.f32 %v1303_v18, %v4465_v1  ;;  %v1347_v25 = vstv %s4036_s14  ;;  %s4087_s14 = sld [smem:[#allocation2 + $0xe]] }
 0x11f   :  { %v4869_v2 = vpop.permute.xlu1 %717  ;;  %v4871_v60 = vpop.permute.xlu0 %715 }
 0x120   :  { %8418 = vst [vmem:[#allocation46_spill] sm:$0xff] %v4869_v2  ;;  %8419 = vst [vmem:[#allocation47_spill] sm:$0xff] %v4871_v60  ;;  %v4032_v60 = vrot.slane %v1305_v4, 9  ;;  %v1348_v4 = vmul.f32 %v1347_v25, %v4460_v0 }
 0x121   :  { %1270 = vrot.lane.b32.xlu1 %v4026_v17, %s4423_s28  ;;  %1268 = vrot.lane.b32.xlu0 %v4025_v26, %s4423_s28  ;;  %v4031_v17 = vrot.slane %v1304_v48, 9  ;;  %v1327_v26 = vmul.f32 %v1325_v53, %v4465_v1  ;;  %v1369_v48 = vstv %s4039_s16  ;;  %s4090_s16 = sld [smem:[#allocation2 + $0x29]] }
 0x123   :  { %v4877_v38 = vpop.permute.xlu1 %735  ;;  %v4879_v54 = vpop.permute.xlu0 %733 }
 0x124   :  { %8420 = vst [vmem:[#allocation48_spill] sm:$0xff] %v4877_v38  ;;  %8421 = vst [vmem:[#allocation49_spill] sm:$0xff] %v4879_v54  ;;  %v4035_v54 = vrot.slane %v1327_v26, 9  ;;  %v1370_v26 = vmul.f32 %v1369_v48, %v4460_v0 }
 0x125   :  { %1292 = vrot.lane.b32.xlu1 %v4029_v27, %s4423_s28  ;;  %1290 = vrot.lane.b32.xlu0 %v4028_v39, %s4423_s28  ;;  %v4034_v27 = vrot.slane %v1326_v8, 9  ;;  %v1349_v39 = vmul.f32 %v1347_v25, %v4465_v1  ;;  %v1391_v8 = vstv %s4042_s17  ;;  %s4093_s17 = sld [smem:[#allocation2 + $0x44]] }
 0x127   :  { %v4885_v2 = vpop.permute.xlu1 %757  ;;  %v4887_v18 = vpop.permute.xlu0 %755 }
 0x128   :  { %8422 = vst [vmem:[#allocation50_spill] sm:$0xff] %v4885_v2  ;;  %8423 = vst [vmem:[#allocation51_spill] sm:$0xff] %v4887_v18  ;;  %v4038_v18 = vrot.slane %v1349_v39, 9  ;;  %v1393_v39 = vmul.f32 %v1391_v8, %v4465_v1 }
 0x129   :  { %1314 = vrot.lane.b32.xlu1 %v4032_v60, %s4423_s28  ;;  %1312 = vrot.lane.b32.xlu0 %v4031_v17, %s4423_s28  ;;  %v4037_v60 = vrot.slane %v1348_v4, 9  ;;  %v1371_v17 = vmul.f32 %v1369_v48, %v4465_v1  ;;  %v1392_v4 = vmul.f32 %v1391_v8, %v4460_v0 }
 0x12b   :  { %v4893_v38 = vpop.permute.xlu1 %761  ;;  %v4895_v53 = vpop.permute.xlu0 %759 }
 0x12c   :  { %8424 = vst [vmem:[#allocation52_spill] sm:$0xff] %v4893_v38  ;;  %8425 = vst [vmem:[#allocation53_spill] sm:$0xff] %v4895_v53  ;;  %v1413_v53 = vstv %s4045_s18  ;;  %s4096_s18 = sld [smem:[#allocation2 + $0x5f]] }
 0x12d   :  { %1336 = vrot.lane.b32.xlu1 %v4035_v54, %s4424_s8  ;;  %1334 = vrot.lane.b32.xlu0 %v4034_v27, %s4424_s8  ;;  %v4041_v54 = vrot.slane %v1371_v17, 9  ;;  %v4040_v27 = vrot.slane %v1370_v26, 9  ;;  %v1414_v17 = vmul.f32 %v1413_v53, %v4460_v0  ;;  %v1435_v26 = vstv %s4901_s20  ;;  %v4935_v0 = vld [vmem:[%s8180_s0] sm:$0x77]  ;;  %s4099_s20 = sld [smem:[#allocation2 + $0x7a]] }
 0x12f   :  { %v4903_v25 = vpop.permute.xlu1 %789  ;;  %v4905_v2 = vpop.permute.xlu0 %787 }
 0x130   :  { %8426 = vst [vmem:[#allocation54_spill] sm:$0xff] %v4903_v25  ;;  %8427 = vst [vmem:[#allocation55_spill] sm:$0xff] %v4905_v2  ;;  %v4043_v2 = vrot.slane %v1392_v4, 9 }
 0x131   :  { %1358 = vrot.lane.b32.xlu1 %v4038_v18, %s4424_s8  ;;  %1356 = vrot.lane.b32.xlu0 %v4037_v60, %s4424_s8  ;;  %v4044_v18 = vrot.slane %v1393_v39, 9  ;;  %v1415_v60 = vmul.f32 %v1413_v53, %v4465_v1  ;;  %v1436_v53 = vmul.f32 %v4935_v0, %v1435_v26  ;;  %v1457_v39 = vstv %s4051_s1  ;;  %s5058_s1 = sld [smem:[#allocation2 + $0x95]] }
 0x133   :  { %v4911_v48 = vpop.permute.xlu1 %793  ;;  %v4913_v38 = vpop.permute.xlu0 %791 }
 0x134   :  { %8428 = vst [vmem:[#allocation56_spill] sm:$0xff] %v4911_v48  ;;  %8429 = vst [vmem:[#allocation57_spill] sm:$0xff] %v4913_v38  ;;  %v4047_v38 = vrot.slane %v1415_v60, 9  ;;  %v4049_v60 = vrot.slane %v1436_v53, 9  ;;  %v1501_v53 = vstv %s4057_s29  ;;  %s5091_s29 = sld [smem:[#allocation2 + $0x36]] }
 0x135   :  { %1380 = vrot.lane.b32.xlu1 %v4041_v54, %s4424_s8  ;;  %1378 = vrot.lane.b32.xlu0 %v4040_v27, %s4424_s8  ;;  %v4046_v54 = vrot.slane %v1414_v17, 9  ;;  %v4929_v27 = vld [vmem:[%s8180_s0 + $0xc] sm:$0x77] }
 0x136   :  { %v1437_v1 = vmul.f32 %v4929_v27, %v1435_v26  ;;  %v1459_v17 = vmul.f32 %v4929_v27, %v1457_v39 }
 0x137   :  { %v4920_v25 = vpop.permute.xlu1 %819  ;;  %v4922_v8 = vpop.permute.xlu0 %817 }
 0x138   :  { %8430 = vst [vmem:[#allocation58_spill] sm:$0xff] %v4920_v25  ;;  %8431 = vst [vmem:[#allocation59_spill] sm:$0xff] %v4922_v8  ;;  %v1458_v8 = vmul.f32 %v4935_v0, %v1457_v39  ;;  %v1479_v25 = vstv %s4054_s21  ;;  %s5068_s21 = sld [smem:[#allocation2 + $0xf]] }
 0x139   :  { %1402 = vrot.lane.b32.xlu1 %v4044_v18, %s4424_s8  ;;  %1400 = vrot.lane.b32.xlu0 %v4043_v2, %s4424_s8  ;;  %v4050_v18 = vrot.slane %v1437_v1, 9  ;;  %v1480_v1 = vmul.f32 %v4935_v0, %v1479_v25 }
 0x13b   :  { %v4938_v4 = vpop.permute.xlu1 %823  ;;  %v4940_v2 = vpop.permute.xlu0 %821 }
 0x13c   :  { %8432 = vst [vmem:[#allocation60_spill] sm:$0xff] %v4938_v4  ;;  %8433 = vst [vmem:[#allocation61_spill] sm:$0xff] %v4940_v2  ;;  %v4053_v2 = vrot.slane %v1459_v17, 9  ;;  %v1523_v17 = vstv %s4060_s30  ;;  %s5098_s30 = sld [smem:[#allocation2 + $0x45]] }
 0x13d   :  { %1424 = vrot.lane.b32.xlu1 %v4047_v38, %s4424_s8  ;;  %1422 = vrot.lane.b32.xlu0 %v4046_v54, %s4424_s8  ;;  %v4052_v38 = vrot.slane %v1458_v8, 9  ;;  %v1481_v54 = vmul.f32 %v4929_v27, %v1479_v25  ;;  %v1502_v8 = vmul.f32 %v4935_v0, %v1501_v53 }
 0x13f   :  { %v4946_v48 = vpop.permute.xlu1 %849  ;;  %v4948_v26 = vpop.permute.xlu0 %847 }
 0x140   :  { %8434 = vst [vmem:[#allocation62_spill] sm:$0xff] %v4946_v48  ;;  %8435 = vst [vmem:[#allocation63_spill] sm:$0xff] %v4948_v26  ;;  %v4056_v26 = vrot.slane %v1481_v54, 9  ;;  %v1524_v54 = vmul.f32 %v4935_v0, %v1523_v17 }
 0x141   :  { %1446 = vrot.lane.b32.xlu1 %v4050_v18, %s4424_s8  ;;  %1444 = vrot.lane.b32.xlu0 %v4049_v60, %s4424_s8  ;;  %v4055_v18 = vrot.slane %v1480_v1, 9  ;;  %v1503_v60 = vmul.f32 %v4929_v27, %v1501_v53  ;;  %v1545_v1 = vstv %s4063_s4  ;;  %s5100_s4 = sld [smem:[#allocation4]] }
 0x142   :  { %v1897_v55 = vstv %s5098_s30  ;;  %s5448_s30 = sld [smem:[#allocation2 + $0x7c]] }
 0x143   :  { %v4954_v4 = vpop.permute.xlu1 %853  ;;  %v4956_v39 = vpop.permute.xlu0 %851  ;;  %v1899_v33 = vmul.f32 %v4929_v27, %v1897_v55 }
 0x144   :  { %8436 = vst [vmem:[#allocation64_spill] sm:$0xff] %v4954_v4  ;;  %8437 = vst [vmem:[#allocation65_spill] sm:$0xff] %v4956_v39  ;;  %v4059_v39 = vrot.slane %v1503_v60, 9  ;;  %v1546_v60 = vmul.f32 %v4935_v0, %v1545_v1 }
 0x145   :  { %1468 = vrot.lane.b32.xlu1 %v4053_v2, %s4425_s15  ;;  %1466 = vrot.lane.b32.xlu0 %v4052_v38, %s4425_s15  ;;  %v4058_v2 = vrot.slane %v1502_v8, 9  ;;  %v1525_v38 = vmul.f32 %v4929_v27, %v1523_v17  ;;  %v1567_v8 = vstv %s4066_s5  ;;  %s5102_s5 = sld [smem:[#allocation4 + $0x2]] }
 0x147   :  { %v4962_v48 = vpop.permute.xlu1 %879  ;;  %v4964_v25 = vpop.permute.xlu0 %877 }
 0x148   :  { %8438 = vst [vmem:[#allocation66_spill] sm:$0xff] %v4962_v48  ;;  %8439 = vst [vmem:[#allocation67_spill] sm:$0xff] %v4964_v25  ;;  %v4062_v25 = vrot.slane %v1525_v38, 9  ;;  %v1568_v38 = vmul.f32 %v4935_v0, %v1567_v8 }
 0x149   :  { %1490 = vrot.lane.b32.xlu1 %v4056_v26, %s4425_s15  ;;  %1488 = vrot.lane.b32.xlu0 %v4055_v18, %s4425_s15  ;;  %v4061_v26 = vrot.slane %v1524_v54, 9  ;;  %v1547_v18 = vmul.f32 %v4929_v27, %v1545_v1  ;;  %v1589_v54 = vstv %s4069_s6  ;;  %s5109_s6 = sld [smem:[#allocation2 + $0x51]] }
 0x14b   :  { %v4970_v4 = vpop.permute.xlu1 %883  ;;  %v4972_v53 = vpop.permute.xlu0 %881 }
 0x14c   :  { %8440 = vst [vmem:[#allocation68_spill] sm:$0xff] %v4970_v4  ;;  %8441 = vst [vmem:[#allocation69_spill] sm:$0xff] %v4972_v53  ;;  %v4065_v53 = vrot.slane %v1547_v18, 9  ;;  %v1590_v18 = vmul.f32 %v4935_v0, %v1589_v54 }
 0x14d   :  { %1512 = vrot.lane.b32.xlu1 %v4059_v39, %s4425_s15  ;;  %1510 = vrot.lane.b32.xlu0 %v4058_v2, %s4425_s15  ;;  %v4064_v39 = vrot.slane %v1546_v60, 9  ;;  %v1569_v2 = vmul.f32 %v4929_v27, %v1567_v8  ;;  %v1611_v60 = vstv %s4072_s7  ;;  %s5111_s7 = sld [smem:[#allocation2 + $0x6c]] }
 0x14f   :  { %v4978_v48 = vpop.permute.xlu1 %909  ;;  %v4980_v17 = vpop.permute.xlu0 %907  ;;  %v74_v45 = vstv %s5109_s6  ;;  %s5520_s6 = sld [smem:[#allocation2 + $0x97]] }
 0x150   :  { %8442 = vst [vmem:[#allocation70_spill] sm:$0xff] %v4978_v48  ;;  %8443 = vst [vmem:[#allocation71_spill] sm:$0xff] %v4980_v17  ;;  %v4068_v17 = vrot.slane %v1569_v2, 9  ;;  %v1612_v2 = vmul.f32 %v4935_v0, %v1611_v60 }
 0x151   :  { %1534 = vrot.lane.b32.xlu1 %v4062_v25, %s4425_s15  ;;  %1532 = vrot.lane.b32.xlu0 %v4061_v26, %s4425_s15  ;;  %v4067_v25 = vrot.slane %v1568_v38, 9  ;;  %v1591_v26 = vmul.f32 %v4929_v27, %v1589_v54  ;;  %v1633_v38 = vstv %s4075_s10  ;;  %s5118_s10 = sld [smem:[#allocation2 + $0x60]] }
 0x153   :  { %v4986_v4 = vpop.permute.xlu1 %913  ;;  %v4988_v1 = vpop.permute.xlu0 %911 }
 0x154   :  { %8444 = vst [vmem:[#allocation72_spill] sm:$0xff] %v4986_v4  ;;  %8445 = vst [vmem:[#allocation73_spill] sm:$0xff] %v4988_v1  ;;  %v4071_v1 = vrot.slane %v1591_v26, 9  ;;  %v1634_v26 = vmul.f32 %v4935_v0, %v1633_v38 }
 0x155   :  { %1556 = vrot.lane.b32.xlu1 %v4065_v53, %s4425_s15  ;;  %1554 = vrot.lane.b32.xlu0 %v4064_v39, %s4425_s15  ;;  %v4070_v53 = vrot.slane %v1590_v18, 9  ;;  %v1613_v39 = vmul.f32 %v4929_v27, %v1611_v60  ;;  %v1655_v18 = vstv %s4078_s11  ;;  %s5122_s11 = sld [smem:[#allocation4 + $0x3]] }
 0x157   :  { %v4994_v48 = vpop.permute.xlu1 %939  ;;  %v4996_v8 = vpop.permute.xlu0 %937  ;;  %v1919_v21 = vstv %s5118_s10  ;;  %s6215_s10 = sld [smem:[#allocation2 + $0x65]] }
 0x158   :  { %8446 = vst [vmem:[#allocation74_spill] sm:$0xff] %v4994_v48  ;;  %8447 = vst [vmem:[#allocation75_spill] sm:$0xff] %v4996_v8  ;;  %v4074_v8 = vrot.slane %v1613_v39, 9  ;;  %v1656_v39 = vmul.f32 %v4935_v0, %v1655_v18 }
 0x159   :  { %1578 = vrot.lane.b32.xlu1 %v4068_v17, %s4425_s15  ;;  %1576 = vrot.lane.b32.xlu0 %v4067_v25, %s4425_s15  ;;  %v4073_v17 = vrot.slane %v1612_v2, 9  ;;  %v1635_v25 = vmul.f32 %v4929_v27, %v1633_v38  ;;  %v1677_v2 = vstv %s4081_s12  ;;  %s5124_s12 = sld [smem:[#allocation2 + $0x87]] }
 0x15b   :  { %v5002_v4 = vpop.permute.xlu1 %943  ;;  %v5004_v54 = vpop.permute.xlu0 %941  ;;  %v50_v16 = vstv %s5122_s11  ;;  %s6253_s11 = sld [smem:[#allocation2 + $0x80]] }
 0x15c   :  { %8448 = vst [vmem:[#allocation76_spill] sm:$0xff] %v5002_v4  ;;  %8449 = vst [vmem:[#allocation77_spill] sm:$0xff] %v5004_v54  ;;  %v4077_v54 = vrot.slane %v1635_v25, 9  ;;  %v1678_v25 = vmul.f32 %v4935_v0, %v1677_v2 }
 0x15d   :  { %1600 = vrot.lane.b32.xlu1 %v4071_v1, %s4426_s2  ;;  %1598 = vrot.lane.b32.xlu0 %v4070_v53, %s4426_s2  ;;  %v4076_v1 = vrot.slane %v1634_v26, 9  ;;  %v1657_v53 = vmul.f32 %v4929_v27, %v1655_v18  ;;  %v1699_v26 = vstv %s4084_s13  ;;  %s5132_s13 = sld [smem:[#allocation4 + $0x4]] }
 0x15f   :  { %v5010_v48 = vpop.permute.xlu1 %970  ;;  %v5012_v60 = vpop.permute.xlu0 %968 }
 0x160   :  { %8450 = vst [vmem:[#allocation78_spill] sm:$0xff] %v5010_v48  ;;  %8451 = vst [vmem:[#allocation79_spill] sm:$0xff] %v5012_v60  ;;  %v4080_v60 = vrot.slane %v1657_v53, 9  ;;  %v1700_v53 = vmul.f32 %v4935_v0, %v1699_v26 }
 0x161   :  { %1622 = vrot.lane.b32.xlu1 %v4074_v8, %s4426_s2  ;;  %1620 = vrot.lane.b32.xlu0 %v4073_v17, %s4426_s2  ;;  %v4079_v8 = vrot.slane %v1656_v39, 9  ;;  %v1679_v17 = vmul.f32 %v4929_v27, %v1677_v2  ;;  %v1721_v39 = vstv %s4087_s14  ;;  %s5142_s14 = sld [smem:[#allocation2 + $0x7b]] }
 0x163   :  { %v5018_v4 = vpop.permute.xlu1 %974  ;;  %v5020_v38 = vpop.permute.xlu0 %972 }
 0x164   :  { %8452 = vst [vmem:[#allocation80_spill] sm:$0xff] %v5018_v4  ;;  %8453 = vst [vmem:[#allocation81_spill] sm:$0xff] %v5020_v38  ;;  %v4083_v38 = vrot.slane %v1679_v17, 9  ;;  %v1722_v17 = vmul.f32 %v4935_v0, %v1721_v39 }
 0x165   :  { %1644 = vrot.lane.b32.xlu1 %v4077_v54, %s4426_s2  ;;  %1642 = vrot.lane.b32.xlu0 %v4076_v1, %s4426_s2  ;;  %v4082_v54 = vrot.slane %v1678_v25, 9  ;;  %v1701_v1 = vmul.f32 %v4929_v27, %v1699_v26  ;;  %v1743_v25 = vstv %s4090_s16  ;;  %s5147_s16 = sld [smem:[#allocation4 + $0x5]] }
 0x167   :  { %v5026_v48 = vpop.permute.xlu1 %1000  ;;  %v5028_v18 = vpop.permute.xlu0 %998  ;;  %v1941_v7 = vstv %s5142_s14  ;;  %s6819_s14 = sld [smem:[#allocation2 + $0x99]] }
 0x168   :  { %8454 = vst [vmem:[#allocation82_spill] sm:$0xff] %v5026_v48  ;;  %8455 = vst [vmem:[#allocation83_spill] sm:$0xff] %v5028_v18  ;;  %v4086_v18 = vrot.slane %v1701_v1, 9  ;;  %v1744_v1 = vmul.f32 %v4935_v0, %v1743_v25 }
 0x169   :  { %1666 = vrot.lane.b32.xlu1 %v4080_v60, %s4426_s2  ;;  %1664 = vrot.lane.b32.xlu0 %v4079_v8, %s4426_s2  ;;  %v4085_v60 = vrot.slane %v1700_v53, 9  ;;  %v1723_v8 = vmul.f32 %v4929_v27, %v1721_v39  ;;  %v1765_v53 = vstv %s4093_s17  ;;  %s5168_s17 = sld [smem:[#allocation2 + $0x96]] }
 0x16b   :  { %v5034_v4 = vpop.permute.xlu1 %1004  ;;  %v5036_v2 = vpop.permute.xlu0 %1002 }
 0x16c   :  { %8456 = vst [vmem:[#allocation84_spill] sm:$0xff] %v5034_v4  ;;  %8457 = vst [vmem:[#allocation85_spill] sm:$0xff] %v5036_v2  ;;  %v4089_v2 = vrot.slane %v1723_v8, 9  ;;  %v1766_v8 = vmul.f32 %v4935_v0, %v1765_v53 }
 0x16d   :  { %1688 = vrot.lane.b32.xlu1 %v4083_v38, %s4426_s2  ;;  %1686 = vrot.lane.b32.xlu0 %v4082_v54, %s4426_s2  ;;  %v4088_v38 = vrot.slane %v1722_v17, 9  ;;  %v1745_v54 = vmul.f32 %v4929_v27, %v1743_v25  ;;  %v1787_v17 = vstv %s4096_s18  ;;  %s5191_s18 = sld [smem:[#allocation2 + $0x10]] }
 0x16f   :  { %v5042_v48 = vpop.permute.xlu1 %1030  ;;  %v5044_v26 = vpop.permute.xlu0 %1028 }
 0x170   :  { %8458 = vst [vmem:[#allocation86_spill] sm:$0xff] %v5042_v48  ;;  %8459 = vst [vmem:[#allocation87_spill] sm:$0xff] %v5044_v26  ;;  %v4092_v26 = vrot.slane %v1745_v54, 9  ;;  %v1789_v54 = vmul.f32 %v4929_v27, %v1787_v17 }
 0x171   :  { %1710 = vrot.lane.b32.xlu1 %v4086_v18, %s4426_s2  ;;  %1708 = vrot.lane.b32.xlu0 %v4085_v60, %s4426_s2  ;;  %v4091_v18 = vrot.slane %v1744_v1, 9  ;;  %v1767_v60 = vmul.f32 %v4929_v27, %v1765_v53  ;;  %v1788_v1 = vmul.f32 %v4935_v0, %v1787_v17  ;;  %v1831_v17 = vstv %s5058_s1  ;;  %s5788_s1 = sld [smem:[#allocation2 + $0x62]] }
 0x173   :  { %v5050_v4 = vpop.permute.xlu1 %1034  ;;  %v5052_v39 = vpop.permute.xlu0 %1032 }
 0x174   :  { %8460 = vst [vmem:[#allocation88_spill] sm:$0xff] %v5050_v4  ;;  %8461 = vst [vmem:[#allocation89_spill] sm:$0xff] %v5052_v39  ;;  %v1809_v39 = vstv %s4099_s20  ;;  %s5245_s20 = sld [smem:[#allocation2 + $0x2b]] }
 0x175   :  { %1732 = vrot.lane.b32.xlu1 %v4089_v2, %s4427_s27  ;;  %1730 = vrot.lane.b32.xlu0 %v4088_v38, %s4427_s27  ;;  %v4095_v2 = vrot.slane %v1767_v60, 9  ;;  %v4094_v38 = vrot.slane %v1766_v8, 9  ;;  %v1811_v60 = vmul.f32 %v4929_v27, %v1809_v39  ;;  %v1810_v8 = vmul.f32 %v4935_v0, %v1809_v39 }
 0x177   :  { %v5060_v25 = vpop.permute.xlu1 %1060  ;;  %v5062_v48 = vpop.permute.xlu0 %1058  ;;  %v4100_v39 = vrot.slane %v1810_v8, 9 }
 0x178   :  { %8462 = vst [vmem:[#allocation90_spill] sm:$0xff] %v5060_v25  ;;  %8463 = vst [vmem:[#allocation91_spill] sm:$0xff] %v5062_v48  ;;  %v56_v48 = vstv %s5083_s24  ;;  %s5318_s24 = sld [smem:[#allocation2 + $0x46]] }
 0x179   :  { %1754 = vrot.lane.b32.xlu1 %v4092_v26, %s4427_s27  ;;  %1752 = vrot.lane.b32.xlu0 %v4091_v18, %s4427_s27  ;;  %v4098_v26 = vrot.slane %v1789_v54, 9  ;;  %v4097_v18 = vrot.slane %v1788_v1, 9  ;;  %v1832_v54 = vmul.f32 %v4935_v0, %v1831_v17  ;;  %v1853_v1 = vstv %s5068_s21  ;;  %s5853_s21 = sld [smem:[#allocation2 + $0x7d]] }
 0x17a   :  { %v58_v61 = vmul.f32 %v4929_v27, %v56_v48 }
 0x17b   :  { %v5070_v53 = vpop.permute.xlu1 %1064  ;;  %v5072_v4 = vpop.permute.xlu0 %1062  ;;  %v4103_v8 = vrot.slane %v1832_v54, 9  ;;  %v68_v54 = vstv %s5091_s29  ;;  %s5423_s29 = sld [smem:[#allocation2 + $0x9]] }
 0x17c   :  { %8464 = vst [vmem:[#allocation92_spill] sm:$0xff] %v5070_v53  ;;  %8465 = vst [vmem:[#allocation93_spill] sm:$0xff] %v5072_v4 }
 0x17d   :  { %1776 = vrot.lane.b32.xlu1 %v4095_v2, %s4427_s27  ;;  %1774 = vrot.lane.b32.xlu0 %v4094_v38, %s4427_s27  ;;  %v4101_v2 = vrot.slane %v1811_v60, 9  ;;  %v1833_v38 = vmul.f32 %v4929_v27, %v1831_v17  ;;  %v1855_v17 = vmul.f32 %v4929_v27, %v1853_v1 }
 0x17f   :  { %v5085_v53 = vpop.permute.xlu1 %1090  ;;  %v5087_v4 = vpop.permute.xlu0 %1088  ;;  %v4104_v60 = vrot.slane %v1833_v38, 9  ;;  %v46_v38 = vstv %s5089_s26  ;;  %s5381_s26 = sld [smem:[#allocation2 + $0x61]] }
 0x180   :  { %8466 = vst [vmem:[#allocation94_spill] sm:$0xff] %v5085_v53  ;;  %8467 = vst [vmem:[#allocation95_spill] sm:$0xff] %v5087_v4  ;;  %v1854_v53 = vmul.f32 %v4935_v0, %v1853_v1  ;;  %v4107_v1 = vrot.slane %v1855_v17, 9 }
 0x181   :  { %1798 = vrot.lane.b32.xlu1 %v4098_v26, %s4427_s27  ;;  %1796 = vrot.lane.b32.xlu0 %v4097_v18, %s4427_s27  ;;  %v62_v18 = vstv %s5074_s22  ;;  %s5910_s22 = sld [smem:[#allocation2 + $0x98]] }
 0x182   :  { %v4106_v25 = vrot.slane %v1854_v53, 9  ;;  %v64_v9 = vmul.f32 %v4929_v27, %v62_v18 }
 0x183   :  { %v5104_v4 = vpop.permute.xlu1 %1094  ;;  %v5106_v26 = vpop.permute.xlu0 %1092 }
 0x184   :  { %8468 = vst [vmem:[#allocation96_spill] sm:$0xff] %v5104_v4  ;;  %8469 = vst [vmem:[#allocation97_spill] sm:$0xff] %v5106_v26  ;;  %v1875_v4 = vstv %s5081_s23  ;;  %v63_v26 = vmul.f32 %v4935_v0, %v62_v18  ;;  %v70_v18 = vmul.f32 %v4929_v27, %v68_v54  ;;  %s5965_s23 = sld [smem:[#allocation2 + $0x13]] }
 0x185   :  { %1820 = vrot.lane.b32.xlu1 %v4101_v2, %s4427_s27  ;;  %1818 = vrot.lane.b32.xlu0 %v4100_v39, %s4427_s27  ;;  %v1877_v12 = vmul.f32 %v4929_v27, %v1875_v4 }
 0x187   :  { %v5126_v2 = vpop.permute.xlu1 %1204  ;;  %v5128_v39 = vpop.permute.xlu0 %1202 }
 0x188   :  { %8470 = vst [vmem:[#allocation98_spill] sm:$0xff] %v5126_v2  ;;  %8471 = vst [vmem:[#allocation99_spill] sm:$0xff] %v5128_v39  ;;  %v1876_v2 = vmul.f32 %v4935_v0, %v1875_v4  ;;  %v57_v39 = vmul.f32 %v4935_v0, %v56_v48  ;;  %v48_v4 = vstv %s5102_s5  ;;  %v80_v48 = vstv %s5111_s7  ;;  %s5504_s5 = sld [smem:[#allocation2 + $0x3f]]  ;;  %s5560_s7 = sld [smem:[#allocation2 + $0x5a]] }
 0x189   :  { %1842 = vrot.lane.b32.xlu1 %v4104_v60, %s4427_s27  ;;  %1840 = vrot.lane.b32.xlu0 %v4103_v8, %s4427_s27  ;;  %v5144_v60 = vadd.f32 %v63_v26, %v46_v38  ;;  %v44_v8 = vstv %s5100_s4  ;;  %v4110_v26 = vrot.slane %v1877_v12, 9  ;;  %v76_v12 = vmul.f32 %v4929_v27, %v74_v45  ;;  %s5457_s4 = sld [smem:[#allocation2 + $0x24]] }
 0x18a   :  { %v4109_v40 = vrot.slane %v1876_v2, 9  ;;  %v5161_v30 = vadd.f32 %v57_v39, %v44_v8  ;;  %v5165_v22 = vadd.f32 %v58_v61, %v44_v8  ;;  %v52_v61 = vstv %s5132_s13  ;;  %s6817_s13 = sld [smem:[#allocation2 + $0x83]] }
 0x18b   :  { %v5149_v53 = vpop.permute.xlu1 %1226  ;;  %v5151_v17 = vpop.permute.xlu0 %1224  ;;  %v82_v39 = vmul.f32 %v4929_v27, %v80_v48  ;;  %v1921_v8 = vmul.f32 %v4929_v27, %v1919_v21  ;;  %v5194_v59 = vadd.f32 %v76_v12, %v50_v16  ;;  %v1943_v12 = vmul.f32 %v4929_v27, %v1941_v7 }
 0x18c   :  { %8472 = vst [vmem:[#allocation100_spill] sm:$0xff] %v5149_v53  ;;  %8473 = vst [vmem:[#allocation101_spill] sm:$0xff] %v5151_v17  ;;  %v1898_v53 = vmul.f32 %v4935_v0, %v1897_v55  ;;  %v5163_v17 = vadd.f32 %v64_v9, %v46_v38  ;;  %v5178_v55 = vadd.f32 %v70_v18, %v48_v4  ;;  %v4113_v38 = vrot.slane %v1899_v33, 9 }
 0x18d   :  { %1864 = vrot.lane.b32.xlu1 %v4107_v1, %s4428_s9  ;;  %1862 = vrot.lane.b32.xlu0 %v4106_v25, %s4428_s9  ;;  %v69_v1 = vmul.f32 %v4935_v0, %v68_v54  ;;  %v86_v25 = vstv %s5124_s12  ;;  %v75_v9 = vmul.f32 %v4935_v0, %v74_v45  ;;  %v81_v18 = vmul.f32 %v4935_v0, %v80_v48  ;;  %s5590_s12 = sld [smem:[#allocation2 + $0x11]] }
 0x18e   :  { %v4112_v54 = vrot.slane %v1898_v53, 9  ;;  %v88_v45 = vmul.f32 %v4929_v27, %v86_v25  ;;  %v54_v33 = vstv %s5147_s16  ;;  %v5204_v48 = vadd.f32 %v82_v39, %v52_v61  ;;  %s5616_s16 = sld [smem:[#allocation2 + $0x75]] }
 0x18f   :  { %v5174_v2 = vpop.permute.xlu1 %1248  ;;  %v5176_v13 = vpop.permute.xlu0 %1246  ;;  %v5202_v58 = vadd.f32 %v75_v9, %v50_v16  ;;  %v87_v50 = vmul.f32 %v4935_v0, %v86_v25  ;;  %v5213_v49 = vadd.f32 %v81_v18, %v52_v61  ;;  %v1963_v9 = vstv %s5168_s17  ;;  %s5661_s17 = sld [smem:[#allocation2 + $0x2c]] }
 0x190   :  { %8474 = vst [vmem:[#allocation102_spill] sm:$0xff] %v5174_v2  ;;  %8475 = vst [vmem:[#allocation103_spill] sm:$0xff] %v5176_v13  ;;  %v1920_v2 = vmul.f32 %v4935_v0, %v1919_v21  ;;  %v120_v13 = vrot.slane %v4585_v31, 4  ;;  %v121_v21 = vrot.slane %v4593_v36, 4  ;;  %v5215_v16 = vadd.f32 %v88_v45, %v54_v33 }
 0x191   :  { %1886 = vrot.lane.b32.xlu1 %v4110_v26, %s4428_s9  ;;  %1884 = vrot.lane.b32.xlu0 %v4109_v40, %s4428_s9  ;;  %v71_v26 = vadd.f32 %v69_v1, %v48_v4  ;;  %v4116_v4 = vrot.slane %v1921_v8, 9  ;;  %v104_v25 = vsel %vm103_vm0, %v4587_v32, %v101_v3  ;;  %v102_v39 = vrot.slane %v4595_v37, 4 }
 0x192   :  { %v4115_v1 = vrot.slane %v1920_v2, 9  ;;  %v138_v2 = vrot.slane %v4603_v42, 4  ;;  %v156_v61 = vrot.slane %v4611_v47, 4  ;;  %v5231_v8 = vadd.f32 %v87_v50, %v54_v33 }
 0x193   :  { %v5197_v40 = vpop.permute.xlu1 %1270  ;;  %v5199_v53 = vpop.permute.xlu0 %1268  ;;  %v4119_v32 = vrot.slane %v1943_v12, 9  ;;  %v1965_v18 = vmul.f32 %v4929_v27, %v1963_v9  ;;  %v1964_v45 = vmul.f32 %v4935_v0, %v1963_v9  ;;  %v175_v50 = vrot.slane %v4617_v51, 4 }
 0x194   :  { %8476 = vst [vmem:[#allocation104_spill] sm:$0xff] %v5197_v40  ;;  %8477 = vst [vmem:[#allocation105_spill] sm:$0xff] %v5199_v53  ;;  %v1942_v40 = vmul.f32 %v4935_v0, %v1941_v7  ;;  %v122_v53 = vsel %vm103_vm0, %v4585_v31, %v120_v13  ;;  %v123_v31 = vsel %vm103_vm0, %v4593_v36, %v121_v21  ;;  %v157_v13 = vrot.slane %v4609_v46, 4 }
 0x195   :  { %1908 = vrot.lane.b32.xlu1 %v4113_v38, %s4428_s9  ;;  %1906 = vrot.lane.b32.xlu0 %v4112_v54, %s4428_s9  ;;  %v139_v38 = vrot.slane %v4601_v41, 4  ;;  %v5241_v36 = vadd.f32 %v104_v25, %v5161_v30  ;;  %v1985_v33 = vstv %s5191_s18  ;;  %v105_v21 = vsel %vm103_vm0, %v4595_v37, %v102_v39  ;;  %v5271_v25 = vld [vmem:[%s8180_s0 + $0x8] sm:$0x7]  ;;  %s5670_s18 = sld [smem:[#allocation2 + $0x90]] }
 0x196   :  { %v4118_v3 = vrot.slane %v1942_v40, 9  ;;  %v159_v12 = vsel %vm103_vm0, %v4609_v46, %v157_v13  ;;  %v158_v37 = vsel %vm103_vm0, %v4611_v47, %v156_v61  ;;  %v4121_v9 = vrot.slane %v1964_v45, 9 }
 0x197   :  { %v5223_v54 = vpop.permute.xlu1 %1292  ;;  %v5225_v7 = vpop.permute.xlu0 %1290  ;;  %v141_v40 = vsel %vm103_vm0, %v4601_v41, %v139_v38  ;;  %v193_v41 = vrot.slane %v4625_v56, 4  ;;  %v1986_v46 = vmul.f32 %v4935_v0, %v1985_v33  ;;  %v109_v39 = vadd.f32 %v105_v21, %v5165_v22 }
 0x198   :  { %8478 = vst [vmem:[#allocation106_spill] sm:$0xff] %v5223_v54  ;;  %8479 = vst [vmem:[#allocation107_spill] sm:$0xff] %v5225_v7  ;;  %v5238_v7 = vadd.f32 %v122_v53, %v5144_v60  ;;  %v174_v60 = vrot.slane %v4619_v52, 4  ;;  %v5277_v47 = vadd.f32 %v141_v40, %v5178_v55  ;;  %v192_v13 = vrot.slane %v4627_v57, 4 }
 0x199   :  { %1930 = vrot.lane.b32.xlu1 %v4116_v4, %s4428_s9  ;;  %1928 = vrot.lane.b32.xlu0 %v4115_v1, %s4428_s9  ;;  %v140_v4 = vsel %vm103_vm0, %v4603_v42, %v138_v2  ;;  %v5259_v1 = vadd.f32 %v123_v31, %v5163_v17  ;;  %v4122_v42 = vrot.slane %v1965_v18, 9  ;;  %v1987_v17 = vmul.f32 %v5271_v25, %v1985_v33 }
 0x19a   :  { %v5279_v38 = vadd.f32 %v140_v4, %v71_v26  ;;  %v177_v2 = vsel %vm103_vm0, %v4617_v51, %v175_v50  ;;  %v176_v31 = vsel %vm103_vm0, %v4619_v52, %v174_v60  ;;  %v211_v61 = vrot.slane %v4638_v62, 4  ;;  %v5306_v50 = vld [vmem:[%s8180_s0 + $0x14] sm:$0x7] }
 0x19b   :  { %v5254_v53 = vpop.permute.xlu1 %1314  ;;  %v5256_v30 = vpop.permute.xlu0 %1312  ;;  %v5293_v55 = vadd.f32 %v159_v12, %v5194_v59  ;;  %v5296_v26 = vadd.f32 %v158_v37, %v5202_v58  ;;  %v195_v51 = vsel %vm103_vm0, %v4625_v56, %v193_v41  ;;  %v230_v52 = vrot.slane %v4651_v5, 4 }
 0x19c   :  { %8480 = vst [vmem:[#allocation108_spill] sm:$0xff] %v5254_v53  ;;  %8481 = vst [vmem:[#allocation109_spill] sm:$0xff] %v5256_v30  ;;  %v4125_v18 = vrot.slane %v1987_v17, 9  ;;  %v4124_v45 = vrot.slane %v1986_v46, 9  ;;  %v1989_v59 = vmul.f32 %v5306_v50, %v1985_v33  ;;  %v1988_v58 = vmul.f32 %v4929_v27, %v1985_v33 }
 0x19d   :  { %1952 = vrot.lane.b32.xlu1 %v4119_v32, %s4428_s9  ;;  %1950 = vrot.lane.b32.xlu0 %v4118_v3, %s4428_s9  ;;  %v210_v32 = vrot.slane %v4640_v63, 4  ;;  %v5311_v21 = vadd.f32 %v177_v2, %v5204_v48  ;;  %v5314_v56 = vadd.f32 %v176_v31, %v5213_v49  ;;  %v229_v40 = vrot.slane %v4653_v6, 4 }
 0x19e   :  { %v2023_v4 = vstv %s5245_s20  ;;  %v194_v60 = vsel %vm103_vm0, %v4627_v57, %v192_v13  ;;  %v214_v12 = vsel %vm212_vm1, %v4638_v62, %v211_v61  ;;  %v248_v48 = vrot.slane %v4659_v10, 4  ;;  %s5726_s20 = sld [smem:[#allocation2 + $0x47]] }
 0x19f   :  { %v5288_v3 = vpop.permute.xlu1 %1336  ;;  %v5290_v22 = vpop.permute.xlu0 %1334  ;;  %v213_v33 = vsel %vm212_vm1, %v4640_v63, %v210_v32  ;;  %v5332_v41 = vadd.f32 %v195_v51, %v5215_v16  ;;  %v247_v57 = vrot.slane %v4661_v11, 4  ;;  %v4127_v62 = vrot.slane %v1989_v59, 9 }
 0x1a0   :  { %8482 = vst [vmem:[#allocation110_spill] sm:$0xff] %v5288_v3  ;;  %8483 = vst [vmem:[#allocation111_spill] sm:$0xff] %v5290_v22  ;;  %v4126_v63 = vrot.slane %v1988_v58, 9  ;;  %v2025_v17 = vmul.f32 %v5271_v25, %v2023_v4  ;;  %v2024_v46 = vmul.f32 %v4935_v0, %v2023_v4  ;;  %v5343_v16 = vadd.f32 %v194_v60, %v5231_v8 }
 0x1a1   :  { %1974 = vrot.lane.b32.xlu1 %v4122_v42, %s4428_s9  ;;  %1972 = vrot.lane.b32.xlu0 %v4121_v9, %s4428_s9  ;;  %v232_v42 = vsel %vm212_vm1, %v4651_v5, %v230_v52  ;;  %v266_v9 = vrot.slane %v4667_v14, 4  ;;  %v5345_v2 = vadd.f32 %v214_v12, %v109_v39  ;;  %v5348_v5 = vadd.f32 %v213_v33, %v5241_v36 }
 0x1a2   :  { %v231_v31 = vsel %vm212_vm1, %v4653_v6, %v229_v40  ;;  %v250_v13 = vsel %vm212_vm1, %v4659_v10, %v248_v48  ;;  %v265_v61 = vrot.slane %v4669_v15, 4  ;;  %v284_v32 = vrot.slane %v4675_v19, 4 }
 0x1a3   :  { %v5327_v37 = vpop.permute.xlu1 %1358  ;;  %v5329_v49 = vpop.permute.xlu0 %1356  ;;  %v283_v51 = vrot.slane %v4677_v20, 4  ;;  %v5362_v36 = vadd.f32 %v232_v42, %v5259_v1  ;;  %v249_v6 = vsel %vm212_vm1, %v4661_v11, %v247_v57  ;;  %v268_v10 = vsel %vm212_vm1, %v4667_v14, %v266_v9 }
 0x1a4   :  { %8484 = vst [vmem:[#allocation112_spill] sm:$0xff] %v5327_v37  ;;  %8485 = vst [vmem:[#allocation113_spill] sm:$0xff] %v5329_v49  ;;  %v302_v52 = vrot.slane %v4683_v23, 4  ;;  %v2027_v59 = vmul.f32 %v5306_v50, %v2023_v4  ;;  %v2026_v58 = vmul.f32 %v4929_v27, %v2023_v4  ;;  %v5374_v1 = vadd.f32 %v231_v31, %v5238_v7 }
 0x1a5   :  { %2004 = vrot.lane.b32.xlu1 %v4125_v18, %s4429_s19  ;;  %2002 = vrot.lane.b32.xlu0 %v4124_v45, %s4429_s19  ;;  %v4130_v18 = vrot.slane %v2025_v17, 9  ;;  %v4129_v45 = vrot.slane %v2024_v46, 9  ;;  %v5377_v11 = vadd.f32 %v250_v13, %v5277_v47  ;;  %v301_v14 = vrot.slane %v4685_v24, 4 }
 0x1a6   :  { %v2061_v40 = vstv %s5318_s24  ;;  %v267_v60 = vsel %vm212_vm1, %v4669_v15, %v265_v61  ;;  %v286_v12 = vsel %vm212_vm1, %v4675_v19, %v284_v32  ;;  %v285_v4 = vsel %vm212_vm1, %v4677_v20, %v283_v51  ;;  %v8492_v61 = vld [vmem:[#allocation8_spill] sm:$0xff]  ;;  %s5991_s24 = sld [smem:[#allocation2 + $0x2e]] }
 0x1a7   :  { %v5357_v8 = vpop.permute.xlu1 %1380  ;;  %v5359_v39 = vpop.permute.xlu0 %1378  ;;  %v320_v7 = vrot.slane %v4691_v28, 4  ;;  %v5395_v48 = vadd.f32 %v249_v6, %v5279_v38  ;;  %v5398_v42 = vadd.f32 %v268_v10, %v5293_v55  ;;  %v304_v15 = vsel %vm212_vm1, %v4683_v23, %v302_v52 }
 0x1a8   :  { %8486 = vst [vmem:[#allocation114_spill] sm:$0xff] %v5357_v8  ;;  %8487 = vst [vmem:[#allocation115_spill] sm:$0xff] %v5359_v39  ;;  %v319_v19 = vrot.slane %v4693_v29, 4  ;;  %v4132_v20 = vrot.slane %v2027_v59, 9  ;;  %v4131_v57 = vrot.slane %v2026_v58, 9  ;;  %v2063_v9 = vmul.f32 %v5271_v25, %v2061_v40 }
 0x1a9   :  { %2008 = vrot.lane.b32.xlu1 %v4127_v62, %s4429_s19  ;;  %2006 = vrot.lane.b32.xlu0 %v4126_v63, %s4429_s19  ;;  %v2062_v62 = vmul.f32 %v4935_v0, %v2061_v40  ;;  %v5408_v38 = vadd.f32 %v267_v60, %v5296_v26  ;;  %v5411_v55 = vadd.f32 %v286_v12, %v5311_v21  ;;  %v339_v46 = vrot.slane %v4699_v34, 4  ;;  %v8494_v60 = vld [vmem:[#allocation10_spill] sm:$0xff] }
 0x1aa   :  { %v5414_v23 = vadd.f32 %v285_v4, %v5314_v56  ;;  %v303_v63 = vsel %vm212_vm1, %v4685_v24, %v301_v14  ;;  %v323_v17 = vsel %vm321_vm2, %v4691_v28, %v320_v7  ;;  %v338_v31 = vrot.slane %v4701_v35, 4  ;;  %v8497_v7 = vld [vmem:[#allocation11_spill] sm:$0xff] }
 0x1ab   :  { %v5390_v33 = vpop.permute.xlu1 %1402  ;;  %v5392_v47 = vpop.permute.xlu0 %1400  ;;  %v357_v13 = vrot.slane %v4707_v43, 4  ;;  %v5430_v56 = vadd.f32 %v304_v15, %v5332_v41  ;;  %v322_v24 = vsel %vm321_vm2, %v4693_v29, %v319_v19  ;;  %v356_v28 = vrot.slane %v4709_v44, 4 }
 0x1ac   :  { %8488 = vst [vmem:[#allocation116_spill] sm:$0xff] %v5390_v33  ;;  %8489 = vst [vmem:[#allocation117_spill] sm:$0xff] %v5392_v47  ;;  %v375_v32 = vrot.slane %v8492_v61, 4  ;;  %v4135_v51 = vrot.slane %v2063_v9, 9  ;;  %v4134_v6 = vrot.slane %v2062_v62, 9  ;;  %v2065_v10 = vmul.f32 %v5306_v50, %v2061_v40 }
 0x1ad   :  { %2042 = vrot.lane.b32.xlu1 %v4130_v18, %s4429_s19  ;;  %2040 = vrot.lane.b32.xlu0 %v4129_v45, %s4429_s19  ;;  %v2064_v52 = vmul.f32 %v4929_v27, %v2061_v40  ;;  %v5441_v41 = vadd.f32 %v303_v63, %v5343_v16  ;;  %v5444_v29 = vadd.f32 %v323_v17, %v5345_v2  ;;  %v8493_v18 = vld [vmem:[#allocation9_spill] sm:$0xff]  ;;  %v2099_v59 = vstv %s5381_s26  ;;  %v8498_v17 = vld [vmem:[#allocation12_spill] sm:$0xff]  ;;  %s6027_s26 = sld [smem:[#allocation2 + $0x49]] }
 0x1ae   :  { %v374_v45 = vrot.slane %v8493_v18, 4  ;;  %v341_v58 = vsel %vm321_vm2, %v4699_v34, %v339_v46  ;;  %v340_v14 = vsel %vm321_vm2, %v4701_v35, %v338_v31  ;;  %v359_v40 = vsel %vm321_vm2, %v4707_v43, %v357_v13  ;;  %v8499_v31 = vld [vmem:[#allocation13_spill] sm:$0xff] }
 0x1af   :  { %v5425_v26 = vpop.permute.xlu1 %1424  ;;  %v5427_v21 = vpop.permute.xlu0 %1422  ;;  %v393_v16 = vrot.slane %v8494_v60, 4  ;;  %v5464_v4 = vadd.f32 %v322_v24, %v5348_v5  ;;  %v358_v34 = vsel %vm321_vm2, %v4709_v44, %v356_v28  ;;  %v377_v35 = vsel %vm321_vm2, %v8492_v61, %v375_v32  ;;  %v8502_v32 = vld [vmem:[#allocation14_spill] sm:$0xff] }
 0x1b0   :  { %8490 = vst [vmem:[#allocation118_spill] sm:$0xff] %v5425_v26  ;;  %8491 = vst [vmem:[#allocation119_spill] sm:$0xff] %v5427_v21  ;;  %v392_v43 = vrot.slane %v8497_v7, 4  ;;  %v4137_v15 = vrot.slane %v2065_v10, 9  ;;  %v4136_v19 = vrot.slane %v2064_v52, 9  ;;  %v2100_v5 = vmul.f32 %v4935_v0, %v2099_v59  ;;  %v8541_v21 = vld [vmem:[#allocation37_spill] sm:$0xff] }
 0x1b1   :  { %2046 = vrot.lane.b32.xlu1 %v4132_v20, %s4429_s19  ;;  %2044 = vrot.lane.b32.xlu0 %v4131_v57, %s4429_s19  ;;  %v2101_v20 = vmul.f32 %v5271_v25, %v2099_v59  ;;  %v5476_v57 = vadd.f32 %v341_v58, %v5362_v36  ;;  %v5479_v44 = vadd.f32 %v340_v14, %v5374_v1  ;;  %v411_v46 = vrot.slane %v8498_v17, 4 }
 0x1b2   :  { %v5482_v9 = vadd.f32 %v359_v40, %v5377_v11  ;;  %v376_v62 = vsel %vm321_vm2, %v8493_v18, %v374_v45  ;;  %v395_v63 = vsel %vm321_vm2, %v8494_v60, %v393_v16  ;;  %v410_v13 = vrot.slane %v8499_v31, 4  ;;  %v8503_v60 = vld [vmem:[#allocation15_spill] sm:$0xff] }
 0x1b3   :  { %v5459_v2 = vpop.permute.xlu1 %1446  ;;  %v5461_v12 = vpop.permute.xlu0 %1444  ;;  %v1109_v24 = vstv %s5423_s29  ;;  %v5496_v1 = vadd.f32 %v358_v34, %v5395_v48  ;;  %v5499_v11 = vadd.f32 %v377_v35, %v5398_v42  ;;  %v394_v61 = vsel %vm321_vm2, %v8497_v7, %v392_v43  ;;  %v8506_v7 = vld [vmem:[#allocation16_spill] sm:$0xff]  ;;  %s6045_s29 = sld [smem:[#allocation2 + $0x64]] }
 0x1b4   :  { %8495 = vst [vmem:[#allocation8_spill] sm:$0xff] %v5459_v2  ;;  %8496 = vst [vmem:[#allocation9_spill] sm:$0xff] %v5461_v12  ;;  %v4139_v10 = vrot.slane %v2100_v5, 9  ;;  %v2103_v48 = vmul.f32 %v5306_v50, %v2099_v59  ;;  %v2102_v52 = vmul.f32 %v4929_v27, %v2099_v59  ;;  %v5511_v42 = vadd.f32 %v376_v62, %v5408_v38 }
 0x1b5   :  { %2080 = vrot.lane.b32.xlu1 %v4135_v51, %s4429_s19  ;;  %2078 = vrot.lane.b32.xlu0 %v4134_v6, %s4429_s19  ;;  %v429_v51 = vrot.slane %v8502_v32, 4  ;;  %v4140_v6 = vrot.slane %v2101_v20, 9  ;;  %v5514_v18 = vadd.f32 %v395_v63, %v5411_v55  ;;  %v5517_v45 = vmul.f32 %v4935_v0, %v1109_v24 }
 0x1b6   :  { %v2137_v58 = vstv %s5448_s30  ;;  %v413_v14 = vsel %vm321_vm2, %v8498_v17, %v411_v46  ;;  %v412_v40 = vsel %vm321_vm2, %v8499_v31, %v410_v13  ;;  %v428_v59 = vrot.slane %v8503_v60, 4  ;;  %v8507_v31 = vld [vmem:[#allocation17_spill] sm:$0xff]  ;;  %s6084_s30 = sld [smem:[#allocation2 + $0x7f]] }
 0x1b7   :  { %v5491_v28 = vpop.permute.xlu1 %1468  ;;  %v5493_v36 = vpop.permute.xlu0 %1466  ;;  %v1123_v16 = vstv %s5457_s4  ;;  %v5533_v55 = vadd.f32 %v394_v61, %v5414_v23  ;;  %v432_v35 = vsel %vm430_vm3, %v8502_v32, %v429_v51  ;;  %v448_v43 = vrot.slane %v8506_v7, 4  ;;  %v8509_v32 = vld [vmem:[#allocation19_spill] sm:$0xff]  ;;  %s6103_s4 = sld [smem:[#allocation2 + $0x9a]] }
 0x1b8   :  { %8500 = vst [vmem:[#allocation10_spill] sm:$0xff] %v5491_v28  ;;  %8501 = vst [vmem:[#allocation11_spill] sm:$0xff] %v5493_v36  ;;  %v4141_v20 = vrot.slane %v2102_v52, 9  ;;  %v2139_v5 = vmul.f32 %v5271_v25, %v2137_v58  ;;  %v2138_v23 = vmul.f32 %v4935_v0, %v2137_v58  ;;  %v5546_v62 = vadd.f32 %v413_v14, %v5430_v56 }
 0x1b9   :  { %2084 = vrot.lane.b32.xlu1 %v4137_v15, %s4429_s19  ;;  %2082 = vrot.lane.b32.xlu0 %v4136_v19, %s4429_s19  ;;  %v5539_v15 = vmul.f32 %v4929_v27, %v1109_v24  ;;  %v4142_v19 = vrot.slane %v2103_v48, 9  ;;  %v5549_v63 = vadd.f32 %v412_v40, %v5441_v41  ;;  %v5553_v17 = vmul.f32 %v4935_v0, %v1123_v16  ;;  %v8508_v24 = vld [vmem:[#allocation18_spill] sm:$0xff] }
 0x1ba   :  { %v431_v46 = vsel %vm430_vm3, %v8503_v60, %v428_v59  ;;  %v447_v13 = vrot.slane %v8507_v31, 4  ;;  %v466_v61 = vrot.slane %v8508_v24, 4  ;;  %v465_v51 = vrot.slane %v8509_v32, 4  ;;  %v5579_v60 = vld [vmem:[%s8180_s0 + $0xc] sm:$0x77] }
 0x1bb   :  { %v5528_v38 = vpop.permute.xlu1 %1490  ;;  %v5530_v34 = vpop.permute.xlu0 %1488  ;;  %v450_v0 = vsel %vm430_vm3, %v8506_v7, %v448_v43  ;;  %v1137_v48 = vstv %s5504_s5  ;;  %v4145_v52 = vrot.slane %v2139_v5, 9  ;;  %v4144_v14 = vrot.slane %v2138_v23, 9  ;;  %v8512_v5 = vld [vmem:[#allocation20_spill] sm:$0xff]  ;;  %v8515_v7 = vld [vmem:[#allocation21_spill] sm:$0xff]  ;;  %v8516_v27 = vld [vmem:[#allocation22_spill] sm:$0xff]  ;;  %s6139_s5 = sld [smem:[#allocation2 + $0x14]] }
 0x1bc   :  { %8504 = vst [vmem:[#allocation12_spill] sm:$0xff] %v5528_v38  ;;  %8505 = vst [vmem:[#allocation13_spill] sm:$0xff] %v5530_v34  ;;  %v2141_v40 = vmul.f32 %v5306_v50, %v2137_v58  ;;  %v5583_v59 = vadd.f32 %v431_v46, %v5464_v4  ;;  %v2175_v43 = vstv %s5520_s6  ;;  %v484_v4 = vrot.slane %v8512_v5, 4  ;;  %s6157_s6 = sld [smem:[#allocation2 + $0x2f]] }
 0x1bd   :  { %2118 = vrot.lane.b32.xlu1 %v4140_v6, %s4429_s19  ;;  %2116 = vrot.lane.b32.xlu0 %v4139_v10, %s4429_s19  ;;  %v5567_v6 = vadd.f32 %v432_v35, %v5444_v29  ;;  %v2140_v29 = vmul.f32 %v5579_v60, %v2137_v58  ;;  %v5586_v35 = vmul.f32 %v5579_v60, %v1123_v16  ;;  %v483_v10 = vrot.slane %v8515_v7, 4 }
 0x1be   :  { %v467_v58 = vsel %vm430_vm3, %v8509_v32, %v465_v51  ;;  %v5604_v46 = vadd.f32 %v450_v0, %v5476_v57  ;;  %v4147_v57 = vrot.slane %v2141_v40, 9  ;;  %v1165_v38 = vstv %s5616_s16  ;;  %s6346_s16 = sld [smem:[#allocation2 + $0x30]] }
 0x1bf   :  { %v5562_v56 = vpop.permute.xlu1 %1512  ;;  %v5564_v41 = vpop.permute.xlu0 %1510  ;;  %v2251_v12 = vstv %s5661_s17  ;;  %v2365_v37 = vstv %s5853_s21  ;;  %s6439_s21 = sld [smem:[#allocation2 + $0x81]]  ;;  %s6872_s17 = sld [smem:[#allocation2 + $0x18]] }
 0x1c0   :  { %8510 = vst [vmem:[#allocation14_spill] sm:$0xff] %v5562_v56  ;;  %8511 = vst [vmem:[#allocation15_spill] sm:$0xff] %v5564_v41  ;;  %v502_v41 = vrot.slane %v8516_v27, 4  ;;  %v1151_v56 = vstv %s5560_s7  ;;  %s6190_s7 = sld [smem:[#allocation2 + $0x4a]] }
 0x1c1   :  { %2122 = vrot.lane.b32.xlu1 %v4142_v19, %s4429_s19  ;;  %2120 = vrot.lane.b32.xlu0 %v4141_v20, %s4429_s19  ;;  %v449_v19 = vsel %vm430_vm3, %v8507_v31, %v447_v13  ;;  %v468_v20 = vsel %vm430_vm3, %v8508_v24, %v466_v61  ;;  %v5611_v31 = vld [vmem:[%s8180_s0] sm:$0x77]  ;;  %v4146_v24 = vrot.slane %v2140_v29, 9  ;;  %v2177_v61 = vmul.f32 %v5271_v25, %v2175_v43 }
 0x1c2   :  { %v5614_v13 = vmul.f32 %v5611_v31, %v1137_v48  ;;  %v2176_v32 = vmul.f32 %v5611_v31, %v2175_v43  ;;  %v5623_v51 = vadd.f32 %v449_v19, %v5479_v44  ;;  %v5626_v0 = vadd.f32 %v468_v20, %v5482_v9  ;;  %v8520_v20 = vld [vmem:[#allocation24_spill] sm:$0xff] }
 0x1c3   :  { %v5599_v23 = vpop.permute.xlu1 %1534  ;;  %v5601_v16 = vpop.permute.xlu0 %1532  ;;  %v5636_v29 = vmul.f32 %v5579_v60, %v1137_v48  ;;  %v485_v9 = vsel %vm430_vm3, %v8515_v7, %v483_v10  ;;  %v4150_v48 = vrot.slane %v2177_v61, 9  ;;  %v8521_v7 = vld [vmem:[#allocation25_spill] sm:$0xff]  ;;  %v8522_v61 = vld [vmem:[#allocation26_spill] sm:$0xff] }
 0x1c4   :  { %8513 = vst [vmem:[#allocation16_spill] sm:$0xff] %v5599_v23  ;;  %8514 = vst [vmem:[#allocation17_spill] sm:$0xff] %v5601_v16  ;;  %v5629_v16 = vadd.f32 %v467_v58, %v5496_v1  ;;  %v504_v1 = vsel %vm430_vm3, %v8516_v27, %v502_v41  ;;  %v520_v58 = vrot.slane %v8520_v20, 4  ;;  %v2179_v23 = vmul.f32 %v5306_v50, %v2175_v43 }
 0x1c5   :  { %2156 = vrot.lane.b32.xlu1 %v4145_v52, %s4429_s19  ;;  %2154 = vrot.lane.b32.xlu0 %v4144_v14, %s4429_s19  ;;  %v486_v52 = vsel %vm430_vm3, %v8512_v5, %v484_v4  ;;  %v8517_v14 = vld [vmem:[#allocation23_spill] sm:$0xff]  ;;  %v4149_v4 = vrot.slane %v2176_v32, 9  ;;  %v519_v27 = vrot.slane %v8521_v7, 4  ;;  %v5658_v41 = vmul.f32 %v5611_v31, %v1151_v56 }
 0x1c6   :  { %v501_v40 = vrot.slane %v8517_v14, 4  ;;  %v5654_v10 = vadd.f32 %v486_v52, %v5499_v11  ;;  %v2213_v5 = vstv %s5590_s12  ;;  %s6320_s12 = sld [smem:[#allocation2 + $0x15]] }
 0x1c7   :  { %v5639_v44 = vpop.permute.xlu1 %1556  ;;  %v5641_v19 = vpop.permute.xlu0 %1554  ;;  %v2215_v32 = vmul.f32 %v5271_v25, %v2213_v5 }
 0x1c8   :  { %8518 = vst [vmem:[#allocation18_spill] sm:$0xff] %v5639_v44  ;;  %8519 = vst [vmem:[#allocation19_spill] sm:$0xff] %v5641_v19  ;;  %v2178_v19 = vmul.f32 %v5579_v60, %v2175_v43  ;;  %v538_v43 = vrot.slane %v8522_v61, 4  ;;  %v5677_v44 = vadd.f32 %v504_v1, %v5514_v18  ;;  %v521_v18 = vsel %vm430_vm3, %v8521_v7, %v519_v27  ;;  %v8529_v27 = vld [vmem:[#allocation29_spill] sm:$0xff] }
 0x1c9   :  { %2160 = vrot.lane.b32.xlu1 %v4147_v57, %s4429_s19  ;;  %2158 = vrot.lane.b32.xlu0 %v4146_v24, %s4429_s19  ;;  %v5664_v57 = vadd.f32 %v485_v9, %v5511_v42  ;;  %v503_v24 = vsel %vm430_vm3, %v8517_v14, %v501_v40  ;;  %v522_v42 = vsel %vm430_vm3, %v8520_v20, %v520_v58  ;;  %v8525_v9 = vld [vmem:[#allocation27_spill] sm:$0xff]  ;;  %v4152_v14 = vrot.slane %v2179_v23, 9 }
 0x1ca   :  { %v537_v34 = vrot.slane %v8525_v9, 4  ;;  %v4151_v40 = vrot.slane %v2178_v19, 9  ;;  %v5693_v1 = vmul.f32 %v5579_v60, %v1151_v56  ;;  %v5697_v58 = vadd.f32 %v522_v42, %v5546_v62  ;;  %v8526_v19 = vld [vmem:[#allocation28_spill] sm:$0xff]  ;;  %v8530_v62 = vld [vmem:[#allocation30_spill] sm:$0xff]  ;;  %v8531_v20 = vld [vmem:[#allocation31_spill] sm:$0xff] }
 0x1cb   :  { %v5672_v11 = vpop.permute.xlu1 %1578  ;;  %v5674_v52 = vpop.permute.xlu0 %1576  ;;  %v541_v23 = vsel %vm539_vm4, %v8522_v61, %v538_v43  ;;  %v575_v42 = vrot.slane %v8530_v62, 4  ;;  %v574_v61 = vrot.slane %v8531_v20, 4  ;;  %v4155_v43 = vrot.slane %v2215_v32, 9 }
 0x1cc   :  { %8523 = vst [vmem:[#allocation20_spill] sm:$0xff] %v5672_v11  ;;  %8524 = vst [vmem:[#allocation21_spill] sm:$0xff] %v5674_v52  ;;  %v2214_v11 = vmul.f32 %v5611_v31, %v2213_v5  ;;  %v5688_v52 = vadd.f32 %v503_v24, %v5533_v55  ;;  %v540_v56 = vsel %vm539_vm4, %v8525_v9, %v537_v34  ;;  %v556_v24 = vrot.slane %v8529_v27, 4  ;;  %v8538_v9 = vld [vmem:[#allocation36_spill] sm:$0xff] }
 0x1cd   :  { %2194 = vrot.lane.b32.xlu1 %v4150_v48, %s4429_s19  ;;  %2192 = vrot.lane.b32.xlu0 %v4149_v4, %s4429_s19  ;;  %v557_v48 = vrot.slane %v8526_v19, 4  ;;  %v5703_v4 = vmul.f32 %v5611_v31, %v1165_v38  ;;  %v5719_v28 = vadd.f32 %v521_v18, %v5549_v63  ;;  %v5722_v34 = vadd.f32 %v541_v23, %v5567_v6 }
 0x1ce   :  { %v4154_v36 = vrot.slane %v2214_v11, 9  ;;  %v558_v6 = vsel %vm539_vm4, %v8529_v27, %v556_v24  ;;  %v577_v18 = vsel %vm539_vm4, %v8530_v62, %v575_v42  ;;  %v5746_v23 = vmul.f32 %v5579_v60, %v1165_v38  ;;  %v8534_v62 = vld [vmem:[#allocation32_spill] sm:$0xff] }
 0x1cf   :  { %v5705_v55 = vpop.permute.xlu1 %1600  ;;  %v5707_v7 = vpop.permute.xlu0 %1598  ;;  %v559_v32 = vsel %vm539_vm4, %v8526_v19, %v557_v48  ;;  %v2252_v27 = vmul.f32 %v5611_v31, %v2251_v12  ;;  %v593_v42 = vrot.slane %v8534_v62, 4 }
 0x1d0   :  { %8527 = vst [vmem:[#allocation22_spill] sm:$0xff] %v5705_v55  ;;  %8528 = vst [vmem:[#allocation23_spill] sm:$0xff] %v5707_v7  ;;  %v2217_v55 = vmul.f32 %v5306_v50, %v2213_v5  ;;  %v2216_v7 = vmul.f32 %v5579_v60, %v2213_v5  ;;  %v1179_v5 = vstv %s5670_s18  ;;  %v5753_v24 = vadd.f32 %v559_v32, %v5604_v46  ;;  %s6893_s18 = sld [smem:[#allocation2 + $0x33]] }
 0x1d1   :  { %2198 = vrot.lane.b32.xlu1 %v4152_v14, %s4429_s19  ;;  %2196 = vrot.lane.b32.xlu0 %v4151_v40, %s4429_s19  ;;  %v5729_v14 = vadd.f32 %v540_v56, %v5583_v59  ;;  %v576_v59 = vsel %vm539_vm4, %v8531_v20, %v574_v61  ;;  %v2253_v56 = vmul.f32 %v5271_v25, %v2251_v12  ;;  %v8535_v20 = vld [vmem:[#allocation33_spill] sm:$0xff]  ;;  %v4159_v47 = vrot.slane %v2252_v27, 9 }
 0x1d2   :  { %v4157_v19 = vrot.slane %v2217_v55, 9  ;;  %v4156_v48 = vrot.slane %v2216_v7, 9  ;;  %v592_v61 = vrot.slane %v8535_v20, 4  ;;  %v5758_v38 = vmul.f32 %v5611_v31, %v1179_v5  ;;  %v8537_v7 = vld [vmem:[#allocation35_spill] sm:$0xff] }
 0x1d3   :  { %v5735_v40 = vpop.permute.xlu1 %1622  ;;  %v5737_v63 = vpop.permute.xlu0 %1620  ;;  %v610_v11 = vrot.slane %v8537_v7, 4  ;;  %v5771_v32 = vadd.f32 %v577_v18, %v5626_v0  ;;  %v5774_v2 = vadd.f32 %v576_v59, %v5629_v16  ;;  %v4160_v26 = vrot.slane %v2253_v56, 9  ;;  %v8545_v18 = vld [vmem:[#allocation39_spill] sm:$0xff] }
 0x1d4   :  { %8532 = vst [vmem:[#allocation24_spill] sm:$0xff] %v5735_v40  ;;  %8533 = vst [vmem:[#allocation25_spill] sm:$0xff] %v5737_v63  ;;  %v629_v63 = vrot.slane %v8538_v9, 4  ;;  %v595_v0 = vsel %vm539_vm4, %v8534_v62, %v593_v42  ;;  %v594_v16 = vsel %vm539_vm4, %v8535_v20, %v592_v61  ;;  %v2289_v59 = vstv %s5726_s20  ;;  %v8544_v20 = vld [vmem:[#allocation38_spill] sm:$0xff]  ;;  %s6386_s20 = sld [smem:[#allocation2 + $0x4b]] }
 0x1d5   :  { %2232 = vrot.lane.b32.xlu1 %v4155_v43, %s4430_s25  ;;  %2230 = vrot.lane.b32.xlu0 %v4154_v36, %s4430_s25  ;;  %v5761_v43 = vadd.f32 %v558_v6, %v5623_v51  ;;  %v8536_v36 = vld [vmem:[#allocation34_spill] sm:$0xff]  ;;  %v628_v51 = vrot.slane %v8541_v21, 4  ;;  %v5797_v56 = vmul.f32 %v5579_v60, %v1179_v5  ;;  %v647_v61 = vrot.slane %v8544_v20, 4 }
 0x1d6   :  { %v611_v55 = vrot.slane %v8536_v36, 4  ;;  %v2291_v5 = vmul.f32 %v5271_v25, %v2289_v59 }
 0x1d7   :  { %v5766_v40 = vpop.permute.xlu1 %1644  ;;  %v5768_v46 = vpop.permute.xlu0 %1642  ;;  %v630_v42 = vsel %vm539_vm4, %v8541_v21, %v628_v51  ;;  %v5816_v21 = vadd.f32 %v594_v16, %v5664_v57  ;;  %v8547_v51 = vld [vmem:[#allocation41_spill] sm:$0xff] }
 0x1d8   :  { %8539 = vst [vmem:[#allocation26_spill] sm:$0xff] %v5766_v40  ;;  %8540 = vst [vmem:[#allocation27_spill] sm:$0xff] %v5768_v46  ;;  %v2255_v40 = vmul.f32 %v5306_v50, %v2251_v12  ;;  %v2254_v46 = vmul.f32 %v5579_v60, %v2251_v12  ;;  %v631_v12 = vsel %vm539_vm4, %v8538_v9, %v629_v63  ;;  %v4165_v16 = vrot.slane %v2291_v5, 9 }
 0x1d9   :  { %2236 = vrot.lane.b32.xlu1 %v4157_v19, %s4430_s25  ;;  %2234 = vrot.lane.b32.xlu0 %v4156_v48, %s4430_s25  ;;  %v613_v19 = vsel %vm539_vm4, %v8536_v36, %v611_v55  ;;  %v612_v48 = vsel %vm539_vm4, %v8537_v7, %v610_v11  ;;  %v646_v36 = vrot.slane %v8545_v18, 4  ;;  %v8546_v55 = vld [vmem:[#allocation40_spill] sm:$0xff]  ;;  %v2290_v63 = vmul.f32 %v5611_v31, %v2289_v59 }
 0x1da   :  { %v666_v6 = vrot.slane %v8546_v55, 4  ;;  %v4162_v9 = vrot.slane %v2255_v40, 9  ;;  %v4161_v11 = vrot.slane %v2254_v46, 9  ;;  %v5813_v7 = vadd.f32 %v595_v0, %v5654_v10 }
 0x1db   :  { %v5799_v27 = vpop.permute.xlu1 %1666  ;;  %v5801_v62 = vpop.permute.xlu0 %1664  ;;  %v5827_v40 = vadd.f32 %v631_v12, %v5697_v58  ;;  %v5835_v0 = vadd.f32 %v630_v42, %v5719_v28  ;;  %v2292_v28 = vmul.f32 %v5579_v60, %v2289_v59 }
 0x1dc   :  { %8542 = vst [vmem:[#allocation28_spill] sm:$0xff] %v5799_v27  ;;  %8543 = vst [vmem:[#allocation29_spill] sm:$0xff] %v5801_v62  ;;  %v665_v62 = vrot.slane %v8547_v51, 4  ;;  %v8548_v27 = vld [vmem:[#allocation42_spill] sm:$0xff]  ;;  %v668_v58 = vsel %vm648_vm5, %v8546_v55, %v666_v6  ;;  %v8552_v6 = vld [vmem:[#allocation44_spill] sm:$0xff] }
 0x1dd   :  { %2270 = vrot.lane.b32.xlu1 %v4160_v26, %s4430_s25  ;;  %2268 = vrot.lane.b32.xlu0 %v4159_v47, %s4430_s25  ;;  %v684_v33 = vrot.slane %v8548_v27, 4  ;;  %v5821_v26 = vadd.f32 %v613_v19, %v5677_v44  ;;  %v5824_v47 = vadd.f32 %v612_v48, %v5688_v52  ;;  %v650_v44 = vsel %vm648_vm5, %v8544_v20, %v647_v61  ;;  %v8553_v55 = vld [vmem:[#allocation45_spill] sm:$0xff] }
 0x1de   :  { %v649_v52 = vsel %vm648_vm5, %v8545_v18, %v646_v36  ;;  %v4164_v19 = vrot.slane %v2290_v63, 9  ;;  %v2293_v48 = vmul.f32 %v5306_v50, %v2289_v59  ;;  %v667_v12 = vsel %vm648_vm5, %v8547_v51, %v665_v62  ;;  %v8551_v18 = vld [vmem:[#allocation43_spill] sm:$0xff]  ;;  %v8558_v51 = vld [vmem:[#allocation50_spill] sm:$0xff] }
 0x1df   :  { %v5830_v10 = vpop.permute.xlu1 %1688  ;;  %v5832_v57 = vpop.permute.xlu0 %1686  ;;  %v686_v42 = vsel %vm648_vm5, %v8548_v27, %v684_v33  ;;  %v683_v20 = vrot.slane %v8551_v18, 4  ;;  %v2327_v61 = vstv %s5788_s1  ;;  %v702_v36 = vrot.slane %v8552_v6, 4  ;;  %v8555_v63 = vld [vmem:[#allocation47_spill] sm:$0xff]  ;;  %s6418_s1 = sld [smem:[#allocation2 + $0x66]] }
 0x1e0   :  { %8549 = vst [vmem:[#allocation30_spill] sm:$0xff] %v5830_v10  ;;  %8550 = vst [vmem:[#allocation31_spill] sm:$0xff] %v5832_v57  ;;  %v719_v46 = vrot.slane %v8555_v63, 4  ;;  %v5864_v33 = vadd.f32 %v650_v44, %v5722_v34  ;;  %v5867_v27 = vadd.f32 %v649_v52, %v5729_v14  ;;  %v764_v57 = vrot.slane %v8558_v51, 4  ;;  %v8559_v10 = vld [vmem:[#allocation51_spill] sm:$0xff] }
 0x1e1   :  { %2274 = vrot.lane.b32.xlu1 %v4162_v9, %s4430_s25  ;;  %2272 = vrot.lane.b32.xlu0 %v4161_v11, %s4430_s25  ;;  %v701_v9 = vrot.slane %v8553_v55, 4  ;;  %v8554_v11 = vld [vmem:[#allocation46_spill] sm:$0xff]  ;;  %v763_v39 = vrot.slane %v8559_v10, 4  ;;  %v4167_v8 = vrot.slane %v2293_v48, 9  ;;  %v4166_v49 = vrot.slane %v2292_v28, 9 }
 0x1e2   :  { %v720_v5 = vrot.slane %v8554_v11, 4  ;;  %v5876_v34 = vadd.f32 %v668_v58, %v5753_v24  ;;  %v5879_v14 = vadd.f32 %v667_v12, %v5761_v43  ;;  %v5882_v44 = vadd.f32 %v686_v42, %v5771_v32  ;;  %v8562_v58 = vld [vmem:[#allocation48_spill] sm:$0xff]  ;;  %v8563_v12 = vld [vmem:[#allocation49_spill] sm:$0xff] }
 0x1e3   :  { %v5859_v59 = vpop.permute.xlu1 %1710  ;;  %v5861_v62 = vpop.permute.xlu0 %1708  ;;  %v685_v52 = vsel %vm648_vm5, %v8551_v18, %v683_v20  ;;  %v721_v24 = vsel %vm648_vm5, %v8555_v63, %v719_v46  ;;  %v738_v28 = vrot.slane %v8562_v58, 4  ;;  %v737_v42 = vrot.slane %v8563_v12, 4  ;;  %v8564_v20 = vld [vmem:[#allocation52_spill] sm:$0xff]  ;;  %v8566_v63 = vld [vmem:[#allocation54_spill] sm:$0xff] }
 0x1e4   :  { %8556 = vst [vmem:[#allocation32_spill] sm:$0xff] %v5859_v59  ;;  %8557 = vst [vmem:[#allocation33_spill] sm:$0xff] %v5861_v62  ;;  %v2329_v59 = vmul.f32 %v5271_v25, %v2327_v61  ;;  %v2328_v62 = vmul.f32 %v5611_v31, %v2327_v61  ;;  %v722_v48 = vsel %vm648_vm5, %v8554_v11, %v720_v5  ;;  %v8565_v11 = vld [vmem:[#allocation53_spill] sm:$0xff]  ;;  %v796_v51 = vrot.slane %v8566_v63, 4 }
 0x1e5   :  { %2308 = vrot.lane.b32.xlu1 %v4165_v16, %s4430_s25  ;;  %2306 = vrot.lane.b32.xlu0 %v4164_v19, %s4430_s25  ;;  %v704_v16 = vsel %vm648_vm5, %v8552_v6, %v702_v36  ;;  %v703_v19 = vsel %vm648_vm5, %v8553_v55, %v701_v9  ;;  %v768_v18 = vsel %vm767_vm6, %v763_v39, %v764_v57  ;;  %v766_v6 = vrot.slane %v8564_v20, 4  ;;  %v8568_v39 = vld [vmem:[#allocation56_spill] sm:$0xff] }
 0x1e6   :  { %v4170_v36 = vrot.slane %v2329_v59, 9  ;;  %v4169_v55 = vrot.slane %v2328_v62, 9  ;;  %v2331_v46 = vmul.f32 %v5306_v50, %v2327_v61  ;;  %v2330_v9 = vmul.f32 %v5579_v60, %v2327_v61  ;;  %v8571_v62 = vld [vmem:[#allocation59_spill] sm:$0xff] }
 0x1e7   :  { %v5894_v43 = vpop.permute.xlu1 %1732  ;;  %v5896_v32 = vpop.permute.xlu0 %1730  ;;  %v765_v5 = vrot.slane %v8565_v11, 4  ;;  %v798_v57 = vrot.slane %v8568_v39, 4  ;;  %v825_v22 = vrot.slane %v8571_v62, 4  ;;  %v689_v30 = vadd.f32 %v685_v52, %v5774_v2 }
 0x1e8   :  { %8560 = vst [vmem:[#allocation34_spill] sm:$0xff] %v5894_v43  ;;  %8561 = vst [vmem:[#allocation35_spill] sm:$0xff] %v5896_v32  ;;  %v8567_v32 = vld [vmem:[#allocation55_spill] sm:$0xff]  ;;  %v5922_v63 = vadd.f32 %v704_v16, %v5813_v7  ;;  %v5925_v53 = vadd.f32 %v703_v19, %v5816_v21  ;;  %v5928_v39 = vadd.f32 %v722_v48, %v5821_v26  ;;  %v4171_v54 = vrot.slane %v2330_v9, 9 }
 0x1e9   :  { %2312 = vrot.lane.b32.xlu1 %v4167_v8, %s4430_s25  ;;  %2310 = vrot.lane.b32.xlu0 %v4166_v49, %s4430_s25  ;;  %v795_v43 = vrot.slane %v8567_v32, 4  ;;  %v8569_v8 = vld [vmem:[#allocation57_spill] sm:$0xff]  ;;  %v8570_v49 = vld [vmem:[#allocation58_spill] sm:$0xff]  ;;  %v5935_v2 = vadd.f32 %v721_v24, %v5824_v47  ;;  %v740_v7 = vsel %vm648_vm5, %v8562_v58, %v738_v28  ;;  %v739_v21 = vsel %vm648_vm5, %v8563_v12, %v737_v42  ;;  %v8574_v58 = vld [vmem:[#allocation60_spill] sm:$0xff] }
 0x1ea   :  { %v797_v20 = vrot.slane %v8569_v8, 4  ;;  %v826_v59 = vrot.slane %v8570_v49, 4  ;;  %v4172_v49 = vrot.slane %v2331_v46, 9  ;;  %v770_v26 = vsel %vm769_vm7, %v8559_v10, %v768_v18  ;;  %v8576_v42 = vld [vmem:[#allocation62_spill] sm:$0xff]  ;;  %v8577_v10 = vld [vmem:[#allocation63_spill] sm:$0xff] }
 0x1eb   :  { %v5916_v3 = vpop.permute.xlu1 %1754  ;;  %v5918_v61 = vpop.permute.xlu0 %1752  ;;  %v771_v52 = vsel %vm767_vm6, %v765_v5, %v766_v6  ;;  %v799_v16 = vsel %vm767_vm6, %v795_v43, %v796_v51  ;;  %v828_v28 = vrot.slane %v8574_v58, 4  ;;  %v855_v18 = vrot.slane %v8577_v10, 4  ;;  %v8578_v5 = vld [vmem:[#allocation64_spill] sm:$0xff] }
 0x1ec   :  { %8572 = vst [vmem:[#allocation36_spill] sm:$0xff] %v5916_v3  ;;  %8573 = vst [vmem:[#allocation37_spill] sm:$0xff] %v5918_v61  ;;  %v2367_v3 = vmul.f32 %v5271_v25, %v2365_v37  ;;  %v2366_v61 = vmul.f32 %v5611_v31, %v2365_v37  ;;  %v801_v19 = vsel %vm767_vm6, %v797_v20, %v798_v57  ;;  %v858_v51 = vrot.slane %v8578_v5, 4  ;;  %v8579_v57 = vld [vmem:[#allocation65_spill] sm:$0xff] }
 0x1ed   :  { %2346 = vrot.lane.b32.xlu1 %v4170_v36, %s4430_s25  ;;  %2344 = vrot.lane.b32.xlu0 %v4169_v55, %s4430_s25  ;;  %v829_v48 = vsel %vm767_vm6, %v825_v22, %v826_v59  ;;  %v8575_v36 = vld [vmem:[#allocation61_spill] sm:$0xff]  ;;  %v856_v55 = vrot.slane %v8576_v42, 4  ;;  %v2369_v22 = vmul.f32 %v5306_v50, %v2365_v37  ;;  %v2368_v46 = vmul.f32 %v5579_v60, %v2365_v37 }
 0x1ee   :  { %v827_v12 = vrot.slane %v8575_v36, 4  ;;  %v4175_v43 = vrot.slane %v2367_v3, 9  ;;  %v4174_v6 = vrot.slane %v2366_v61, 9  ;;  %v5960_v9 = vadd.f32 %v740_v7, %v5827_v40 }
 0x1ef   :  { %v5947_v47 = vpop.permute.xlu1 %1776  ;;  %v5949_v24 = vpop.permute.xlu0 %1774  ;;  %v857_v20 = vrot.slane %v8579_v57, 4  ;;  %v2403_v59 = vstv %s5910_s22  ;;  %v772_v3 = vsel %vm769_vm7, %v8565_v11, %v771_v52  ;;  %v800_v37 = vsel %vm769_vm7, %v8567_v32, %v799_v16  ;;  %v8581_v16 = vld [vmem:[#allocation66_spill] sm:$0xff]  ;;  %s6484_s22 = sld [smem:[#allocation2 + $0x16]] }
 0x1f0   :  { %v802_v7 = vsel %vm769_vm7, %v8569_v8, %v801_v19  ;;  %v4177_v32 = vrot.slane %v2369_v22, 9  ;;  %v4176_v11 = vrot.slane %v2368_v46, 9  ;;  %v2404_v52 = vmul.f32 %v5611_v31, %v2403_v59 }
 0x1f1   :  { %2350 = vrot.lane.b32.xlu1 %v4172_v49, %s4430_s25  ;;  %2348 = vrot.lane.b32.xlu0 %v4171_v54, %s4430_s25  ;;  %v5968_v49 = vadd.f32 %v739_v21, %v5835_v0  ;;  %v5971_v54 = vadd.f32 %v770_v26, %v5867_v27  ;;  %v830_v0 = vsel %vm769_vm7, %v8571_v62, %v829_v48  ;;  %v886_v19 = vrot.slane %v8581_v16, 4  ;;  %v8582_v48 = vld [vmem:[#allocation67_spill] sm:$0xff]  ;;  %v8595_v16 = vld [vmem:[#allocation76_spill] sm:$0xff] }
 0x1f2   :  { %v831_v21 = vsel %vm767_vm6, %v827_v12, %v828_v28  ;;  %v859_v27 = vsel %vm767_vm6, %v855_v18, %v856_v55  ;;  %v2405_v26 = vmul.f32 %v5271_v25, %v2403_v59  ;;  %v5994_v8 = vadd.f32 %v772_v3, %v5864_v33  ;;  %v8588_v3 = vld [vmem:[#allocation69_spill] sm:$0xff] }
 0x1f3   :  { %v5977_v40 = vpop.permute.xlu1 %1798  ;;  %v5979_v61 = vpop.permute.xlu0 %1796  ;;  %v861_v62 = vsel %vm767_vm6, %v857_v20, %v858_v51  ;;  %v885_v58 = vrot.slane %v8582_v48, 4  ;;  %v6000_v28 = vadd.f32 %v800_v37, %v5879_v14  ;;  %v6003_v12 = vadd.f32 %v802_v7, %v5876_v34  ;;  %v8586_v14 = vld [vmem:[#allocation75_spill] sm:$0xff] }
 0x1f4   :  { %8580 = vst [vmem:[#allocation38_spill] sm:$0xff] %v5979_v61  ;;  %v6005_v25 = vadd.f32 %v830_v0, %v689_v30  ;;  %v832_v42 = vsel %vm769_vm7, %v8575_v36, %v831_v21  ;;  %v860_v18 = vsel %vm769_vm7, %v8577_v10, %v859_v27  ;;  %v945_v22 = vrot.slane %v8586_v14, 4  ;;  %v8587_v10 = vld [vmem:[#allocation68_spill] sm:$0xff]  ;;  %v8590_v0 = vld [vmem:[#allocation71_spill] sm:$0xff] }
 0x1f5   :  { %2384 = vrot.lane.b32.xlu1 %v4175_v43, %s4430_s25  ;;  %2382 = vrot.lane.b32.xlu0 %v4174_v6, %s4430_s25  ;;  %v8585_v43 = vld [vmem:[#allocation74_spill] sm:$0xff]  ;;  %v2407_v34 = vmul.f32 %v5306_v50, %v2403_v59  ;;  %v862_v30 = vsel %vm769_vm7, %v8579_v57, %v861_v62  ;;  %v4180_v36 = vrot.slane %v2405_v26, 9  ;;  %v4179_v46 = vrot.slane %v2404_v52, 9  ;;  %v8591_v27 = vld [vmem:[#allocation72_spill] sm:$0xff] }
 0x1f6   :  { %v946_v6 = vrot.slane %v8585_v43, 4  ;;  %v2406_v5 = vmul.f32 %v5579_v60, %v2403_v59  ;;  %v889_v51 = vsel %vm767_vm6, %v885_v58, %v886_v19  ;;  %v888_v20 = vrot.slane %v8587_v10, 4  ;;  %v8589_v50 = vld [vmem:[#allocation70_spill] sm:$0xff]  ;;  %v8596_v58 = vld [vmem:[#allocation77_spill] sm:$0xff] }
 0x1f7   :  { %v6009_v33 = vpop.permute.xlu1 %1820  ;;  %v6011_v55 = vpop.permute.xlu0 %1818  ;;  %v887_v37 = vrot.slane %v8588_v3, 4  ;;  %v2525_v7 = vstv %s5965_s23  ;;  %v916_v57 = vrot.slane %v8589_v50, 4  ;;  %v915_v21 = vrot.slane %v8590_v0, 4  ;;  %s6496_s23 = sld [smem:[#allocation2 + $0x12]] }
 0x1f8   :  { %8583 = vst [vmem:[#allocation39_spill] sm:$0xff] %v6009_v33  ;;  %8584 = vst [vmem:[#allocation40_spill] sm:$0xff] %v6011_v55  ;;  %v949_v62 = vsel %vm767_vm6, %v945_v22, %v946_v6  ;;  %v948_v19 = vrot.slane %v8595_v16, 4  ;;  %v947_v43 = vrot.slane %v8596_v58, 4  ;;  %v4182_v10 = vrot.slane %v2407_v34, 9  ;;  %v8598_v16 = vld [vmem:[#allocation79_spill] sm:$0xff] }
 0x1f9   :  { %2388 = vrot.lane.b32.xlu1 %v4177_v32, %s4430_s25  ;;  %2386 = vrot.lane.b32.xlu0 %v4176_v11, %s4430_s25  ;;  %v918_v32 = vrot.slane %v8591_v27, 4  ;;  %v8592_v11 = vld [vmem:[#allocation73_spill] sm:$0xff]  ;;  %v4181_v50 = vrot.slane %v2406_v5, 9  ;;  %v2527_v27 = vmul.f32 %v5579_v60, %v2525_v7  ;;  %v2526_v55 = vmul.f32 %v5611_v31, %v2525_v7  ;;  %v8597_v5 = vld [vmem:[#allocation78_spill] sm:$0xff] }
 0x1fa   :  { %v917_v26 = vrot.slane %v8592_v11, 4  ;;  %v2547_v33 = vstv %s5991_s24  ;;  %v6051_v6 = vadd.f32 %v860_v18, %v5925_v53  ;;  %v890_v22 = vsel %vm769_vm7, %v8582_v48, %v889_v51  ;;  %s6521_s24 = sld [smem:[#allocation2 + $0x31]] }
 0x1fb   :  { %v6033_v52 = vpop.permute.xlu1 %1842  ;;  %v6035_v59 = vpop.permute.xlu0 %1840  ;;  %v891_v34 = vsel %vm767_vm6, %v887_v37, %v888_v20  ;;  %v977_v7 = vrot.slane %v8597_v5, 4  ;;  %v6065_v53 = vadd.f32 %v862_v30, %v5922_v63  ;;  %v951_v48 = vsel %vm950_vm8, %v8586_v14, %v949_v62 }
 0x1fc   :  { %8593 = vst [vmem:[#allocation41_spill] sm:$0xff] %v6033_v52  ;;  %8594 = vst [vmem:[#allocation42_spill] sm:$0xff] %v6035_v59  ;;  %v6048_v59 = vadd.f32 %v832_v42, %v5882_v44  ;;  %v976_v52 = vrot.slane %v8598_v16, 4  ;;  %v952_v42 = vsel %vm767_vm6, %v947_v43, %v948_v19  ;;  %v2549_v18 = vmul.f32 %v5579_v60, %v2547_v33 }
 0x1fd   :  { %2422 = vrot.lane.b32.xlu1 %v4180_v36, %s4430_s25  ;;  %2420 = vrot.lane.b32.xlu0 %v4179_v46, %s4430_s25  ;;  %v919_v36 = vsel %vm767_vm6, %v915_v21, %v916_v57  ;;  %v921_v46 = vsel %vm767_vm6, %v917_v26, %v918_v32  ;;  %v6072_v51 = vadd.f32 %v890_v22, %v5935_v2  ;;  %v4203_v20 = vrot.slane %v2527_v27, 10  ;;  %v8599_v32 = vld [vmem:[#allocation80_spill] sm:$0xff] }
 0x1fe   :  { %v4202_v37 = vrot.slane %v2526_v55, 10  ;;  %v2548_v57 = vmul.f32 %v5611_v31, %v2547_v33  ;;  %v892_v63 = vsel %vm769_vm7, %v8588_v3, %v891_v34  ;;  %v920_v14 = vsel %vm769_vm7, %v8590_v0, %v919_v36  ;;  %v8602_v0 = vld [vmem:[#allocation81_spill] sm:$0xff]  ;;  %v8605_v34 = vld [vmem:[#allocation84_spill] sm:$0xff] }
 0x1ff   :  { %v6060_v61 = vpop.permute.xlu1 %1864  ;;  %v6062_v44 = vpop.permute.xlu0 %1862  ;;  %v922_v30 = vsel %vm769_vm7, %v8592_v11, %v921_v46  ;;  %v2569_v21 = vstv %s6027_s26  ;;  %v956_v2 = vadd.f32 %v951_v48, %v5971_v54  ;;  %v953_v55 = vsel %vm950_vm8, %v8596_v58, %v952_v42  ;;  %v8603_v11 = vld [vmem:[#allocation82_spill] sm:$0xff]  ;;  %v8606_v46 = vld [vmem:[#allocation85_spill] sm:$0xff]  ;;  %v8608_v42 = vld [vmem:[#allocation87_spill] sm:$0xff]  ;;  %s6546_s26 = sld [smem:[#allocation2 + $0x4c]] }
 0x200   :  { %v980_v33 = vsel %vm767_vm6, %v976_v52, %v977_v7  ;;  %v979_v26 = vrot.slane %v8599_v32, 4  ;;  %v978_v19 = vrot.slane %v8602_v0, 4  ;;  %v1007_v43 = vrot.slane %v8603_v11, 4  ;;  %v8607_v7 = vld [vmem:[#allocation86_spill] sm:$0xff] }
 0x201   :  { %2426 = vrot.lane.b32.xlu1 %v4182_v10, %s4430_s25  ;;  %2424 = vrot.lane.b32.xlu0 %v4181_v50, %s4430_s25  ;;  %v8604_v10 = vld [vmem:[#allocation83_spill] sm:$0xff]  ;;  %v4206_v27 = vrot.slane %v2549_v18, 10  ;;  %v4205_v54 = vrot.slane %v2548_v57, 10  ;;  %v2571_v52 = vmul.f32 %v5579_v60, %v2569_v21  ;;  %v2570_v58 = vmul.f32 %v5611_v31, %v2569_v21 }
 0x202   :  { %v1006_v50 = vrot.slane %v8604_v10, 4  ;;  %v2591_v22 = vstv %s6045_s29  ;;  %v1009_v36 = vrot.slane %v8605_v34, 4  ;;  %v1008_v5 = vrot.slane %v8606_v46, 4  ;;  %s6562_s29 = sld [smem:[#allocation2 + $0x2d]] }
 0x203   :  { %v6091_v3 = vpop.permute.xlu1 %1886  ;;  %v6093_v62 = vpop.permute.xlu0 %1884  ;;  %v1037_v48 = vrot.slane %v8607_v7, 4  ;;  %v1036_v18 = vrot.slane %v8608_v42, 4  ;;  %v6116_v57 = vadd.f32 %v922_v30, %v5960_v9  ;;  %v8609_v21 = vrot.slane %v5517_v45, 9 }
 0x204   :  { %8600 = vst [vmem:[#allocation43_spill] sm:$0xff] %v6091_v3  ;;  %8601 = vst [vmem:[#allocation44_spill] sm:$0xff] %v6093_v62  ;;  %v957_v7 = vadd.f32 %v953_v55, %v5994_v8  ;;  %v1010_v9 = vsel %vm767_vm6, %v1006_v50, %v1007_v43  ;;  %v4209_v45 = vrot.slane %v2571_v52, 10  ;;  %v2592_v30 = vmul.f32 %v5611_v31, %v2591_v22  ;;  %v8612_v55 = vld [vmem:[#allocation88_spill] sm:$0xff]  ;;  %v8614_v43 = vld [vmem:[#allocation90_spill] sm:$0xff] }
 0x205   :  { %2536 = vrot.lane.b32.xlu1 %v4203_v20, %s4423_s28  ;;  %2534 = vrot.lane.b32.xlu0 %v4202_v37, %s4423_s28  ;;  %v6110_v20 = vadd.f32 %v892_v63, %v5928_v39  ;;  %v6113_v37 = vadd.f32 %v920_v14, %v5968_v49  ;;  %v6120_v32 = vadd.f32 %v8609_v21, %v956_v2  ;;  %v4208_v14 = vrot.slane %v2570_v58, 10  ;;  %v8616_v52 = vld [vmem:[#allocation92_spill] sm:$0xff] }
 0x206   :  { %v981_v39 = vsel %vm950_vm8, %v8598_v16, %v980_v33  ;;  %v982_v49 = vsel %vm767_vm6, %v978_v19, %v979_v26  ;;  %v2593_v63 = vmul.f32 %v5579_v60, %v2591_v22  ;;  %v1012_v2 = vsel %vm767_vm6, %v1008_v5, %v1009_v36  ;;  %v8613_v26 = vld [vmem:[#allocation89_spill] sm:$0xff] }
 0x207   :  { %v6122_v11 = vpop.permute.xlu1 %1908  ;;  %v6124_v34 = vpop.permute.xlu0 %1906  ;;  %v1040_v8 = vsel %vm767_vm6, %v1036_v18, %v1037_v48  ;;  %v1039_v16 = vrot.slane %v8612_v55, 4  ;;  %v2613_v33 = vstv %s6084_s30  ;;  %v1038_v19 = vrot.slane %v8613_v26, 4  ;;  %v8619_v36 = vld [vmem:[#allocation93_spill] sm:$0xff]  ;;  %v8620_v48 = vld [vmem:[#allocation94_spill] sm:$0xff]  ;;  %v8621_v55 = vld [vmem:[#allocation95_spill] sm:$0xff]  ;;  %s6571_s30 = sld [smem:[#allocation2 + $0x67]] }
 0x208   :  { %8610 = vst [vmem:[#allocation45_spill] sm:$0xff] %v6122_v11  ;;  %8611 = vst [vmem:[#allocation46_spill] sm:$0xff] %v6124_v34  ;;  %v1067_v50 = vrot.slane %v8614_v43, 4  ;;  %v1069_v58 = vrot.slane %v8616_v52, 4  ;;  %v1068_v5 = vrot.slane %v8619_v36, 4  ;;  %v1097_v18 = vrot.slane %v8620_v48, 4 }
 0x209   :  { %2558 = vrot.lane.b32.xlu1 %v4206_v27, %s4423_s28  ;;  %2556 = vrot.lane.b32.xlu0 %v4205_v54, %s4423_s28  ;;  %v8615_v27 = vld [vmem:[#allocation91_spill] sm:$0xff]  ;;  %v1096_v34 = vrot.slane %v8621_v55, 4  ;;  %v4212_v11 = vrot.slane %v2593_v63, 10  ;;  %v4211_v43 = vrot.slane %v2592_v30, 10  ;;  %v2615_v62 = vmul.f32 %v5579_v60, %v2613_v33 }
 0x20a   :  { %v1066_v54 = vrot.slane %v8615_v27, 4  ;;  %v2614_v52 = vmul.f32 %v5611_v31, %v2613_v33  ;;  %v2635_v3 = vstv %s6103_s4  ;;  %v983_v48 = vsel %vm950_vm8, %v8602_v0, %v982_v49  ;;  %v8624_v49 = vld [vmem:[#allocation97_spill] sm:$0xff]  ;;  %s6610_s4 = sld [smem:[#allocation2 + $0x82]] }
 0x20b   :  { %v6145_v21 = vpop.permute.xlu1 %1930  ;;  %v6147_v22 = vpop.permute.xlu0 %1928  ;;  %v1011_v63 = vsel %vm950_vm8, %v8604_v10, %v1010_v9  ;;  %v1041_v30 = vsel %vm950_vm8, %v8608_v42, %v1040_v8  ;;  %v1042_v33 = vsel %vm767_vm6, %v1038_v19, %v1039_v16  ;;  %v1072_v10 = vsel %vm767_vm6, %v1068_v5, %v1069_v58 }
 0x20c   :  { %8617 = vst [vmem:[#allocation47_spill] sm:$0xff] %v6145_v21  ;;  %8618 = vst [vmem:[#allocation50_spill] sm:$0xff] %v6147_v22  ;;  %v986_v22 = vadd.f32 %v981_v39, %v6000_v28  ;;  %v1070_v28 = vsel %vm767_vm6, %v1066_v54, %v1067_v50  ;;  %v1098_v9 = vrot.slane %v8624_v49, 4  ;;  %v4215_v42 = vrot.slane %v2615_v62, 10 }
 0x20d   :  { %2580 = vrot.lane.b32.xlu1 %v4209_v45, %s4423_s28  ;;  %2578 = vrot.lane.b32.xlu0 %v4208_v14, %s4423_s28  ;;  %v8622_v45 = vrot.slane %v5539_v15, 9  ;;  %v1013_v14 = vsel %vm950_vm8, %v8606_v46, %v1012_v2  ;;  %v8623_v15 = vld [vmem:[#allocation96_spill] sm:$0xff]  ;;  %v2637_v46 = vmul.f32 %v5579_v60, %v2635_v3  ;;  %v1100_v2 = vsel %vm767_vm6, %v1096_v34, %v1097_v18 }
 0x20e   :  { %v4214_v8 = vrot.slane %v2614_v52, 10  ;;  %v2636_v16 = vmul.f32 %v5611_v31, %v2635_v3  ;;  %v987_v19 = vadd.f32 %v983_v48, %v6003_v12  ;;  %v1016_v50 = vadd.f32 %v1011_v63, %v6005_v25 }
 0x20f   :  { %v6166_v21 = vadd.f32 %v8622_v45, %v957_v7  ;;  %v6174_v39 = vpop.permute.xlu1 %1952  ;;  %v6176_v0 = vpop.permute.xlu0 %1950  ;;  %v1099_v7 = vrot.slane %v8623_v15, 4  ;;  %v1017_v54 = vadd.f32 %v1013_v14, %v6048_v59  ;;  %v2657_v58 = vstv %s6139_s5  ;;  %s6620_s5 = sld [smem:[#allocation2 + $0x48]] }
 0x210   :  { %v1046_v34 = vadd.f32 %v1041_v30, %v6051_v6  ;;  %v1071_v62 = vsel %vm950_vm8, %v8615_v27, %v1070_v28  ;;  %v8625_v3 = vrot.slane %v5553_v17, 9  ;;  %v1073_v59 = vsel %vm950_vm8, %v8619_v36, %v1072_v10 }
 0x211   :  { %2602 = vrot.lane.b32.xlu1 %v4212_v11, %s4423_s28  ;;  %2600 = vrot.lane.b32.xlu0 %v4211_v43, %s4423_s28  ;;  %v1043_v11 = vsel %vm950_vm8, %v8613_v26, %v1042_v33  ;;  %v1101_v6 = vsel %vm950_vm8, %v8621_v55, %v1100_v2  ;;  %v1102_v18 = vsel %vm767_vm6, %v1098_v9, %v1099_v7  ;;  %v4218_v26 = vrot.slane %v2637_v46, 10  ;;  %v8630_v7 = vld [vmem:[#allocation99_spill] sm:$0xff]  ;;  %v8631_v9 = vld [vmem:[#allocation100_spill] sm:$0xff] }
 0x212   :  { %v6199_v5 = vadd.f32 %v8625_v3, %v986_v22  ;;  %v4217_v17 = vrot.slane %v2636_v16, 10  ;;  %v2659_v27 = vmul.f32 %v5579_v60, %v2657_v58  ;;  %v2658_v22 = vmul.f32 %v5611_v31, %v2657_v58  ;;  %v8633_v16 = vld [vmem:[#allocation101_spill] sm:$0xff] }
 0x213   :  { %v6201_v12 = vpop.permute.xlu1 %1974  ;;  %v6203_v25 = vpop.permute.xlu0 %1972  ;;  %v2679_v43 = vstv %s6157_s6  ;;  %v1047_v36 = vadd.f32 %v1043_v11, %v6065_v53  ;;  %v8626_v52 = vrot.slane %v5586_v35, 9  ;;  %v8627_v48 = vrot.slane %v5636_v29, 9  ;;  %v8629_v29 = vld [vmem:[#allocation98_spill] sm:$0xff]  ;;  %s6649_s6 = sld [smem:[#allocation2 + $0x9d]] }
 0x214   :  { %v8628_v45 = vrot.slane %v5614_v13, 9  ;;  %v1076_v30 = vadd.f32 %v1071_v62, %v6072_v51  ;;  %v1077_v33 = vadd.f32 %v1073_v59, %v6110_v20  ;;  %v1106_v28 = vadd.f32 %v1101_v6, %v6113_v37 }
 0x215   :  { %2624 = vrot.lane.b32.xlu1 %v4215_v42, %s4423_s28  ;;  %2622 = vrot.lane.b32.xlu0 %v4214_v8, %s4423_s28  ;;  %v1135_v55 = vadd.f32 %v8626_v52, %v987_v19  ;;  %v1149_v63 = vadd.f32 %v8627_v48, %v1017_v54  ;;  %v1103_v10 = vsel %vm950_vm8, %v8624_v49, %v1102_v18  ;;  %v1207_v15 = vrot.slane %v8629_v29, 4  ;;  %v8639_v52 = vld [vmem:[#allocation103_spill] sm:$0xff] }
 0x216   :  { %v6224_v14 = vadd.f32 %v8628_v45, %v1016_v50  ;;  %v1206_v13 = vrot.slane %v8630_v7, 4  ;;  %v1229_v46 = vrot.slane %v8631_v9, 4  ;;  %v2681_v51 = vmul.f32 %v5579_v60, %v2679_v43  ;;  %v8640_v45 = vld [vmem:[#allocation104_spill] sm:$0xff] }
 0x217   :  { %v6231_v53 = vpop.permute.xlu1 %2004  ;;  %v6233_v35 = vpop.permute.xlu0 %2002  ;;  %v8632_v20 = vrot.slane %v5658_v41, 9  ;;  %v4221_v37 = vrot.slane %v2659_v27, 10  ;;  %v4220_v49 = vrot.slane %v2658_v22, 10  ;;  %v2680_v42 = vmul.f32 %v5611_v31, %v2679_v43  ;;  %v8635_v41 = vld [vmem:[#allocation102_spill] sm:$0xff] }
 0x218   :  { %v1107_v8 = vadd.f32 %v1103_v10, %v6116_v57  ;;  %v1228_v19 = vrot.slane %v8633_v16, 4  ;;  %v8634_v50 = vrot.slane %v5693_v1, 9  ;;  %v2701_v58 = vstv %s6190_s7  ;;  %s6665_s7 = sld [smem:[#allocation2 + $0x17]] }
 0x219   :  { %v6241_v2 = vadd.f32 %v8632_v20, %v1046_v34  ;;  %2646 = vrot.lane.b32.xlu1 %v4218_v26, %s4423_s28  ;;  %2644 = vrot.lane.b32.xlu0 %v4217_v17, %s4423_s28  ;;  %v1251_v34 = vrot.slane %v8635_v41, 4  ;;  %v8636_v11 = vrot.slane %v5746_v23, 9  ;;  %v8637_v3 = vrot.slane %v5703_v4, 9  ;;  %s6281_s28 = sld [smem:[#allocation2 + $0x9b]] }
 0x21a   :  { %v6250_v54 = vadd.f32 %v8634_v50, %v1047_v36  ;;  %v8638_v57 = vrot.slane %v5758_v38, 9  ;;  %v1209_v26 = vsel %vm103_vm0, %v8629_v29, %v1207_v15  ;;  %v1208_v17 = vsel %vm103_vm0, %v8630_v7, %v1206_v13  ;;  %v8642_v15 = vld [vmem:[#allocation105_spill] sm:$0xff]  ;;  %v8643_v13 = vld [vmem:[#allocation106_spill] sm:$0xff] }
 0x21b   :  { %v1177_v62 = vadd.f32 %v8636_v11, %v1077_v33  ;;  %v6260_v59 = vadd.f32 %v8637_v3, %v1076_v30  ;;  %v6266_v1 = vpop.permute.xlu1 %2008  ;;  %v6268_v18 = vpop.permute.xlu0 %2006  ;;  %v1231_v23 = vsel %vm103_vm0, %v8631_v9, %v1229_v46  ;;  %v4224_v4 = vrot.slane %v2681_v51, 10 }
 0x21c   :  { %v6264_v6 = vadd.f32 %v8638_v57, %v1106_v28  ;;  %v4223_v38 = vrot.slane %v2680_v42, 10  ;;  %v2703_v27 = vmul.f32 %v5579_v60, %v2701_v58  ;;  %v2702_v22 = vmul.f32 %v5611_v31, %v2701_v58 }
 0x21d   :  { %2668 = vrot.lane.b32.xlu1 %v4221_v37, %s4424_s8  ;;  %2666 = vrot.lane.b32.xlu0 %v4220_v49, %s4424_s8  ;;  %v2723_v43 = vstv %s6215_s10  ;;  %v1230_v36 = vsel %vm103_vm0, %v8633_v16, %v1228_v19  ;;  %v1250_v48 = vrot.slane %v8639_v52, 4  ;;  %v1273_v30 = vrot.slane %v8640_v45, 4  ;;  %v8644_v37 = vld [vmem:[#allocation107_spill] sm:$0xff]  ;;  %s6707_s10 = sld [smem:[#allocation2 + $0x32]] }
 0x21e   :  { %v8641_v33 = vrot.slane %v5797_v56, 9  ;;  %v6290_v10 = vadd.f32 %v1209_v26, %v6166_v21  ;;  %v1253_v29 = vsel %vm103_vm0, %v8635_v41, %v1251_v34  ;;  %v1272_v7 = vrot.slane %v8642_v15, 4  ;;  %v8645_v41 = vld [vmem:[#allocation108_spill] sm:$0xff] }
 0x21f   :  { %v1295_v9 = vrot.slane %v8643_v13, 4  ;;  %v6296_v46 = vpop.permute.xlu1 %2042  ;;  %v6298_v51 = vpop.permute.xlu0 %2040  ;;  %v6301_v20 = vadd.f32 %v1208_v17, %v6120_v32  ;;  %v6303_v56 = vadd.f32 %v1231_v23, %v1135_v55  ;;  %v1294_v21 = vrot.slane %v8644_v37, 4  ;;  %v8647_v17 = vld [vmem:[#allocation110_spill] sm:$0xff] }
 0x220   :  { %v1191_v28 = vadd.f32 %v8641_v33, %v1107_v8  ;;  %v2725_v49 = vmul.f32 %v5579_v60, %v2723_v43  ;;  %v6308_v42 = vadd.f32 %v1230_v36, %v6199_v5  ;;  %v4227_v8 = vrot.slane %v2703_v27, 10 }
 0x221   :  { %2690 = vrot.lane.b32.xlu1 %v4224_v4, %s4424_s8  ;;  %2688 = vrot.lane.b32.xlu0 %v4223_v38, %s4424_s8  ;;  %v4226_v16 = vrot.slane %v2702_v22, 10  ;;  %v2724_v19 = vmul.f32 %v5611_v31, %v2723_v43  ;;  %v6313_v50 = vadd.f32 %v1253_v29, %v1149_v63  ;;  %v1252_v32 = vsel %vm103_vm0, %v8639_v52, %v1250_v48  ;;  %v8646_v63 = vld [vmem:[#allocation109_spill] sm:$0xff]  ;;  %v8648_v4 = vld [vmem:[#allocation111_spill] sm:$0xff] }
 0x222   :  { %v1275_v55 = vsel %vm103_vm0, %v8640_v45, %v1273_v30  ;;  %v2745_v60 = vstv %s6253_s11  ;;  %v1274_v5 = vsel %vm103_vm0, %v8642_v15, %v1272_v7  ;;  %v1297_v58 = vsel %vm103_vm0, %v8643_v13, %v1295_v9  ;;  %v6341_v43 = vld [vmem:[%s8180_s0 + $0xc] sm:$0x77]  ;;  %v8649_v7 = vld [vmem:[#allocation112_spill] sm:$0xff]  ;;  %s6728_s11 = sld [smem:[#allocation2 + $0x4d]] }
 0x223   :  { %v1317_v34 = vrot.slane %v8645_v41, 4  ;;  %v1316_v11 = vrot.slane %v8646_v63, 4  ;;  %v6328_v3 = vpop.permute.xlu1 %2046  ;;  %v6330_v57 = vpop.permute.xlu0 %2044  ;;  %v1296_v26 = vsel %vm103_vm0, %v8644_v37, %v1294_v21  ;;  %v1339_v23 = vrot.slane %v8647_v17, 4  ;;  %v8650_v9 = vld [vmem:[#allocation113_spill] sm:$0xff] }
 0x224   :  { %v1338_v38 = vrot.slane %v8648_v4, 4  ;;  %v4230_v27 = vrot.slane %v2725_v49, 10  ;;  %v4229_v22 = vrot.slane %v2724_v19, 10  ;;  %v2747_v36 = vmul.f32 %v6341_v43, %v2745_v60 }
 0x225   :  { %2712 = vrot.lane.b32.xlu1 %v4227_v8, %s4424_s8  ;;  %2710 = vrot.lane.b32.xlu0 %v4226_v16, %s4424_s8  ;;  %v2746_v52 = vmul.f32 %v5611_v31, %v2745_v60  ;;  %v2767_v48 = vstv %s6281_s28  ;;  %v6349_v45 = vadd.f32 %v1252_v32, %v6224_v14  ;;  %v6352_v30 = vadd.f32 %v1275_v55, %v6250_v54  ;;  %s6759_s28 = sld [smem:[#allocation2 + $0x7e]] }
 0x226   :  { %v6355_v33 = vadd.f32 %v1274_v5, %v6241_v2  ;;  %v6357_v29 = vadd.f32 %v1297_v58, %v1177_v62  ;;  %v1319_v15 = vsel %vm103_vm0, %v8645_v41, %v1317_v34  ;;  %v1318_v31 = vsel %vm103_vm0, %v8646_v63, %v1316_v11  ;;  %v8651_v62 = vld [vmem:[#allocation114_spill] sm:$0xff]  ;;  %v8652_v58 = vld [vmem:[#allocation115_spill] sm:$0xff] }
 0x227   :  { %v1361_v13 = vrot.slane %v8649_v7, 4  ;;  %v1360_v37 = vrot.slane %v8650_v9, 4  ;;  %v6365_v14 = vpop.permute.xlu1 %2080  ;;  %v6367_v21 = vpop.permute.xlu0 %2078  ;;  %v6370_v2 = vadd.f32 %v1296_v26, %v6260_v59  ;;  %v1341_v54 = vsel %vm212_vm1, %v8647_v17, %v1339_v23  ;;  %v6383_v59 = vld [vmem:[%s8180_s0] sm:$0x77]  ;;  %v8654_v23 = vld [vmem:[#allocation117_spill] sm:$0xff] }
 0x228   :  { %v1383_v49 = vrot.slane %v8651_v62, 4  ;;  %v2769_v8 = vmul.f32 %v6341_v43, %v2767_v48  ;;  %v1340_v16 = vsel %vm212_vm1, %v8648_v4, %v1338_v38  ;;  %v4233_v19 = vrot.slane %v2747_v36, 10  ;;  %v8653_v26 = vld [vmem:[#allocation116_spill] sm:$0xff] }
 0x229   :  { %2734 = vrot.lane.b32.xlu1 %v4230_v27, %s4424_s8  ;;  %2732 = vrot.lane.b32.xlu0 %v4229_v22, %s4424_s8  ;;  %v4232_v32 = vrot.slane %v2746_v52, 10  ;;  %v2768_v55 = vmul.f32 %v6383_v59, %v2767_v48  ;;  %v6388_v60 = vadd.f32 %v1319_v15, %v1191_v28  ;;  %v6391_v5 = vadd.f32 %v1318_v31, %v6264_v6 }
 0x22a   :  { %v1382_v41 = vrot.slane %v8652_v58, 4  ;;  %v2789_v34 = vstv %s6320_s12  ;;  %v1363_v63 = vsel %vm212_vm1, %v8649_v7, %v1361_v13  ;;  %v1362_v11 = vsel %vm212_vm1, %v8650_v9, %v1360_v37  ;;  %v8655_v13 = vld [vmem:[#allocation118_spill] sm:$0xff]  ;;  %s6782_s12 = sld [smem:[#allocation2 + $0x68]] }
 0x22b   :  { %v1405_v17 = vrot.slane %v8653_v26, 4  ;;  %v1404_v4 = vrot.slane %v8654_v23, 4  ;;  %v6401_v38 = vpop.permute.xlu1 %2084  ;;  %v6403_v28 = vpop.permute.xlu0 %2082  ;;  %v6406_v6 = vadd.f32 %v1341_v54, %v6290_v10  ;;  %v6409_v27 = vadd.f32 %v1340_v16, %v6301_v20 }
 0x22c   :  { %v1385_v22 = vsel %vm212_vm1, %v8651_v62, %v1383_v49  ;;  %v4236_v36 = vrot.slane %v2769_v8, 10  ;;  %v4235_v52 = vrot.slane %v2768_v55, 10  ;;  %v2791_v48 = vmul.f32 %v6341_v43, %v2789_v34  ;;  %v8656_v62 = vld [vmem:[#allocation119_spill] sm:$0xff]  ;;  %v8657_v8 = vld [vmem:[#allocation8_spill] sm:$0xff] }
 0x22d   :  { %2756 = vrot.lane.b32.xlu1 %v4233_v19, %s4424_s8  ;;  %2754 = vrot.lane.b32.xlu0 %v4232_v32, %s4424_s8  ;;  %v2790_v15 = vmul.f32 %v6383_v59, %v2789_v34  ;;  %v2811_v31 = vstv %s6346_s16  ;;  %v6421_v10 = vadd.f32 %v1363_v63, %v6303_v56  ;;  %v6424_v20 = vadd.f32 %v1362_v11, %v6308_v42  ;;  %v8660_v32 = vld [vmem:[#allocation9_spill] sm:$0xff]  ;;  %v8661_v34 = vld [vmem:[#allocation10_spill] sm:$0xff]  ;;  %s6837_s16 = sld [smem:[#allocation2 + $0x9e]] }
 0x22e   :  { %v1384_v7 = vsel %vm212_vm1, %v8652_v58, %v1382_v41  ;;  %v1427_v9 = vrot.slane %v8655_v13, 4  ;;  %v1407_v37 = vsel %vm212_vm1, %v8653_v26, %v1405_v17  ;;  %v1406_v54 = vsel %vm212_vm1, %v8654_v23, %v1404_v4 }
 0x22f   :  { %v1426_v49 = vrot.slane %v8656_v62, 4  ;;  %v1449_v56 = vrot.slane %v8657_v8, 4  ;;  %v6435_v16 = vpop.permute.xlu1 %2118  ;;  %v6437_v42 = vpop.permute.xlu0 %2116  ;;  %v6442_v19 = vadd.f32 %v1385_v22, %v6313_v50  ;;  %v1448_v55 = vrot.slane %v8660_v32, 4 }
 0x230   :  { %8658 = vst [vmem:[#allocation51_spill] sm:$0xff] %v6435_v16  ;;  %8659 = vst [vmem:[#allocation48_spill] sm:$0xff] %v6437_v42  ;;  %v2813_v58 = vmul.f32 %v6341_v43, %v2811_v31  ;;  %v2812_v41 = vmul.f32 %v6383_v59, %v2811_v31  ;;  %v1471_v63 = vrot.slane %v8661_v34, 4  ;;  %v4239_v11 = vrot.slane %v2791_v48, 10  ;;  %v8662_v48 = vld [vmem:[#allocation11_spill] sm:$0xff] }
 0x231   :  { %2778 = vrot.lane.b32.xlu1 %v4236_v36, %s4424_s8  ;;  %2776 = vrot.lane.b32.xlu0 %v4235_v52, %s4424_s8  ;;  %v4238_v26 = vrot.slane %v2790_v15, 10  ;;  %v2833_v17 = vstv %s6386_s20  ;;  %v6452_v23 = vadd.f32 %v1384_v7, %v6349_v45  ;;  %v6455_v50 = vadd.f32 %v1407_v37, %v6352_v30  ;;  %v8663_v45 = vld [vmem:[#allocation12_spill] sm:$0xff]  ;;  %s6472_s8 = sld [smem:[#allocation2 + $0x9c]]  ;;  %s6968_s20 = sld [smem:[#allocation2 + $0x69]] }
 0x232   :  { %v6458_v4 = vadd.f32 %v1406_v54, %v6355_v33  ;;  %v1429_v22 = vsel %vm212_vm1, %v8655_v13, %v1427_v9  ;;  %v1428_v36 = vsel %vm212_vm1, %v8656_v62, %v1426_v49  ;;  %v1451_v52 = vsel %vm212_vm1, %v8657_v8, %v1449_v56  ;;  %v8666_v62 = vld [vmem:[#allocation13_spill] sm:$0xff] }
 0x233   :  { %v1470_v15 = vrot.slane %v8662_v48, 4  ;;  %v1493_v31 = vrot.slane %v8663_v45, 4  ;;  %v6468_v7 = vpop.permute.xlu1 %2122  ;;  %v6470_v30 = vpop.permute.xlu0 %2120  ;;  %v1450_v33 = vsel %vm212_vm1, %v8660_v32, %v1448_v55  ;;  %v4242_v13 = vrot.slane %v2813_v58, 10 }
 0x234   :  { %8664 = vst [vmem:[#allocation49_spill] sm:$0xff] %v6468_v7  ;;  %8665 = vst [vmem:[#allocation52_spill] sm:$0xff] %v6470_v30  ;;  %v4241_v9 = vrot.slane %v2812_v41, 10  ;;  %v2835_v37 = vmul.f32 %v6341_v43, %v2833_v17  ;;  %v1473_v54 = vsel %vm321_vm2, %v8661_v34, %v1471_v63  ;;  %v1492_v49 = vrot.slane %v8666_v62, 4  ;;  %v8667_v41 = vld [vmem:[#allocation14_spill] sm:$0xff] }
 0x235   :  { %2800 = vrot.lane.b32.xlu1 %v4239_v11, %s4425_s15  ;;  %2798 = vrot.lane.b32.xlu0 %v4238_v26, %s4425_s15  ;;  %v2834_v8 = vmul.f32 %v6383_v59, %v2833_v17  ;;  %v2855_v56 = vstv %s6418_s1  ;;  %v6487_v32 = vadd.f32 %v1429_v22, %v6357_v29  ;;  %v6490_v55 = vadd.f32 %v1428_v36, %v6370_v2  ;;  %v8668_v26 = vld [vmem:[#allocation15_spill] sm:$0xff]  ;;  %s6990_s1 = sld [smem:[#allocation2 + $0x84]] }
 0x236   :  { %v6493_v58 = vadd.f32 %v1451_v52, %v6388_v60  ;;  %v1515_v34 = vrot.slane %v8667_v41, 4  ;;  %v1472_v63 = vsel %vm321_vm2, %v8662_v48, %v1470_v15  ;;  %v1495_v11 = vsel %vm321_vm2, %v8663_v45, %v1493_v31  ;;  %v8671_v15 = vld [vmem:[#allocation16_spill] sm:$0xff] }
 0x237   :  { %v1514_v17 = vrot.slane %v8668_v26, 4  ;;  %v6503_v29 = vpop.permute.xlu1 %2156  ;;  %v6505_v22 = vpop.permute.xlu0 %2154  ;;  %v2877_v2 = vstv %s6439_s21  ;;  %v6509_v60 = vadd.f32 %v1450_v33, %v6391_v5  ;;  %v6512_v36 = vadd.f32 %v1473_v54, %v6406_v6  ;;  %s7010_s21 = sld [smem:[#allocation2 + $0x9f]] }
 0x238   :  { %8669 = vst [vmem:[#allocation53_spill] sm:$0xff] %v6503_v29  ;;  %8670 = vst [vmem:[#allocation54_spill] sm:$0xff] %v6505_v22  ;;  %v4245_v52 = vrot.slane %v2835_v37, 10  ;;  %v2857_v30 = vmul.f32 %v6341_v43, %v2855_v56  ;;  %v1494_v48 = vsel %vm321_vm2, %v8666_v62, %v1492_v49  ;;  %v1537_v45 = vrot.slane %v8671_v15, 4 }
 0x239   :  { %2822 = vrot.lane.b32.xlu1 %v4242_v13, %s4425_s15  ;;  %2820 = vrot.lane.b32.xlu0 %v4241_v9, %s4425_s15  ;;  %v4244_v31 = vrot.slane %v2834_v8, 10  ;;  %v2856_v5 = vmul.f32 %v6383_v59, %v2855_v56  ;;  %v6524_v6 = vadd.f32 %v1472_v63, %v6409_v27  ;;  %v6527_v33 = vadd.f32 %v1495_v11, %v6421_v10  ;;  %v8672_v9 = vld [vmem:[#allocation17_spill] sm:$0xff]  ;;  %v8676_v63 = vld [vmem:[#allocation19_spill] sm:$0xff] }
 0x23a   :  { %v1517_v37 = vsel %vm321_vm2, %v8667_v41, %v1515_v34  ;;  %v2879_v54 = vmul.f32 %v6341_v43, %v2877_v2  ;;  %v1516_v13 = vsel %vm321_vm2, %v8668_v26, %v1514_v17  ;;  %v1536_v62 = vrot.slane %v8672_v9, 4  ;;  %v8675_v41 = vld [vmem:[#allocation18_spill] sm:$0xff] }
 0x23b   :  { %v6535_v49 = vpop.permute.xlu1 %2160  ;;  %v6537_v8 = vpop.permute.xlu0 %2158  ;;  %v2878_v27 = vmul.f32 %v6383_v59, %v2877_v2  ;;  %v2899_v10 = vstv %s6472_s8  ;;  %v6542_v56 = vadd.f32 %v1494_v48, %v6424_v20  ;;  %v1559_v34 = vrot.slane %v8675_v41, 4  ;;  %s7044_s8 = sld [smem:[#allocation2 + $0x19]] }
 0x23c   :  { %8673 = vst [vmem:[#allocation55_spill] sm:$0xff] %v6535_v49  ;;  %8674 = vst [vmem:[#allocation56_spill] sm:$0xff] %v6537_v8  ;;  %v1558_v11 = vrot.slane %v8676_v63, 4  ;;  %v4248_v22 = vrot.slane %v2857_v30, 10  ;;  %v6549_v26 = vadd.f32 %v1517_v37, %v6442_v19  ;;  %v1539_v17 = vsel %vm321_vm2, %v8671_v15, %v1537_v45  ;;  %v8677_v15 = vld [vmem:[#allocation20_spill] sm:$0xff] }
 0x23d   :  { %2844 = vrot.lane.b32.xlu1 %v4245_v52, %s4425_s15  ;;  %2842 = vrot.lane.b32.xlu0 %v4244_v31, %s4425_s15  ;;  %v4247_v2 = vrot.slane %v2856_v5, 10  ;;  %v2921_v20 = vstv %s6484_s22  ;;  %v6557_v48 = vadd.f32 %v1516_v13, %v6452_v23  ;;  %v2901_v8 = vmul.f32 %v6341_v43, %v2899_v10  ;;  %s7095_s22 = sld [smem:[#allocation2 + $0x34]] }
 0x23e   :  { %v2900_v30 = vmul.f32 %v6383_v59, %v2899_v10  ;;  %v2441_v49 = vstv %s6496_s23  ;;  %v1538_v19 = vsel %vm321_vm2, %v8672_v9, %v1536_v62  ;;  %v1581_v52 = vrot.slane %v8677_v15, 4  ;;  %v8680_v62 = vld [vmem:[#allocation21_spill] sm:$0xff]  ;;  %s7139_s23 = sld [smem:[#allocation2 + $0x4f]] }
 0x23f   :  { %v6567_v45 = vpop.permute.xlu1 %2194  ;;  %v6569_v31 = vpop.permute.xlu0 %2192  ;;  %v4251_v5 = vrot.slane %v2879_v54, 10  ;;  %v4250_v23 = vrot.slane %v2878_v27, 10  ;;  %v6574_v37 = vadd.f32 %v1539_v17, %v6455_v50  ;;  %v1561_v13 = vsel %vm321_vm2, %v8675_v41, %v1559_v34  ;;  %v8682_v34 = vld [vmem:[#allocation22_spill] sm:$0xff] }
 0x240   :  { %8678 = vst [vmem:[#allocation57_spill] sm:$0xff] %v6567_v45  ;;  %8679 = vst [vmem:[#allocation58_spill] sm:$0xff] %v6569_v31  ;;  %v1560_v10 = vsel %vm321_vm2, %v8676_v63, %v1558_v11  ;;  %v6581_v9 = vmul.f32 %v6341_v43, %v2921_v20  ;;  %v1580_v45 = vrot.slane %v8680_v62, 4  ;;  %v6587_v54 = vmul.f32 %v6383_v59, %v2921_v20  ;;  %v8683_v20 = vld [vmem:[#allocation23_spill] sm:$0xff] }
 0x241   :  { %2866 = vrot.lane.b32.xlu1 %v4248_v22, %s4425_s15  ;;  %2864 = vrot.lane.b32.xlu0 %v4247_v2, %s4425_s15  ;;  %v2943_v50 = vstv %s6521_s24  ;;  %v6591_v27 = vmul.f32 %v6383_v59, %v2441_v49  ;;  %v6594_v41 = vadd.f32 %v1538_v19, %v6458_v4  ;;  %v1603_v63 = vrot.slane %v8682_v34, 4 }
 0x242   :  { %v4254_v11 = vrot.slane %v2901_v8, 10  ;;  %v4253_v17 = vrot.slane %v2900_v30, 10  ;;  %v6598_v31 = vadd.f32 %v1561_v13, %v6487_v32  ;;  %v6601_v22 = vadd.f32 %v1560_v10, %v6490_v55 }
 0x243   :  { %8681 = vst [vmem:[#allocation59_spill] sm:$0xff] %v6591_v27  ;;  %v1583_v2 = vsel %vm321_vm2, %v8677_v15, %v1581_v52  ;;  %v1602_v29 = vrot.slane %v8683_v20, 4  ;;  %v6606_v7 = vpop.permute.xlu1 %2198  ;;  %v6608_v42 = vpop.permute.xlu0 %2196  ;;  %v4257_v4 = vrot.slane %v6581_v9, 10  ;;  %v6614_v32 = vmul.f32 %v6341_v43, %v2943_v50  ;;  %v8687_v9 = vld [vmem:[#allocation24_spill] sm:$0xff]  ;;  %v8691_v27 = vld [vmem:[#allocation26_spill] sm:$0xff] }
 0x244   :  { %8684 = vst [vmem:[#allocation60_spill] sm:$0xff] %v6606_v7  ;;  %8685 = vst [vmem:[#allocation61_spill] sm:$0xff] %v6608_v42  ;;  %v6617_v55 = vmul.f32 %v6383_v59, %v2943_v50  ;;  %v2965_v8 = vstv %s6546_s26  ;;  %v1582_v30 = vsel %vm321_vm2, %v8680_v62, %v1580_v45  ;;  %v4256_v19 = vrot.slane %v6587_v54, 10 }
 0x245   :  { %2888 = vrot.lane.b32.xlu1 %v4251_v5, %s4425_s15  ;;  %2886 = vrot.lane.b32.xlu0 %v4250_v23, %s4425_s15  ;;  %v6628_v15 = vmul.f32 %v6341_v43, %v2441_v49  ;;  %v6632_v13 = vadd.f32 %v1583_v2, %v6493_v58  ;;  %v1605_v10 = vsel %vm430_vm3, %v8682_v34, %v1603_v63  ;;  %v1625_v50 = vrot.slane %v8687_v9, 4  ;;  %v8688_v23 = vld [vmem:[#allocation25_spill] sm:$0xff] }
 0x246   :  { %v2455_v45 = vstv %s6562_s29  ;;  %v1604_v5 = vsel %vm430_vm3, %v8683_v20, %v1602_v29  ;;  %v1624_v62 = vrot.slane %v8688_v23, 4  ;;  %v6646_v52 = vmul.f32 %v6341_v43, %v2965_v8 }
 0x247   :  { %8686 = vst [vmem:[#allocation62_spill] sm:$0xff] %v6628_v15  ;;  %v6641_v54 = vpop.permute.xlu1 %2232  ;;  %v6643_v49 = vpop.permute.xlu0 %2230  ;;  %v2987_v58 = vstv %s6571_s30  ;;  %v6652_v34 = vadd.f32 %v1582_v30, %v6509_v60  ;;  %v4260_v63 = vrot.slane %v6614_v32, 10  ;;  %v4259_v2 = vrot.slane %v6617_v55, 10 }
 0x248   :  { %8689 = vst [vmem:[#allocation63_spill] sm:$0xff] %v6641_v54  ;;  %8690 = vst [vmem:[#allocation64_spill] sm:$0xff] %v6643_v49  ;;  %v6657_v29 = vmul.f32 %v6383_v59, %v2965_v8  ;;  %v6660_v20 = vadd.f32 %v1605_v10, %v6512_v36  ;;  %v1647_v42 = vrot.slane %v8691_v27, 4  ;;  %v6669_v32 = vmul.f32 %v6383_v59, %v2455_v45  ;;  %v8693_v8 = vld [vmem:[#allocation27_spill] sm:$0xff] }
 0x249   :  { %2910 = vrot.lane.b32.xlu1 %v4254_v11, %s4425_s15  ;;  %2908 = vrot.lane.b32.xlu0 %v4253_v17, %s4425_s15  ;;  %v6672_v55 = vadd.f32 %v1604_v5, %v6524_v6  ;;  %v1627_v36 = vsel %vm430_vm3, %v8687_v9, %v1625_v50  ;;  %v1646_v30 = vrot.slane %v8693_v8, 4  ;;  %v6678_v11 = vmul.f32 %v6341_v43, %v2987_v58  ;;  %s6691_s15 = sld [smem:[#allocation2 + $0x63]]  ;;  %v8696_v9 = vld [vmem:[#allocation28_spill] sm:$0xff] }
 0x24a   :  { %8692 = vst [vmem:[#allocation65_spill] sm:$0xff] %v6669_v32  ;;  %v1626_v17 = vsel %vm430_vm3, %v8688_v23, %v1624_v62  ;;  %v4263_v15 = vrot.slane %v6646_v52, 10  ;;  %v6688_v6 = vmul.f32 %v6383_v59, %v2987_v58  ;;  %v3009_v5 = vstv %s6610_s4  ;;  %v8698_v58 = vld [vmem:[#allocation29_spill] sm:$0xff]  ;;  %s7253_s4 = sld [smem:[#allocation2 + $0x1a]] }
 0x24b   :  { %v6682_v10 = vpop.permute.xlu1 %2236  ;;  %v6684_v60 = vpop.permute.xlu0 %2234  ;;  %v1669_v50 = vrot.slane %v8696_v9, 4  ;;  %v4262_v7 = vrot.slane %v6657_v29, 10  ;;  %v6696_v49 = vmul.f32 %v6341_v43, %v2455_v45  ;;  %v2469_v23 = vstv %s6620_s5 }
 0x24c   :  { %8694 = vst [vmem:[#allocation66_spill] sm:$0xff] %v6682_v10  ;;  %8695 = vst [vmem:[#allocation67_spill] sm:$0xff] %v6684_v60  ;;  %v6700_v62 = vadd.f32 %v1627_v36, %v6527_v33  ;;  %v1649_v52 = vsel %vm430_vm3, %v8691_v27, %v1647_v42  ;;  %v1668_v60 = vrot.slane %v8698_v58, 4  ;;  %v6711_v45 = vadd.f32 %v1626_v17, %v6542_v56  ;;  %v8702_v17 = vld [vmem:[#allocation30_spill] sm:$0xff] }
 0x24d   :  { %8697 = vst [vmem:[#allocation74_spill] sm:$0xff] %v6696_v49  ;;  %2932 = vrot.lane.b32.xlu1 %v4257_v4, %s4426_s2  ;;  %2930 = vrot.lane.b32.xlu0 %v4256_v19, %s4426_s2  ;;  %v1648_v33 = vsel %vm430_vm3, %v8693_v8, %v1646_v30  ;;  %v4266_v36 = vrot.slane %v6678_v11, 10  ;;  %v6717_v42 = vmul.f32 %v6341_v43, %v3009_v5  ;;  %v4265_v19 = vrot.slane %v6688_v6, 10 }
 0x24e   :  { %v6725_v29 = vmul.f32 %v6383_v59, %v3009_v5  ;;  %v3031_v56 = vstv %s6649_s6  ;;  %v6731_v8 = vmul.f32 %v6383_v59, %v2469_v23  ;;  %v6734_v30 = vadd.f32 %v1649_v52, %v6549_v26 }
 0x24f   :  { %v6719_v27 = vpop.permute.xlu1 %2270  ;;  %v6721_v4 = vpop.permute.xlu0 %2268  ;;  %v1671_v11 = vsel %vm430_vm3, %v8696_v9, %v1669_v50  ;;  %v1691_v32 = vrot.slane %v8702_v17, 4  ;;  %v6741_v6 = vadd.f32 %v1648_v33, %v6557_v48  ;;  %v1670_v5 = vsel %vm430_vm3, %v8698_v58, %v1668_v60 }
 0x250   :  { %8699 = vst [vmem:[#allocation75_spill] sm:$0xff] %v6719_v27  ;;  %8700 = vst [vmem:[#allocation68_spill] sm:$0xff] %v6721_v4  ;;  %v8703_v27 = vld [vmem:[#allocation31_spill] sm:$0xff]  ;;  %v3053_v26 = vstv %s6665_s7  ;;  %v4269_v9 = vrot.slane %v6717_v42, 10  ;;  %v6751_v50 = vmul.f32 %v6341_v43, %v3031_v56  ;;  %v6754_v52 = vmul.f32 %v6383_v59, %v3031_v56  ;;  %s7316_s7 = sld [smem:[#allocation2 + $0x35]] }
 0x251   :  { %8701 = vst [vmem:[#allocation69_spill] sm:$0xff] %v6731_v8  ;;  %v1690_v10 = vrot.slane %v8703_v27, 4  ;;  %2954 = vrot.lane.b32.xlu1 %v4260_v63, %s4426_s2  ;;  %2952 = vrot.lane.b32.xlu0 %v4259_v2, %s4426_s2  ;;  %v6757_v48 = vmul.f32 %v6341_v43, %v2469_v23  ;;  %v6762_v60 = vadd.f32 %v1671_v11, %v6574_v37  ;;  %v4268_v58 = vrot.slane %v6725_v29, 10  ;;  %v8707_v11 = vld [vmem:[#allocation32_spill] sm:$0xff]  ;;  %v8708_v8 = vld [vmem:[#allocation33_spill] sm:$0xff] }
 0x252   :  { %v2483_v42 = vstv %s6691_s15  ;;  %v6772_v56 = vadd.f32 %v1670_v5, %v6594_v41  ;;  %v1693_v23 = vsel %vm430_vm3, %v8702_v17, %v1691_v32  ;;  %v6777_v4 = vmul.f32 %v6341_v43, %v3053_v26  ;;  %s7356_s15 = sld [smem:[#allocation2 + $0x85]] }
 0x253   :  { %8704 = vst [vmem:[#allocation70_spill] sm:$0xff] %v6757_v48  ;;  %v6764_v63 = vpop.permute.xlu1 %2274  ;;  %v6766_v2 = vpop.permute.xlu0 %2272  ;;  %v6780_v37 = vmul.f32 %v6383_v59, %v3053_v26  ;;  %v1692_v29 = vsel %vm430_vm3, %v8703_v27, %v1690_v10  ;;  %v1713_v33 = vrot.slane %v8707_v11, 4  ;;  %v1712_v41 = vrot.slane %v8708_v8, 4  ;;  %v8710_v27 = vld [vmem:[#allocation34_spill] sm:$0xff] }
 0x254   :  { %8705 = vst [vmem:[#allocation71_spill] sm:$0xff] %v6764_v63  ;;  %8706 = vst [vmem:[#allocation72_spill] sm:$0xff] %v6766_v2  ;;  %v3075_v32 = vstv %s6707_s10  ;;  %v4272_v17 = vrot.slane %v6751_v50, 10  ;;  %v4271_v5 = vrot.slane %v6754_v52, 10  ;;  %v6795_v49 = vmul.f32 %v6383_v59, %v2483_v42  ;;  %v8711_v63 = vld [vmem:[#allocation35_spill] sm:$0xff] }
 0x255   :  { %2976 = vrot.lane.b32.xlu1 %v4263_v15, %s4426_s2  ;;  %2974 = vrot.lane.b32.xlu0 %v4262_v7, %s4426_s2  ;;  %v6798_v10 = vadd.f32 %v1693_v23, %v6598_v31  ;;  %v1735_v2 = vrot.slane %v8710_v27, 4  ;;  %v1734_v54 = vrot.slane %v8711_v63, 4  ;;  %v3097_v16 = vstv %s6728_s11 }
 0x256   :  { %8709 = vst [vmem:[#allocation73_spill] sm:$0xff] %v6795_v49  ;;  %v6808_v50 = vadd.f32 %v1692_v29, %v6601_v22  ;;  %v6812_v26 = vmul.f32 %v6341_v43, %v3075_v32  ;;  %v6815_v31 = vmul.f32 %v6383_v59, %v3075_v32  ;;  %v1715_v23 = vsel %vm430_vm3, %v8707_v11, %v1713_v33  ;;  %v8715_v11 = vld [vmem:[#allocation36_spill] sm:$0xff]  ;;  %v8722_v49 = vld [vmem:[#allocation38_spill] sm:$0xff] }
 0x257   :  { %v6802_v15 = vpop.permute.xlu1 %2308  ;;  %v6804_v7 = vpop.permute.xlu0 %2306  ;;  %v1714_v22 = vsel %vm430_vm3, %v8708_v8, %v1712_v41  ;;  %v6829_v32 = vmul.f32 %v6341_v43, %v2483_v42  ;;  %v6832_v52 = vmul.f32 %v6341_v43, %v3097_v16  ;;  %v6835_v48 = vmul.f32 %v6383_v59, %v3097_v16  ;;  %v8716_v41 = vld [vmem:[#allocation37_spill] sm:$0xff] }
 0x258   :  { %8712 = vst [vmem:[#allocation76_spill] sm:$0xff] %v6802_v15  ;;  %8713 = vst [vmem:[#allocation77_spill] sm:$0xff] %v6804_v7  ;;  %v2497_v33 = vstv %s6759_s28  ;;  %v1757_v42 = vrot.slane %v8715_v11, 4  ;;  %v1756_v29 = vrot.slane %v8716_v41, 4  ;;  %v6852_v16 = vadd.f32 %v1715_v23, %v6632_v13  ;;  %s7425_s28 = sld [smem:[#allocation2 + $0x50]] }
 0x259   :  { %2998 = vrot.lane.b32.xlu1 %v4266_v36, %s4426_s2  ;;  %2996 = vrot.lane.b32.xlu0 %v4265_v19, %s4426_s2  ;;  %8714 = vst [vmem:[#allocation78_spill] sm:$0xff] %v6829_v32  ;;  %v1737_v36 = vsel %vm539_vm4, %v8710_v27, %v1735_v2  ;;  %v1736_v19 = vsel %vm539_vm4, %v8711_v63, %v1734_v54  ;;  %v3119_v2 = vstv %s6782_s12  ;;  %v1779_v27 = vrot.slane %v5947_v47, 4  ;;  %s7867_s12 = sld [smem:[#allocation2 + $0x6b]] }
 0x25a   :  { %v6855_v8 = vadd.f32 %v1714_v22, %v6652_v34  ;;  %v1778_v54 = vrot.slane %v5949_v24, 4  ;;  %v4277_v63 = vrot.slane %v6815_v31, 10  ;;  %v6866_v34 = vadd.f32 %v1737_v36, %v6660_v20 }
 0x25b   :  { %v6847_v7 = vpop.permute.xlu1 %2312  ;;  %v6849_v15 = vpop.permute.xlu0 %2310  ;;  %v6869_v23 = vadd.f32 %v1736_v19, %v6672_v55  ;;  %v1758_v31 = vsel %vm539_vm4, %v8716_v41, %v1756_v29  ;;  %v6887_v36 = vmul.f32 %v6341_v43, %v3119_v2  ;;  %v6890_v19 = vmul.f32 %v6383_v59, %v3119_v2 }
 0x25c   :  { %8717 = vst [vmem:[#allocation79_spill] sm:$0xff] %v6849_v15  ;;  %v3141_v22 = vstv %s6817_s13  ;;  %v2511_v29 = vstv %s6819_s14  ;;  %v1780_v41 = vsel %vm539_vm4, %v5949_v24, %v1778_v54  ;;  %v1801_v55 = vrot.slane %v5977_v40, 4  ;;  %v8726_v54 = vld [vmem:[#allocation39_spill] sm:$0xff]  ;;  %s4359_s13 = sld [smem:[#allocation2 + $0x86]]  ;;  %s4364_s14 = sld [smem:[#allocation2 + $0xa1]] }
 0x25d   :  { %3020 = vrot.lane.b32.xlu1 %v4269_v9, %s4426_s2  ;;  %3018 = vrot.lane.b32.xlu0 %v4268_v58, %s4426_s2  ;;  %v6875_v9 = vmul.f32 %v6383_v59, %v2497_v33  ;;  %v1759_v58 = vsel %vm539_vm4, %v8715_v11, %v1757_v42  ;;  %v6896_v11 = vmul.f32 %v6341_v43, %v2497_v33  ;;  %v1800_v32 = vrot.slane %v8722_v49, 4 }
 0x25e   :  { %v1781_v42 = vsel %vm539_vm4, %v5947_v47, %v1779_v27  ;;  %v6908_v2 = vadd.f32 %v1759_v58, %v6700_v62  ;;  %v6911_v33 = vadd.f32 %v1758_v31, %v6711_v45  ;;  %v6929_v62 = vmul.f32 %v6383_v59, %v2511_v29 }
 0x25f   :  { %8718 = vst [vmem:[#allocation80_spill] sm:$0xff] %v6875_v9  ;;  %v6881_v13 = vpop.permute.xlu1 %2346  ;;  %v6883_v20 = vpop.permute.xlu0 %2344  ;;  %8721 = vst [vmem:[#allocation83_spill] sm:$0xff] %v6896_v11  ;;  %v6932_v45 = vadd.f32 %v1781_v42, %v6734_v30  ;;  %v1803_v47 = vsel %vm539_vm4, %v5977_v40, %v1801_v55  ;;  %v1823_v9 = vrot.slane %v8726_v54, 4  ;;  %v8728_v30 = vrot.slane %v6780_v37, 10  ;;  %v8729_v42 = vld [vmem:[#allocation40_spill] sm:$0xff]  ;;  %v8731_v55 = vld [vmem:[#allocation41_spill] sm:$0xff] }
 0x260   :  { %8719 = vst [vmem:[#allocation81_spill] sm:$0xff] %v6881_v13  ;;  %8720 = vst [vmem:[#allocation82_spill] sm:$0xff] %v6883_v20  ;;  %v3163_v20 = vstv %s6837_s16  ;;  %v6921_v13 = vmul.f32 %v6341_v43, %v3141_v22  ;;  %v8733_v11 = vld [vmem:[#allocation42_spill] sm:$0xff]  ;;  %v3207_v15 = vstv %s6893_s18  ;;  %v1867_v37 = vrot.slane %v6060_v61, 4 }
 0x261   :  { %3042 = vrot.lane.b32.xlu1 %v4272_v17, %s4426_s2  ;;  %3040 = vrot.lane.b32.xlu0 %v4271_v5, %s4426_s2  ;;  %v6924_v17 = vmul.f32 %v6383_v59, %v3141_v22  ;;  %s6926_s2 = sld [smem:[#allocation2 + $0x4e]]  ;;  %8725 = vst [vmem:[#allocation86_spill] sm:$0xff] %v6929_v62  ;;  %v6935_v5 = vadd.f32 %v1780_v41, %v6741_v6  ;;  %v1822_v41 = vrot.slane %v8729_v42, 4 }
 0x262   :  { %v1802_v22 = vsel %vm539_vm4, %v8722_v49, %v1800_v32  ;;  %v6951_v6 = vmul.f32 %v6341_v43, %v3163_v20  ;;  %v6955_v40 = vmul.f32 %v6383_v59, %v3163_v20  ;;  %v3185_v49 = vstv %s6872_s17 }
 0x263   :  { %v6915_v27 = vpop.permute.xlu1 %2350  ;;  %v6917_v24 = vpop.permute.xlu0 %2348  ;;  %v6959_v32 = vmul.f32 %v6341_v43, %v2511_v29  ;;  %v6972_v20 = vadd.f32 %v1803_v47, %v6762_v60  ;;  %v6975_v29 = vadd.f32 %v1802_v22, %v6772_v56  ;;  %v6988_v56 = vmul.f32 %v6341_v43, %v3185_v49 }
 0x264   :  { %8723 = vst [vmem:[#allocation84_spill] sm:$0xff] %v6915_v27  ;;  %8724 = vst [vmem:[#allocation85_spill] sm:$0xff] %v6917_v24  ;;  %v8727_v24 = vrot.slane %v6777_v4, 10  ;;  %v1845_v4 = vrot.slane %v8731_v55, 4  ;;  %v1844_v27 = vrot.slane %v8733_v11, 4  ;;  %v1824_v47 = vsel %vm539_vm4, %v8729_v42, %v1822_v41 }
 0x265   :  { %3062 = vrot.lane.b32.xlu0 %v8728_v30, %s4427_s27  ;;  %8730 = vst [vmem:[#allocation87_spill] sm:$0xff] %v6959_v32  ;;  %v8734_v30 = vrot.slane %v6812_v26, 10  ;;  %v1866_v22 = vrot.slane %v6062_v44, 4  ;;  %v7007_v60 = vmul.f32 %v6341_v43, %v3207_v15  ;;  %v8736_v26 = vld [vmem:[#allocation43_spill] sm:$0xff]  ;;  %v1869_v62 = vsel %vm648_vm5, %v6060_v61, %v1867_v37  ;;  %v8737_v32 = vld [vmem:[#allocation44_spill] sm:$0xff] }
 0x266   :  { %3064 = vrot.lane.b32.xlu1 %v8727_v24, %s4427_s27 }
 0x267   :  { %v6962_v24 = vpop.permute.xlu1 %2384  ;;  %v6964_v31 = vpop.permute.xlu0 %2382  ;;  %v3229_v42 = vstv %s6926_s2 }
 0x268   :  { %8732 = vst [vmem:[#allocation88_spill] sm:$0xff] %v6964_v31  ;;  %v1825_v31 = vsel %vm539_vm4, %v8726_v54, %v1823_v9  ;;  %v6996_v54 = vmul.f32 %v6383_v59, %v3185_v49  ;;  %v1846_v49 = vsel %vm539_vm4, %v8733_v11, %v1844_v27  ;;  %v7022_v9 = vadd.f32 %v1824_v47, %v6808_v50 }
 0x269   :  { %3084 = vrot.lane.b32.xlu0 %v4277_v63, %s4427_s27  ;;  %v1847_v63 = vsel %vm539_vm4, %v8731_v55, %v1845_v4  ;;  %v7013_v41 = vadd.f32 %v1825_v31, %v6798_v10  ;;  %v1889_v55 = vrot.slane %v8736_v26, 4  ;;  %v7019_v4 = vmul.f32 %v6383_v59, %v3207_v15  ;;  %v8744_v15 = vld [vmem:[#allocation47_spill] sm:$0xff] }
 0x26a   :  { %3086 = vrot.lane.b32.xlu1 %v8734_v30, %s4427_s27  ;;  %v8738_v10 = vrot.slane %v6832_v52, 10  ;;  %v8739_v11 = vrot.slane %v6835_v48, 10  ;;  %v7035_v27 = vadd.f32 %v1847_v63, %v6852_v16  ;;  %v7039_v31 = vmul.f32 %v6341_v43, %v3229_v42 }
 0x26b   :  { %v7002_v30 = vpop.permute.xlu1 %2388  ;;  %v7004_v58 = vpop.permute.xlu0 %2386  ;;  %v7042_v61 = vmul.f32 %v6383_v59, %v3229_v42  ;;  %v7047_v52 = vadd.f32 %v1846_v49, %v6855_v8  ;;  %v1868_v48 = vsel %vm648_vm5, %v6062_v44, %v1866_v22  ;;  %v3251_v63 = vstv %s6968_s20  ;;  %v8743_v22 = vld [vmem:[#allocation46_spill] sm:$0xff] }
 0x26c   :  { %8735 = vst [vmem:[#allocation89_spill] sm:$0xff] %v7004_v58  ;;  %v1888_v58 = vrot.slane %v8737_v32, 4  ;;  %v1891_v42 = vsel %vm648_vm5, %v8736_v26, %v1889_v55  ;;  %v1910_v49 = vrot.slane %v8743_v22, 4  ;;  %v8745_v47 = vrot.slane %v6887_v36, 10  ;;  %v8747_v36 = vld [vmem:[#allocation50_spill] sm:$0xff] }
 0x26d   :  { %3106 = vrot.lane.b32.xlu0 %v8739_v11, %s4427_s27  ;;  %v8742_v11 = vld [vmem:[#allocation45_spill] sm:$0xff]  ;;  %v7076_v26 = vadd.f32 %v1868_v48, %v6869_v23  ;;  %v7084_v8 = vadd.f32 %v1891_v42, %v6908_v2  ;;  %v3295_v23 = vstv %s7010_s21 }
 0x26e   :  { %3108 = vrot.lane.b32.xlu1 %v8738_v10, %s4427_s27  ;;  %v7058_v10 = vadd.f32 %v1869_v62, %v6866_v34  ;;  %v1911_v50 = vrot.slane %v8742_v11, 4  ;;  %v1890_v44 = vsel %vm648_vm5, %v8737_v32, %v1888_v58  ;;  %v8746_v34 = vrot.slane %v6890_v19, 10 }
 0x26f   :  { %v7051_v37 = vpop.permute.xlu1 %2422  ;;  %v7053_v16 = vpop.permute.xlu0 %2420  ;;  %v3273_v62 = vstv %s6990_s1  ;;  %v7081_v32 = vmul.f32 %v6341_v43, %v3251_v63  ;;  %v7098_v48 = vadd.f32 %v1890_v44, %v6911_v33  ;;  %v1954_v33 = vrot.slane %v6176_v0, 4 }
 0x270   :  { %8740 = vst [vmem:[#allocation90_spill] sm:$0xff] %v7051_v37  ;;  %8741 = vst [vmem:[#allocation91_spill] sm:$0xff] %v7053_v16  ;;  %v1933_v16 = vrot.slane %v8744_v15, 4  ;;  %v1913_v2 = vsel %vm648_vm5, %v8742_v11, %v1911_v50  ;;  %v7103_v42 = vmul.f32 %v6341_v43, %v3273_v62  ;;  %v7106_v58 = vmul.f32 %v6383_v59, %v3273_v62 }
 0x271   :  { %3128 = vrot.lane.b32.xlu0 %v8746_v34, %s4427_s27  ;;  %v7092_v34 = vmul.f32 %v6383_v59, %v3251_v63  ;;  %v1912_v63 = vsel %vm648_vm5, %v8743_v22, %v1910_v49  ;;  %v8749_v44 = vrot.slane %v6921_v13, 10  ;;  %v8750_v50 = vrot.slane %v6924_v17, 10 }
 0x272   :  { %3130 = vrot.lane.b32.xlu1 %v8745_v47, %s4427_s27  ;;  %v1932_v47 = vrot.slane %v8747_v36, 4  ;;  %v1935_v55 = vsel %vm648_vm5, %v8744_v15, %v1933_v16  ;;  %v7122_v62 = vmul.f32 %v6341_v43, %v3295_v23  ;;  %v7125_v22 = vmul.f32 %v6383_v59, %v3295_v23 }
 0x273   :  { %v7087_v37 = vpop.permute.xlu1 %2426  ;;  %v7089_v19 = vpop.permute.xlu0 %2424  ;;  %v3317_v15 = vstv %s7044_s8  ;;  %v7129_v16 = vadd.f32 %v1913_v2, %v6932_v45  ;;  %v1977_v49 = vrot.slane %v6201_v12, 4  ;;  %v7142_v23 = vadd.f32 %v1912_v63, %v6935_v5 }
 0x274   :  { %8748 = vst [vmem:[#allocation92_spill] sm:$0xff] %v7089_v19  ;;  %v1955_v19 = vrot.slane %v6174_v39, 4  ;;  %v1934_v13 = vsel %vm648_vm5, %v8747_v36, %v1932_v47  ;;  %v7145_v11 = vadd.f32 %v1935_v55, %v6972_v20  ;;  %v1956_v2 = vsel %vm648_vm5, %v6176_v0, %v1954_v33  ;;  %v7163_v55 = vld [vmem:[%s8180_s0 + $0x8] sm:$0x7] }
 0x275   :  { %3150 = vrot.lane.b32.xlu0 %v8750_v50, %s4427_s27  ;;  %v1976_v50 = vrot.slane %v6203_v25, 4  ;;  %v8751_v5 = vrot.slane %v6951_v6, 10  ;;  %v8752_v20 = vrot.slane %v6955_v40, 10  ;;  %v7169_v0 = vadd.f32 %v1934_v13, %v6975_v29 }
 0x276   :  { %3152 = vrot.lane.b32.xlu1 %v8749_v44, %s4427_s27  ;;  %v1957_v47 = vsel %vm648_vm5, %v6174_v39, %v1955_v19  ;;  %v7166_v39 = vmul.f32 %v7163_v55, %v3317_v15  ;;  %v7174_v63 = vmul.f32 %v6383_v59, %v3317_v15  ;;  %v1979_v40 = vsel %vm648_vm5, %v6201_v12, %v1977_v49 }
 0x277   :  { %v7134_v44 = vpop.permute.xlu1 %2536  ;;  %v7136_v17 = vpop.permute.xlu0 %2534  ;;  %v2011_v33 = vrot.slane %v6231_v53, 4  ;;  %v3355_v29 = vstv %s7095_s22  ;;  %v7186_v13 = vadd.f32 %v1957_v47, %v7013_v41  ;;  %v7189_v6 = vadd.f32 %v1956_v2, %v7022_v9 }
 0x278   :  { %v2013_v19 = vrot.slane %v6266_v1, 4  ;;  %v2012_v45 = vrot.slane %v6268_v18, 4  ;;  %v1978_v12 = vsel %vm648_vm5, %v6203_v25, %v1976_v50  ;;  %v8755_v53 = vrot.slane %v6988_v56, 10  ;;  %v7207_v1 = vld [vmem:[%s8180_s0 + $0x14] sm:$0x7] }
 0x279   :  { %3172 = vrot.lane.b32.xlu0 %v8752_v20, %s4427_s27  ;;  %v8756_v41 = vrot.slane %v6996_v54, 10  ;;  %8757 = vst [vmem:[#allocation95_spill] sm:$0xff] %v7207_v1  ;;  %v7210_v49 = vmul.f32 %v7207_v1, %v3317_v15  ;;  %v7213_v25 = vmul.f32 %v6341_v43, %v3317_v15  ;;  %v7216_v56 = vadd.f32 %v1979_v40, %v7035_v27 }
 0x27a   :  { %3174 = vrot.lane.b32.xlu1 %v8751_v5, %s4427_s27  ;;  %v2010_v5 = vrot.slane %v6233_v35, 4  ;;  %s7193_s27 = sld [smem:[#allocation2 + $0x6a]]  ;;  %v7220_v54 = vmul.f32 %v7163_v55, %v3355_v29  ;;  %v7223_v47 = vmul.f32 %v6383_v59, %v3355_v29  ;;  %v3393_v27 = vstv %s7139_s23 }
 0x27b   :  { %v7180_v20 = vpop.permute.xlu1 %2558  ;;  %v7182_v36 = vpop.permute.xlu0 %2556  ;;  %v7234_v40 = vadd.f32 %v1978_v12, %v7047_v52  ;;  %v2016_v50 = vsel %vm767_vm6, %v2012_v45, %v2013_v19  ;;  %v7248_v52 = vmul.f32 %v7207_v1, %v3355_v29  ;;  %v2087_v45 = vrot.slane %v6365_v14, 4 }
 0x27c   :  { %8753 = vst [vmem:[#allocation93_spill] sm:$0xff] %v7180_v20  ;;  %8754 = vst [vmem:[#allocation94_spill] sm:$0xff] %v7182_v36  ;;  %v2014_v2 = vsel %vm767_vm6, %v2010_v5, %v2011_v33  ;;  %v2051_v36 = vrot.slane %v6328_v3, 4  ;;  %v2050_v20 = vrot.slane %v6330_v57, 4  ;;  %v8760_v33 = vrot.slane %v7007_v60, 10 }
 0x27d   :  { %3194 = vrot.lane.b32.xlu0 %v8756_v41, %s4428_s9  ;;  %v2048_v41 = vrot.slane %v6298_v51, 4  ;;  %v7251_v3 = vmul.f32 %v6341_v43, %v3355_v29  ;;  %v2015_v60 = vsel %vm769_vm7, %v6233_v35, %v2014_v2  ;;  %v7260_v19 = vmul.f32 %v7163_v55, %v3393_v27  ;;  %v8775_v35 = vld [vmem:[#allocation49_spill] sm:$0xff]  ;;  %v8776_v29 = vld [vmem:[#allocation52_spill] sm:$0xff] }
 0x27e   :  { %3196 = vrot.lane.b32.xlu1 %v8755_v53, %s4428_s9  ;;  %v2049_v53 = vrot.slane %v6296_v46, 4  ;;  %v8761_v46 = vrot.slane %v7019_v4, 10  ;;  %v2086_v4 = vrot.slane %v6367_v21, 4  ;;  %v2017_v12 = vsel %vm769_vm7, %v6268_v18, %v2016_v50 }
 0x27f   :  { %v7228_v9 = vpop.permute.xlu1 %2580  ;;  %v7230_v15 = vpop.permute.xlu0 %2578  ;;  %v2054_v14 = vsel %vm767_vm6, %v2050_v20, %v2051_v36  ;;  %v2089_v2 = vrot.slane %v6401_v38, 4  ;;  %v8764_v18 = vrot.slane %v7039_v31, 10  ;;  %v8765_v50 = vrot.slane %v7042_v61, 10 }
 0x280   :  { %8758 = vst [vmem:[#allocation96_spill] sm:$0xff] %v7228_v9  ;;  %8759 = vst [vmem:[#allocation97_spill] sm:$0xff] %v7230_v15  ;;  %v2088_v15 = vrot.slane %v6403_v28, 4  ;;  %v3431_v5 = vstv %s7193_s27  ;;  %v7276_v9 = vadd.f32 %v2015_v60, %v7076_v26  ;;  %v7287_v38 = vmul.f32 %v6383_v59, %v3393_v27 }
 0x281   :  { %3216 = vrot.lane.b32.xlu0 %v8761_v46, %s4428_s9  ;;  %v7290_v20 = vadd.f32 %v2017_v12, %v7058_v10  ;;  %v2090_v31 = vsel %vm767_vm6, %v2086_v4, %v2087_v45  ;;  %v2055_v61 = vsel %vm769_vm7, %v6330_v57, %v2054_v14  ;;  %v7308_v10 = vld [vmem:[%s8180_s0 + $0xc] sm:$0x77]  ;;  %v7314_v45 = vmul.f32 %v7163_v55, %v3431_v5  ;;  %v8770_v4 = vld [vmem:[#allocation51_spill] sm:$0xff] }
 0x282   :  { %3218 = vrot.lane.b32.xlu1 %v8760_v33, %s4428_s9  ;;  %v2052_v33 = vsel %vm767_vm6, %v2048_v41, %v2049_v53  ;;  %8768 = vst [vmem:[#allocation102_spill] sm:$0xff] %v7308_v10  ;;  %v2092_v57 = vsel %vm767_vm6, %v2088_v15, %v2089_v2  ;;  %v2125_v12 = vrot.slane %v8770_v4, 4  ;;  %v7322_v41 = vmul.f32 %v6383_v59, %v3431_v5 }
 0x283   :  { %v7265_v46 = vpop.permute.xlu1 %2602  ;;  %v7267_v43 = vpop.permute.xlu0 %2600  ;;  %v2053_v26 = vsel %vm769_vm7, %v6298_v51, %v2052_v33  ;;  %v7311_v51 = vmul.f32 %v7308_v10, %v3393_v27  ;;  %8769 = vst [vmem:[#allocation103_spill] sm:$0xff] %v7314_v45  ;;  %v8771_v33 = vld [vmem:[#allocation48_spill] sm:$0xff]  ;;  %v8773_v53 = vrot.slane %v7081_v32, 10  ;;  %v8774_v15 = vrot.slane %v7092_v34, 10 }
 0x284   :  { %8762 = vst [vmem:[#allocation98_spill] sm:$0xff] %v7265_v46  ;;  %8763 = vst [vmem:[#allocation99_spill] sm:$0xff] %v7267_v43  ;;  %v2124_v14 = vrot.slane %v8771_v33, 4  ;;  %v7325_v36 = vadd.f32 %v2053_v26, %v7098_v48  ;;  %v3545_v4 = vstv %s7253_s4  ;;  %v2127_v59 = vrot.slane %v8775_v35, 4  ;;  %v8783_v35 = vld [vmem:[#allocation54_spill] sm:$0xff] }
 0x285   :  { %3238 = vrot.lane.b32.xlu0 %v8765_v50, %s4428_s9  ;;  %v7303_v50 = vmul.f32 %v7207_v1, %v3393_v27  ;;  %8772 = vst [vmem:[#allocation104_spill] sm:$0xff] %v7322_v41  ;;  %v2091_v27 = vsel %vm769_vm7, %v6367_v21, %v2090_v31  ;;  %v7340_v48 = vmul.f32 %v7207_v1, %v3431_v5  ;;  %v8784_v31 = vrot.slane %v7103_v42, 10  ;;  %v8792_v41 = vld [vmem:[#allocation64_spill] sm:$0xff] }
 0x286   :  { %3240 = vrot.lane.b32.xlu1 %v8764_v18, %s4428_s9  ;;  %v7343_v21 = vmul.f32 %v7308_v10, %v3431_v5  ;;  %v7346_v32 = vadd.f32 %v2055_v61, %v7084_v8  ;;  %v2093_v34 = vsel %vm769_vm7, %v6403_v28, %v2092_v57  ;;  %v7362_v61 = vmul.f32 %v7163_v55, %v3545_v4  ;;  %v8782_v57 = vld [vmem:[#allocation53_spill] sm:$0xff]  ;;  %v8788_v5 = vld [vmem:[#allocation56_spill] sm:$0xff] }
 0x287   :  { %v7298_v60 = vpop.permute.xlu1 %2624  ;;  %v7300_v18 = vpop.permute.xlu0 %2622  ;;  %8777 = vst [vmem:[#allocation105_spill] sm:$0xff] %v7340_v48  ;;  %v7365_v28 = vadd.f32 %v2091_v27, %v7142_v23  ;;  %v2163_v2 = vrot.slane %v8782_v57, 4  ;;  %v7384_v27 = vadd.f32 %v2093_v34, %v7129_v16  ;;  %v3583_v46 = vstv %s7316_s7  ;;  %v8791_v16 = vld [vmem:[#allocation63_spill] sm:$0xff] }
 0x288   :  { %8766 = vst [vmem:[#allocation100_spill] sm:$0xff] %v7298_v60  ;;  %8767 = vst [vmem:[#allocation101_spill] sm:$0xff] %v7300_v18  ;;  %v2126_v18 = vrot.slane %v8776_v29, 4  ;;  %v2239_v34 = vrot.slane %v8791_v16, 4  ;;  %v8795_v16 = vrot.slane %v7125_v22, 10  ;;  %v8801_v22 = vld [vmem:[#allocation60_spill] sm:$0xff]  ;;  %v7442_v45 = vmul.f32 %v7207_v1, %v3583_v46 }
 0x289   :  { %3260 = vrot.lane.b32.xlu0 %v8774_v15, %s4428_s9  ;;  %8778 = vst [vmem:[#allocation106_spill] sm:$0xff] %v7343_v21  ;;  %v2128_v15 = vsel %vm767_vm6, %v2124_v14, %v2125_v12  ;;  %8781 = vst [vmem:[#allocation109_spill] sm:$0xff] %v7362_v61  ;;  %v8785_v12 = vrot.slane %v7106_v58, 10  ;;  %v7378_v14 = vld [vmem:[%s8180_s0] sm:$0x77]  ;;  %v8797_v61 = vld [vmem:[#allocation57_spill] sm:$0xff] }
 0x28a   :  { %3262 = vrot.lane.b32.xlu1 %v8773_v53, %s4428_s9  ;;  %v7381_v23 = vmul.f32 %v7378_v14, %v3545_v4  ;;  %v2130_v57 = vsel %vm767_vm6, %v2126_v18, %v2127_v59  ;;  %v2129_v58 = vsel %vm769_vm7, %v8771_v33, %v2128_v15  ;;  %v2238_v18 = vrot.slane %v8792_v41, 4  ;;  %8803 = vst [vmem:[#allocation117_spill] sm:$0xff] %v7442_v45 }
 0x28b   :  { %v7350_v53 = vpop.permute.xlu1 %2646  ;;  %v7352_v26 = vpop.permute.xlu0 %2644  ;;  %v2131_v33 = vsel %vm769_vm7, %v8776_v29, %v2130_v57  ;;  %v7415_v59 = vmul.f32 %v7308_v10, %v3545_v4  ;;  %v7420_v57 = vmul.f32 %v7163_v55, %v3583_v46 }
 0x28c   :  { %8779 = vst [vmem:[#allocation107_spill] sm:$0xff] %v7350_v53  ;;  %8780 = vst [vmem:[#allocation108_spill] sm:$0xff] %v7352_v26  ;;  %v2162_v26 = vrot.slane %v8783_v35, 4  ;;  %v2164_v53 = vrot.slane %v8788_v5, 4  ;;  %v2242_v48 = vsel %vm767_vm6, %v2238_v18, %v2239_v34  ;;  %v8817_v18 = vld [vmem:[#allocation68_spill] sm:$0xff] }
 0x28d   :  { %3282 = vrot.lane.b32.xlu0 %v8785_v12, %s4428_s9  ;;  %8786 = vst [vmem:[#allocation110_spill] sm:$0xff] %v7381_v23  ;;  %v8787_v12 = vld [vmem:[#allocation55_spill] sm:$0xff]  ;;  %8796 = vst [vmem:[#allocation114_spill] sm:$0xff] %v7415_v59  ;;  %v7436_v23 = vadd.f32 %v2129_v58, %v7169_v0  ;;  %v7456_v58 = vmul.f32 %v7308_v10, %v3583_v46 }
 0x28e   :  { %3284 = vrot.lane.b32.xlu1 %v8784_v31, %s4428_s9  ;;  %v2165_v8 = vrot.slane %v8787_v12, 4  ;;  %v7402_v31 = vmul.f32 %v7207_v1, %v3545_v4  ;;  %v2166_v15 = vsel %vm767_vm6, %v2162_v26, %v2163_v2  ;;  %v8794_v12 = vrot.slane %v7122_v62, 10  ;;  %8799 = vst [vmem:[#allocation115_spill] sm:$0xff] %v7420_v57 }
 0x28f   :  { %v7393_v60 = vpop.permute.xlu1 %2668  ;;  %v7395_v43 = vpop.permute.xlu0 %2666  ;;  %v7423_v2 = vmul.f32 %v7378_v14, %v3583_v46  ;;  %v2203_v26 = vrot.slane %v8801_v22, 4  ;;  %v2167_v21 = vsel %vm769_vm7, %v8783_v35, %v2166_v15  ;;  %v8805_v22 = vrot.slane %v7174_v63, 10  ;;  %8806 = vst [vmem:[#allocation118_spill] sm:$0xff] %v7456_v58 }
 0x290   :  { %8789 = vst [vmem:[#allocation111_spill] sm:$0xff] %v7393_v60  ;;  %8790 = vst [vmem:[#allocation112_spill] sm:$0xff] %v7395_v43  ;;  %v2201_v43 = vrot.slane %v8797_v61, 4  ;;  %v8798_v60 = vld [vmem:[#allocation58_spill] sm:$0xff]  ;;  %v2168_v62 = vsel %vm767_vm6, %v2164_v53, %v2165_v8  ;;  %v3469_v61 = vstv %s7356_s15  ;;  %v7445_v53 = vadd.f32 %v2131_v33, %v7145_v11 }
 0x291   :  { %8793 = vst [vmem:[#allocation113_spill] sm:$0xff] %v7402_v31  ;;  %3304 = vrot.lane.b32.xlu0 %v8795_v16, %s4428_s9  ;;  %v2200_v29 = vrot.slane %v8798_v60, 4  ;;  %8800 = vst [vmem:[#allocation116_spill] sm:$0xff] %v7423_v2  ;;  %v8804_v8 = vrot.slane %v7166_v39, 10  ;;  %v2169_v34 = vsel %vm769_vm7, %v8788_v5, %v2168_v62  ;;  %v7463_v39 = vmul.f32 %v7163_v55, %v3469_v61  ;;  %v8810_v5 = vld [vmem:[#allocation66_spill] sm:$0xff]  ;;  %v8811_v62 = vld [vmem:[#allocation67_spill] sm:$0xff] }
 0x292   :  { %3306 = vrot.lane.b32.xlu1 %v8794_v12, %s4428_s9  ;;  %v8802_v12 = vld [vmem:[#allocation61_spill] sm:$0xff]  ;;  %v7466_v63 = vadd.f32 %v2167_v21, %v7189_v6  ;;  %v2243_v15 = vsel %vm950_vm8, %v8792_v41, %v2242_v48  ;;  %v7480_v6 = vmul.f32 %v7378_v14, %v3469_v61  ;;  %v7483_v21 = vadd.f32 %v2169_v34, %v7186_v13  ;;  %s7502_s9 = sld [smem:[#allocation2 + $0xa0]]  ;;  %v8842_v2 = vld [vmem:[#allocation91_spill] sm:$0xff] }
 0x293   :  { %v2202_v16 = vrot.slane %v8802_v12, 4  ;;  %v7430_v4 = vpop.permute.xlu1 %2690  ;;  %v7432_v42 = vpop.permute.xlu0 %2688  ;;  %v2204_v11 = vsel %vm767_vm6, %v2200_v29, %v2201_v43  ;;  %8807 = vst [vmem:[#allocation119_spill] sm:$0xff] %v7463_v39  ;;  %v2241_v29 = vrot.slane %v8810_v5, 4  ;;  %v8813_v48 = vrot.slane %v7210_v49, 10  ;;  %v8816_v49 = vld [vmem:[#allocation75_spill] sm:$0xff] }
 0x294   :  { %8812 = vst [vmem:[#allocation10_spill] sm:$0xff] %v7480_v6  ;;  %v2205_v41 = vsel %vm769_vm7, %v8798_v60, %v2204_v11  ;;  %v7495_v5 = vmul.f32 %v7207_v1, %v3469_v61  ;;  %v2248_v34 = vadd.f32 %v2243_v15, %v7276_v9  ;;  %v3621_v11 = vstv %s7425_s28 }
 0x295   :  { %3334 = vrot.lane.b32.xlu0 %v8805_v22, %s4429_s19  ;;  %v2206_v33 = vsel %vm767_vm6, %v2202_v16, %v2203_v26  ;;  %v2240_v22 = vrot.slane %v8811_v62, 4  ;;  %v8814_v26 = vrot.slane %v7213_v25, 10  ;;  %v2276_v25 = vrot.slane %v8817_v18, 4  ;;  %v8819_v16 = vld [vmem:[#allocation72_spill] sm:$0xff] }
 0x296   :  { %3336 = vrot.lane.b32.xlu1 %v8804_v8, %s4429_s19  ;;  %8815 = vst [vmem:[#allocation11_spill] sm:$0xff] %v7495_v5  ;;  %v2207_v13 = vsel %vm769_vm7, %v8802_v12, %v2206_v33  ;;  %v2278_v35 = vrot.slane %v8819_v16, 4  ;;  %v7513_v12 = vadd.f32 %v2205_v41, %v7234_v40  ;;  %v7518_v15 = vmul.f32 %v7308_v10, %v3469_v61  ;;  %v8824_v61 = vld [vmem:[#allocation76_spill] sm:$0xff]  ;;  %v8828_v40 = vld [vmem:[#allocation59_spill] sm:$0xff] }
 0x297   :  { %v7471_v46 = vpop.permute.xlu1 %2712  ;;  %v7473_v8 = vpop.permute.xlu0 %2710  ;;  %v2244_v9 = vsel %vm767_vm6, %v2240_v22, %v2241_v29  ;;  %v8823_v60 = vrot.slane %v7223_v47, 10  ;;  %v7531_v29 = vmul.f32 %v7163_v55, %v3621_v11  ;;  %v7534_v22 = vmul.f32 %v7378_v14, %v3621_v11 }
 0x298   :  { %8808 = vst [vmem:[#allocation8_spill] sm:$0xff] %v7471_v46  ;;  %8809 = vst [vmem:[#allocation9_spill] sm:$0xff] %v7473_v8  ;;  %v2315_v41 = vrot.slane %v8824_v61, 4  ;;  %v7539_v33 = vmul.f32 %v7207_v1, %v3621_v11  ;;  %v2245_v47 = vsel %vm950_vm8, %v8811_v62, %v2244_v9  ;;  %v8829_v5 = vrot.slane %v8828_v40, 10  ;;  %v8834_v62 = vld [vmem:[#allocation82_spill] sm:$0xff] }
 0x299   :  { %3338 = vrot.lane.b32.xlu0 %v8814_v26, %s4429_s19  ;;  %v8818_v26 = vld [vmem:[#allocation71_spill] sm:$0xff]  ;;  %v2317_v1 = vrot.slane %v6847_v7, 4  ;;  %v2352_v9 = vrot.slane %v8834_v62, 4  ;;  %v8839_v7 = vrot.slane %v7251_v3, 10  ;;  %v7574_v45 = vstv %s7502_s9 }
 0x29a   :  { %3340 = vrot.lane.b32.xlu1 %v8813_v48, %s4429_s19  ;;  %v2277_v48 = vrot.slane %v8816_v49, 4  ;;  %v2279_v43 = vrot.slane %v8818_v26, 4  ;;  %v7521_v49 = vadd.f32 %v2207_v13, %v7216_v56  ;;  %v8822_v26 = vrot.slane %v7220_v54, 10  ;;  %v8825_v56 = vld [vmem:[#allocation77_spill] sm:$0xff]  ;;  %8826 = vst [vmem:[#allocation14_spill] sm:$0xff] %v7539_v33 }
 0x29b   :  { %v7508_v0 = vpop.permute.xlu1 %2734  ;;  %v7510_v58 = vpop.permute.xlu0 %2732  ;;  %v2314_v13 = vrot.slane %v8825_v56, 4  ;;  %v7542_v54 = vmul.f32 %v7308_v10, %v3621_v11  ;;  %v7550_v6 = vadd.f32 %v8829_v5, %v2248_v34  ;;  %v8832_v11 = vld [vmem:[#allocation79_spill] sm:$0xff]  ;;  %v2391_v5 = vrot.slane %v6962_v24, 4  ;;  %v8837_v34 = vld [vmem:[#allocation88_spill] sm:$0xff] }
 0x29c   :  { %8820 = vst [vmem:[#allocation12_spill] sm:$0xff] %v7508_v0  ;;  %8821 = vst [vmem:[#allocation13_spill] sm:$0xff] %v7510_v58  ;;  %v2316_v10 = vrot.slane %v8832_v11, 4  ;;  %v2390_v40 = vrot.slane %v8837_v34, 4  ;;  %v8840_v58 = vld [vmem:[#allocation89_spill] sm:$0xff]  ;;  %v8841_v0 = vld [vmem:[#allocation90_spill] sm:$0xff] }
 0x29d   :  { %3372 = vrot.lane.b32.xlu0 %v8823_v60, %s4429_s19  ;;  %8827 = vst [vmem:[#allocation15_spill] sm:$0xff] %v7542_v54  ;;  %v2280_v60 = vsel %vm767_vm6, %v2276_v25, %v2277_v48  ;;  %v8833_v54 = vld [vmem:[#allocation81_spill] sm:$0xff]  ;;  %v8835_v48 = vld [vmem:[#allocation84_spill] sm:$0xff]  ;;  %v2429_v24 = vrot.slane %v8841_v0, 4  ;;  %v2428_v57 = vrot.slane %v8842_v2, 4  ;;  %v2431_v8 = vrot.slane %v7087_v37, 4 }
 0x29e   :  { %3374 = vrot.lane.b32.xlu1 %v8822_v26, %s4429_s19  ;;  %v2282_v26 = vsel %vm767_vm6, %v2278_v35, %v2279_v43  ;;  %v2353_v33 = vrot.slane %v8833_v54, 4  ;;  %v2355_v25 = vrot.slane %v8835_v48, 4  ;;  %v8836_v35 = vld [vmem:[#allocation85_spill] sm:$0xff]  ;;  %v2318_v54 = vsel %vm767_vm6, %v2314_v13, %v2315_v41 }
 0x29f   :  { %v7552_v61 = vpop.permute.xlu1 %2756  ;;  %v7554_v39 = vpop.permute.xlu0 %2754  ;;  %v2354_v43 = vrot.slane %v8836_v35, 4  ;;  %v2392_v48 = vrot.slane %v8840_v58, 4  ;;  %v2249_v41 = vadd.f32 %v2245_v47, %v7290_v20  ;;  %v2283_v13 = vsel %vm950_vm8, %v8819_v16, %v2282_v26 }
 0x2a0   :  { %8830 = vst [vmem:[#allocation16_spill] sm:$0xff] %v7552_v61  ;;  %8831 = vst [vmem:[#allocation17_spill] sm:$0xff] %v7554_v39  ;;  %v8838_v61 = vrot.slane %v7248_v52, 10  ;;  %v2393_v39 = vrot.slane %v7002_v30, 4  ;;  %v8843_v52 = vld [vmem:[#allocation92_spill] sm:$0xff]  ;;  %v2281_v30 = vsel %vm950_vm8, %v8817_v18, %v2280_v60  ;;  %v2320_v0 = vsel %vm767_vm6, %v2316_v10, %v2317_v1 }
 0x2a1   :  { %3376 = vrot.lane.b32.xlu0 %v8839_v7, %s4429_s19  ;;  %v2356_v7 = vsel %vm767_vm6, %v2352_v9, %v2353_v33  ;;  %v2358_v37 = vsel %vm767_vm6, %v2354_v43, %v2355_v25  ;;  %v2394_v59 = vsel %vm767_vm6, %v2390_v40, %v2391_v5  ;;  %v8844_v31 = vrot.slane %v7260_v19, 10 }
 0x2a2   :  { %3378 = vrot.lane.b32.xlu1 %v8838_v61, %s4429_s19  ;;  %v2430_v61 = vrot.slane %v8843_v52, 4  ;;  %v8845_v20 = vrot.slane %v7287_v38, 10  ;;  %v4332_v18 = vrot.slane %v7518_v15, 10  ;;  %v2319_v16 = vsel %vm950_vm8, %v8825_v56, %v2318_v54 }
 0x2a3   :  { %v7580_v46 = vpop.permute.xlu1 %2778  ;;  %v7582_v3 = vpop.permute.xlu0 %2776  ;;  %v2396_v1 = vsel %vm767_vm6, %v2392_v48, %v2393_v39  ;;  %v7605_v10 = vmul.f32 %v7163_v55, %v7574_v45  ;;  %v7609_v33 = vmul.f32 %v7378_v14, %v7574_v45  ;;  %v2286_v19 = vadd.f32 %v2281_v30, %v7325_v36 }
 0x2a4   :  { %v2321_v38 = vsel %vm950_vm8, %v8832_v11, %v2320_v0  ;;  %v2434_v47 = vsel %vm767_vm6, %v2430_v61, %v2431_v8  ;;  %v2287_v60 = vadd.f32 %v2283_v13, %v7346_v32  ;;  %v2357_v26 = vsel %vm950_vm8, %v8834_v62, %v2356_v7  ;;  %v8846_v8 = vld [vmem:[#allocation62_spill] sm:$0xff]  ;;  %v8854_v13 = vld [vmem:[#allocation93_spill] sm:$0xff] }
 0x2a5   :  { %3410 = vrot.lane.b32.xlu0 %v8845_v20, %s4429_s19  ;;  %v2359_v9 = vsel %vm950_vm8, %v8836_v35, %v2358_v37  ;;  %v2395_v36 = vsel %vm950_vm8, %v8837_v34, %v2394_v59  ;;  %v2324_v11 = vadd.f32 %v2319_v16, %v7365_v28  ;;  %v8847_v25 = vrot.slane %v8846_v8, 10  ;;  %v8855_v0 = vld [vmem:[#allocation69_spill] sm:$0xff]  ;;  %v8857_v20 = vld [vmem:[#allocation103_spill] sm:$0xff] }
 0x2a6   :  { %3412 = vrot.lane.b32.xlu1 %v8844_v31, %s4429_s19  ;;  %v2432_v31 = vsel %vm767_vm6, %v2428_v57, %v2429_v24  ;;  %v2397_v57 = vsel %vm950_vm8, %v8840_v58, %v2396_v1  ;;  %v8848_v32 = vrot.slane %v7303_v50, 10  ;;  %v8849_v62 = vrot.slane %v7311_v51, 10  ;;  %v8850_v51 = vld [vmem:[#allocation65_spill] sm:$0xff] }
 0x2a7   :  { %v7616_v56 = vpop.permute.xlu1 %2800  ;;  %v7618_v39 = vpop.permute.xlu0 %2798  ;;  %v2453_v43 = vadd.f32 %v8847_v25, %v2249_v41  ;;  %v4351_v35 = vrot.slane %v7531_v29, 10  ;;  %v2325_v59 = vadd.f32 %v2321_v38, %v7384_v27  ;;  %v2433_v28 = vsel %vm950_vm8, %v8842_v2, %v2432_v31  ;;  %v8861_v31 = vld [vmem:[#allocation94_spill] sm:$0xff] }
 0x2a8   :  { %v2435_v58 = vsel %vm950_vm8, %v8843_v52, %v2434_v47  ;;  %v2539_v5 = vrot.slane %v7134_v44, 4  ;;  %v2362_v34 = vadd.f32 %v2357_v26, %v7436_v23  ;;  %v2363_v50 = vadd.f32 %v2359_v9, %v7445_v53  ;;  %v8852_v52 = vld [vmem:[#allocation74_spill] sm:$0xff]  ;;  %v8864_v26 = vld [vmem:[#allocation96_spill] sm:$0xff] }
 0x2a9   :  { %3414 = vrot.lane.b32.xlu0 %v8849_v62, %s4429_s19  ;;  %v2400_v40 = vadd.f32 %v2395_v36, %v7466_v63  ;;  %v8851_v54 = vrot.slane %v8850_v51, 10  ;;  %v2401_v2 = vadd.f32 %v2397_v57, %v7483_v21  ;;  %v2538_v61 = vrot.slane %v7136_v17, 4  ;;  %v8859_v21 = vld [vmem:[#allocation104_spill] sm:$0xff]  ;;  %v8862_v47 = vld [vmem:[#allocation70_spill] sm:$0xff]  ;;  %v8865_v36 = vld [vmem:[#allocation97_spill] sm:$0xff] }
 0x2aa   :  { %3416 = vrot.lane.b32.xlu1 %v8848_v32, %s4429_s19  ;;  %v8853_v41 = vrot.slane %v8852_v52, 10  ;;  %v2561_v23 = vrot.slane %v8854_v13, 4  ;;  %v2438_v53 = vadd.f32 %v2433_v28, %v7513_v12  ;;  %v2439_v63 = vadd.f32 %v2435_v58, %v7521_v49  ;;  %v8866_v57 = vld [vmem:[#allocation78_spill] sm:$0xff]  ;;  %v8868_v32 = vld [vmem:[#allocation73_spill] sm:$0xff]  ;;  %v8870_v58 = vld [vmem:[#allocation80_spill] sm:$0xff] }
 0x2ab   :  { %v2466_v48 = vadd.f32 %v8851_v54, %v2286_v19  ;;  %v7650_v24 = vpop.permute.xlu1 %2822  ;;  %v7652_v27 = vpop.permute.xlu0 %2820  ;;  %v8856_v7 = vrot.slane %v8855_v0, 10  ;;  %v8858_v16 = vrot.slane %v8857_v20, 10  ;;  %v8860_v1 = vrot.slane %v8859_v21, 10 }
 0x2ac   :  { %v2467_v30 = vadd.f32 %v8853_v41, %v2287_v60  ;;  %v4350_v19 = vrot.slane %v7534_v22, 10  ;;  %v2541_v38 = vsel %vm103_vm0, %v7134_v44, %v2539_v5  ;;  %v2560_v12 = vrot.slane %v8861_v31, 4  ;;  %v8872_v41 = vld [vmem:[#allocation98_spill] sm:$0xff] }
 0x2ad   :  { %v2480_v37 = vadd.f32 %v8856_v7, %v2324_v11  ;;  %3448 = vrot.lane.b32.xlu0 %v8860_v1, %s4429_s19  ;;  %v8863_v49 = vrot.slane %v8862_v47, 10  ;;  %v2583_v9 = vrot.slane %v8864_v26, 4  ;;  %v2582_v11 = vrot.slane %v8865_v36, 4 }
 0x2ae   :  { %3450 = vrot.lane.b32.xlu1 %v8858_v16, %s4429_s19  ;;  %v8867_v8 = vrot.slane %v8866_v57, 10  ;;  %v8869_v62 = vrot.slane %v8868_v32, 10  ;;  %v8871_v51 = vrot.slane %v8870_v58, 10  ;;  %v2563_v52 = vsel %vm103_vm0, %v8854_v13, %v2561_v23  ;;  %v8875_v16 = vld [vmem:[#allocation99_spill] sm:$0xff]  ;;  %v8880_v32 = vld [vmem:[#allocation105_spill] sm:$0xff]  ;;  %v8884_v23 = vld [vmem:[#allocation100_spill] sm:$0xff] }
 0x2af   :  { %v2481_v60 = vadd.f32 %v8863_v49, %v2325_v59  ;;  %v7685_v44 = vpop.permute.xlu1 %2844  ;;  %v7687_v5 = vpop.permute.xlu0 %2842  ;;  %v2540_v59 = vsel %vm103_vm0, %v7136_v17, %v2538_v61  ;;  %v2605_v0 = vrot.slane %v8872_v41, 4  ;;  %v2604_v21 = vrot.slane %v8875_v16, 4  ;;  %v8878_v49 = vld [vmem:[#allocation86_spill] sm:$0xff] }
 0x2b0   :  { %v2495_v25 = vadd.f32 %v8867_v8, %v2363_v50  ;;  %v2494_v28 = vadd.f32 %v8869_v62, %v2362_v34  ;;  %v7683_v54 = vadd.f32 %v8871_v51, %v2400_v40  ;;  %v8873_v50 = vld [vmem:[#allocation83_spill] sm:$0xff]  ;;  %v2545_v34 = vadd.f32 %v2541_v38, %v2453_v43  ;;  %v8882_v61 = vld [vmem:[#allocation106_spill] sm:$0xff] }
 0x2b1   :  { %v8874_v7 = vrot.slane %v8873_v50, 10  ;;  %v8876_v40 = vld [vmem:[#allocation87_spill] sm:$0xff]  ;;  %v8879_v57 = vrot.slane %v8878_v49, 10  ;;  %v8881_v17 = vrot.slane %v8880_v32, 10  ;;  %v8883_v13 = vrot.slane %v8882_v61, 10  ;;  %v8886_v50 = vld [vmem:[#allocation108_spill] sm:$0xff] }
 0x2b2   :  { %v8877_v1 = vrot.slane %v8876_v40, 10  ;;  %v2585_v43 = vsel %vm103_vm0, %v8864_v26, %v2583_v9  ;;  %v2627_v38 = vrot.slane %v8884_v23, 4  ;;  %v2567_v58 = vadd.f32 %v2563_v52, %v2467_v30  ;;  %v8888_v9 = vld [vmem:[#allocation111_spill] sm:$0xff] }
 0x2b3   :  { %v2509_v20 = vadd.f32 %v8874_v7, %v2401_v2  ;;  %v2522_v8 = vadd.f32 %v8879_v57, %v2438_v53  ;;  %3454 = vrot.lane.b32.xlu1 %v8881_v17, %s4429_s19  ;;  %3452 = vrot.lane.b32.xlu0 %v8883_v13, %s4429_s19  ;;  %v2562_v2 = vsel %vm103_vm0, %v8861_v31, %v2560_v12  ;;  %v2648_v7 = vrot.slane %v8886_v50, 4  ;;  %v7717_v40 = vpop.permute.xlu1 %2866  ;;  %v8887_v12 = vld [vmem:[#allocation101_spill] sm:$0xff]  ;;  %v8889_v57 = vld [vmem:[#allocation112_spill] sm:$0xff] }
 0x2b4   :  { %v2523_v47 = vadd.f32 %v8877_v1, %v2439_v63  ;;  %v8885_v63 = vld [vmem:[#allocation107_spill] sm:$0xff]  ;;  %v2544_v53 = vadd.f32 %v2540_v59, %v7550_v6  ;;  %v2584_v51 = vsel %vm103_vm0, %v8865_v36, %v2582_v11  ;;  %v7719_v1 = vpop.permute.xlu0 %2864  ;;  %v2607_v31 = vsel %vm103_vm0, %v8872_v41, %v2605_v0  ;;  %v8890_v59 = vld [vmem:[#allocation109_spill] sm:$0xff]  ;;  %v8892_v41 = vld [vmem:[#allocation110_spill] sm:$0xff] }
 0x2b5   :  { %v2649_v62 = vrot.slane %v8885_v63, 4  ;;  %v2626_v26 = vrot.slane %v8887_v12, 4  ;;  %v2671_v49 = vrot.slane %v8888_v9, 4  ;;  %v2670_v32 = vrot.slane %v8889_v57, 4 }
 0x2b6   :  { %v2566_v6 = vadd.f32 %v2562_v2, %v2466_v48  ;;  %v7726_v30 = vadd.f32 %v2585_v43, %v2481_v60  ;;  %v2606_v36 = vsel %vm103_vm0, %v8875_v16, %v2604_v21  ;;  %v2693_v11 = vrot.slane %v7430_v4, 4 }
 0x2b7   :  { %v8891_v52 = vrot.slane %v8890_v59, 10  ;;  %v8893_v0 = vrot.slane %v8892_v41, 10  ;;  %v2629_v17 = vsel %vm103_vm0, %v8884_v23, %v2627_v38  ;;  %v2651_v48 = vsel %vm103_vm0, %v8885_v63, %v2649_v62  ;;  %v7750_v43 = vpop.permute.xlu1 %2888 }
 0x2b8   :  { %v2781_v60 = vrot.slane %v7580_v46, 4  ;;  %v2780_v16 = vrot.slane %v7582_v3, 4  ;;  %v7743_v21 = vadd.f32 %v2584_v51, %v2480_v37  ;;  %v7745_v61 = vadd.f32 %v2607_v31, %v2495_v25  ;;  %v7752_v59 = vpop.permute.xlu0 %2886  ;;  %v8896_v31 = vld [vmem:[#allocation114_spill] sm:$0xff] }
 0x2b9   :  { %3564 = vrot.lane.b32.xlu1 %v8891_v52, %s4430_s25  ;;  %3562 = vrot.lane.b32.xlu0 %v8893_v0, %s4430_s25  ;;  %v2650_v13 = vsel %vm103_vm0, %v8886_v50, %v2648_v7  ;;  %v2692_v2 = vrot.slane %v7432_v42, 4  ;;  %v7754_v23 = vadd.f32 %v2606_v36, %v2494_v28  ;;  %v7758_v38 = vsel %vm103_vm0, %v8887_v12, %v2626_v26  ;;  %v8894_v28 = vld [vmem:[#allocation113_spill] sm:$0xff] }
 0x2ba   :  { %v2673_v37 = vsel %vm212_vm1, %v8888_v9, %v2671_v49  ;;  %v2672_v25 = vsel %vm212_vm1, %v8889_v57, %v2670_v32  ;;  %v7764_v63 = vadd.f32 %v2629_v17, %v2509_v20  ;;  %v2655_v62 = vadd.f32 %v2651_v48, %v2523_v47  ;;  %v8898_v32 = vld [vmem:[#allocation8_spill] sm:$0xff]  ;;  %v8899_v0 = vld [vmem:[#allocation9_spill] sm:$0xff] }
 0x2bb   :  { %v2695_v51 = vsel %vm212_vm1, %v7430_v4, %v2693_v11  ;;  %v2803_v50 = vrot.slane %v7616_v56, 4  ;;  %v8895_v7 = vrot.slane %v8894_v28, 10  ;;  %v8897_v12 = vrot.slane %v8896_v31, 10  ;;  %v2911_v11 = vpop.permute.xlu1 %2910 }
 0x2bc   :  { %v2654_v26 = vadd.f32 %v2650_v13, %v2522_v8  ;;  %v2783_v9 = vsel %vm212_vm1, %v7580_v46, %v2781_v60  ;;  %v2782_v20 = vsel %vm212_vm1, %v7582_v3, %v2780_v16  ;;  %v2802_v47 = vrot.slane %v7618_v39, 4  ;;  %v2909_v52 = vpop.permute.xlu0 %2908 }
 0x2bd   :  { %3568 = vrot.lane.b32.xlu1 %v8895_v7, %s4430_s25  ;;  %3566 = vrot.lane.b32.xlu0 %v8897_v12, %s4430_s25  ;;  %v2677_v4 = vadd.f32 %v2673_v37, %v2545_v34  ;;  %v2676_v49 = vadd.f32 %v2672_v25, %v2544_v53  ;;  %v2694_v57 = vsel %vm212_vm1, %v7432_v42, %v2692_v2  ;;  %v2715_v36 = vrot.slane %v8898_v32, 4  ;;  %v8900_v53 = vld [vmem:[#allocation115_spill] sm:$0xff]  ;;  %v8902_v42 = vld [vmem:[#allocation116_spill] sm:$0xff] }
 0x2be   :  { %v2699_v41 = vadd.f32 %v2695_v51, %v2567_v58  ;;  %v2714_v8 = vrot.slane %v8899_v0, 4  ;;  %v2913_v17 = vrot.slane %v2911_v11, 4  ;;  %v2912_v48 = vrot.slane %v2909_v52, 4 }
 0x2bf   :  { %v2787_v46 = vadd.f32 %v2783_v9, %v2655_v62  ;;  %v2786_v60 = vadd.f32 %v2782_v20, %v2654_v26  ;;  %v2805_v3 = vsel %vm321_vm2, %v7616_v56, %v2803_v50  ;;  %v2825_v34 = vrot.slane %v7650_v24, 4  ;;  %v2933_v28 = vpop.permute.xlu1 %2932 }
 0x2c0   :  { %v8901_v16 = vrot.slane %v8900_v53, 10  ;;  %v8903_v13 = vrot.slane %v8902_v42, 10  ;;  %v2804_v58 = vsel %vm321_vm2, %v7618_v39, %v2802_v47  ;;  %v2824_v2 = vrot.slane %v7652_v27, 4  ;;  %v2931_v7 = vpop.permute.xlu0 %2930  ;;  %v8904_v39 = vld [vmem:[#allocation12_spill] sm:$0xff] }
 0x2c1   :  { %v2915_v37 = vsel %vm321_vm2, %v2911_v11, %v2913_v17  ;;  %v2914_v25 = vsel %vm321_vm2, %v2909_v52, %v2912_v48  ;;  %v2698_v56 = vadd.f32 %v2694_v57, %v2566_v6  ;;  %v2717_v62 = vsel %vm212_vm1, %v8898_v32, %v2715_v36  ;;  %v8905_v32 = vld [vmem:[#allocation117_spill] sm:$0xff]  ;;  %v8907_v11 = vld [vmem:[#allocation118_spill] sm:$0xff] }
 0x2c2   :  { %3602 = vrot.lane.b32.xlu1 %v8901_v16, %s4430_s25  ;;  %3600 = vrot.lane.b32.xlu0 %v8903_v13, %s4430_s25  ;;  %v7800_v51 = vadd.f32 %v2915_v37, %v2787_v46  ;;  %v7802_v50 = vadd.f32 %v2914_v25, %v2786_v60  ;;  %v2716_v31 = vsel %vm212_vm1, %v8899_v0, %v2714_v8  ;;  %v2737_v12 = vrot.slane %v8904_v39, 4  ;;  %v8909_v17 = vld [vmem:[#allocation13_spill] sm:$0xff]  ;;  %v8910_v37 = vld [vmem:[#allocation119_spill] sm:$0xff] }
 0x2c3   :  { %v2935_v26 = vrot.slane %v2933_v28, 4  ;;  %v2934_v9 = vrot.slane %v2931_v7, 4  ;;  %v2809_v20 = vadd.f32 %v2805_v3, %v2677_v4  ;;  %v2808_v47 = vadd.f32 %v2804_v58, %v2676_v49  ;;  %v2955_v3 = vpop.permute.xlu1 %2954 }
 0x2c4   :  { %v2827_v6 = vsel %vm321_vm2, %v7650_v24, %v2825_v34  ;;  %v2847_v57 = vrot.slane %v7685_v44, 4  ;;  %v8906_v36 = vrot.slane %v8905_v32, 10  ;;  %v8908_v52 = vrot.slane %v8907_v11, 10  ;;  %v2953_v34 = vpop.permute.xlu0 %2952 }
 0x2c5   :  { %v2826_v0 = vsel %vm321_vm2, %v7652_v27, %v2824_v2  ;;  %v2846_v8 = vrot.slane %v7687_v5, 4  ;;  %v2937_v4 = vsel %vm430_vm3, %v2933_v28, %v2935_v26  ;;  %v2936_v49 = vsel %vm430_vm3, %v2931_v7, %v2934_v9 }
 0x2c6   :  { %3606 = vrot.lane.b32.xlu1 %v8906_v36, %s4430_s25  ;;  %3604 = vrot.lane.b32.xlu0 %v8908_v52, %s4430_s25  ;;  %v2721_v24 = vadd.f32 %v2717_v62, %v7726_v30  ;;  %v2736_v48 = vrot.slane %v8909_v17, 4  ;;  %v7823_v46 = vadd.f32 %v2937_v4, %v2809_v20  ;;  %v7825_v60 = vadd.f32 %v2936_v49, %v2808_v47  ;;  %v8912_v62 = vld [vmem:[#allocation10_spill] sm:$0xff] }
 0x2c7   :  { %v2720_v53 = vadd.f32 %v2716_v31, %v7743_v21  ;;  %v2831_v16 = vadd.f32 %v2827_v6, %v2699_v41  ;;  %v2957_v27 = vrot.slane %v2955_v3, 4  ;;  %v2956_v42 = vrot.slane %v2953_v34, 4  ;;  %v8914_v31 = vld [vmem:[#allocation16_spill] sm:$0xff]  ;;  %v2977_v47 = vpop.permute.xlu1 %2976  ;;  %v8918_v4 = vld [vmem:[#allocation14_spill] sm:$0xff] }
 0x2c8   :  { %v2830_v13 = vadd.f32 %v2826_v0, %v2698_v56  ;;  %v2849_v58 = vsel %vm321_vm2, %v7685_v44, %v2847_v57  ;;  %v2869_v2 = vrot.slane %v7717_v40, 4  ;;  %v2868_v30 = vrot.slane %v7719_v1, 4  ;;  %v2975_v6 = vpop.permute.xlu0 %2974  ;;  %v8915_v57 = vld [vmem:[#allocation17_spill] sm:$0xff]  ;;  %v8916_v0 = vld [vmem:[#allocation11_spill] sm:$0xff] }
 0x2c9   :  { %v8911_v25 = vrot.slane %v8910_v37, 10  ;;  %v8913_v28 = vrot.slane %v8912_v62, 10  ;;  %v2739_v21 = vsel %vm212_vm1, %v8904_v39, %v2737_v12  ;;  %v2848_v41 = vsel %vm321_vm2, %v7687_v5, %v2846_v8 }
 0x2ca   :  { %v2959_v44 = vsel %vm430_vm3, %v2955_v3, %v2957_v27  ;;  %v2958_v56 = vsel %vm430_vm3, %v2953_v34, %v2956_v42  ;;  %v2738_v7 = vsel %vm212_vm1, %v8909_v17, %v2736_v48  ;;  %v2759_v26 = vrot.slane %v8914_v31, 4 }
 0x2cb   :  { %3488 = vrot.lane.b32.xlu1 %v8911_v25, %s4429_s19  ;;  %3486 = vrot.lane.b32.xlu0 %v8913_v28, %s4429_s19  ;;  %v7847_v9 = vadd.f32 %v2959_v44, %v2831_v16  ;;  %v7849_v20 = vadd.f32 %v2958_v56, %v2830_v13  ;;  %v2758_v39 = vrot.slane %v8915_v57, 4  ;;  %v2853_v12 = vadd.f32 %v2849_v58, %v2721_v24 }
 0x2cc   :  { %v2979_v32 = vrot.slane %v2977_v47, 4  ;;  %v2978_v5 = vrot.slane %v2975_v6, 4  ;;  %v2852_v36 = vadd.f32 %v2848_v41, %v2720_v53  ;;  %v2871_v11 = vsel %vm321_vm2, %v7717_v40, %v2869_v2  ;;  %v2997_v53 = vpop.permute.xlu0 %2996 }
 0x2cd   :  { %v2870_v52 = vsel %vm321_vm2, %v7719_v1, %v2868_v30  ;;  %v8917_v8 = vrot.slane %v8916_v0, 10  ;;  %v4353_v49 = vrot.slane %v8918_v4, 10  ;;  %v2891_v24 = vrot.slane %v7750_v43, 4 }
 0x2ce   :  { %v2890_v17 = vrot.slane %v7752_v59, 4  ;;  %v2981_v48 = vsel %vm430_vm3, %v2977_v47, %v2979_v32  ;;  %v2980_v40 = vsel %vm430_vm3, %v2975_v6, %v2978_v5  ;;  %v2743_v1 = vadd.f32 %v2739_v21, %v7745_v61 }
 0x2cf   :  { %3492 = vrot.lane.b32.xlu1 %v8917_v8, %s4429_s19  ;;  %3490 = vrot.lane.b32.xlu0 %v4332_v18, %s4429_s19  ;;  %v2742_v3 = vadd.f32 %v2738_v7, %v7754_v23  ;;  %v7871_v34 = vadd.f32 %v2981_v48, %v2853_v12  ;;  %v7873_v15 = vadd.f32 %v2980_v40, %v2852_v36  ;;  %v2999_v18 = vpop.permute.xlu1 %2998  ;;  %v3000_v13 = vrot.slane %v2997_v53, 4  ;;  %v8919_v23 = vld [vmem:[#allocation15_spill] sm:$0xff] }
 0x2d0   :  { %v2761_v16 = vsel %vm212_vm1, %v8914_v31, %v2759_v26  ;;  %v2760_v27 = vsel %vm212_vm1, %v8915_v57, %v2758_v39  ;;  %v3001_v42 = vrot.slane %v2999_v18, 4  ;;  %v2632_v58 = vadd.f32 %v7758_v38, %v7683_v54  ;;  %v3019_v28 = vpop.permute.xlu0 %3018  ;;  %v8921_v31 = vld [vmem:[#allocation102_spill] sm:$0xff] }
 0x2d1   :  { %v2875_v61 = vadd.f32 %v2871_v11, %v2743_v1  ;;  %v2874_v2 = vadd.f32 %v2870_v52, %v2742_v3  ;;  %v4352_v30 = vrot.slane %v8919_v23, 10  ;;  %v2893_v37 = vsel %vm321_vm2, %v7750_v43, %v2891_v24 }
 0x2d2   :  { %v2892_v25 = vsel %vm321_vm2, %v7752_v59, %v2890_v17  ;;  %v3003_v54 = vsel %vm430_vm3, %v2999_v18, %v3001_v42  ;;  %v3002_v38 = vsel %vm430_vm3, %v2997_v53, %v3000_v13  ;;  %v2765_v62 = vadd.f32 %v2761_v16, %v7764_v63  ;;  %v8920_v59 = vld [vmem:[#allocation95_spill] sm:$0xff] }
 0x2d3   :  { %3640 = vrot.lane.b32.xlu1 %v4351_v35, %s4430_s25  ;;  %3638 = vrot.lane.b32.xlu0 %v4350_v19, %s4430_s25  ;;  %v2764_v29 = vadd.f32 %v2760_v27, %v2632_v58  ;;  %v7895_v35 = vadd.f32 %v3003_v54, %v2875_v61  ;;  %v7897_v22 = vadd.f32 %v3002_v38, %v2874_v2  ;;  %v3021_v19 = vpop.permute.xlu1 %3020  ;;  %v3022_v41 = vrot.slane %v3019_v28, 4 }
 0x2d4   :  { %v3023_v21 = vrot.slane %v3021_v19, 4  ;;  %v4336_v43 = vrot.slane %v7605_v10, 10  ;;  %v3511_v44 = vmul.f32 %v8920_v59, %v7574_v45  ;;  %v2897_v56 = vadd.f32 %v2893_v37, %v2765_v62  ;;  %v3041_v32 = vpop.permute.xlu0 %3040 }
 0x2d5   :  { %v2896_v7 = vadd.f32 %v2892_v25, %v2764_v29  ;;  %v4335_v63 = vrot.slane %v7609_v33, 10  ;;  %v3510_v26 = vmul.f32 %v8921_v31, %v7574_v45  ;;  %v3024_v6 = vsel %vm430_vm3, %v3019_v28, %v3022_v41 }
 0x2d6   :  { %v3025_v47 = vsel %vm430_vm3, %v3021_v19, %v3023_v21  ;;  %v3659_v57 = vstv %s7867_s12  ;;  %v3044_v36 = vrot.slane %v3041_v32, 4  ;;  %v4338_v33 = vrot.slane %v3511_v44, 10 }
 0x2d7   :  { %3644 = vrot.lane.b32.xlu1 %v4353_v49, %s4430_s25  ;;  %3642 = vrot.lane.b32.xlu0 %v4352_v30, %s4430_s25  ;;  %v7910_v10 = vadd.f32 %v3025_v47, %v2897_v56  ;;  %v7912_v39 = vadd.f32 %v3024_v6, %v2896_v7  ;;  %v3043_v12 = vpop.permute.xlu1 %3042  ;;  %v4337_v45 = vrot.slane %v3510_v26, 10  ;;  %v3661_v11 = vmul.f32 %v7163_v55, %v3659_v57 }
 0x2d8   :  { %v3045_v5 = vrot.slane %v3043_v12, 4  ;;  %v3660_v52 = vmul.f32 %v7378_v14, %v3659_v57  ;;  %v3046_v8 = vsel %vm430_vm3, %v3041_v32, %v3044_v36  ;;  %v3063_v17 = vpop.permute.xlu0 %3062  ;;  %v3663_v18 = vmul.f32 %v8920_v59, %v3659_v57 }
 0x2d9   :  { %v7924_v49 = vadd.f32 %v3046_v8, %v7802_v50  ;;  %v3066_v40 = vrot.slane %v3063_v17, 4  ;;  %v4356_v1 = vrot.slane %v3661_v11, 10  ;;  %v3662_v53 = vmul.f32 %v8921_v31, %v3659_v57 }
 0x2da   :  { %v3047_v0 = vsel %vm430_vm3, %v3043_v12, %v3045_v5  ;;  %v4355_v3 = vrot.slane %v3660_v52, 10  ;;  %v3697_v50 = vstv %s4359_s13  ;;  %v4358_v23 = vrot.slane %v3663_v18, 10  ;;  %v4391_v12 = vld [vmem:[%s8180_s0 + $0x8] sm:$0x7] }
 0x2db   :  { %3526 = vrot.lane.b32.xlu1 %v4336_v43, %s4429_s19  ;;  %3524 = vrot.lane.b32.xlu0 %v4335_v63, %s4429_s19  ;;  %v7921_v4 = vadd.f32 %v3047_v0, %v7800_v51  ;;  %v3065_v24 = vpop.permute.xlu1 %3064  ;;  %v3068_v16 = vsel %vm539_vm4, %v3063_v17, %v3066_v40  ;;  %v4357_v30 = vrot.slane %v3662_v53, 10  ;;  %v3699_v37 = vmul.f32 %v7163_v55, %v3697_v50 }
 0x2dc   :  { %v3067_v48 = vrot.slane %v3065_v24, 4  ;;  %v7936_v42 = vadd.f32 %v3068_v16, %v7825_v60  ;;  %v3085_v58 = vpop.permute.xlu0 %3084  ;;  %v3698_v25 = vmul.f32 %v7378_v14, %v3697_v50  ;;  %v3701_v41 = vmul.f32 %v8920_v59, %v3697_v50 }
 0x2dd   :  { %v3088_v2 = vrot.slane %v3085_v58, 4  ;;  %v4361_v55 = vrot.slane %v3699_v37, 10  ;;  %v3700_v43 = vmul.f32 %v8921_v31, %v3697_v50 }
 0x2de   :  { %v3069_v51 = vsel %vm539_vm4, %v3065_v24, %v3067_v48  ;;  %v4360_v21 = vrot.slane %v3698_v25, 10  ;;  %v4363_v59 = vrot.slane %v3701_v41, 10 }
 0x2df   :  { %3530 = vrot.lane.b32.xlu1 %v4338_v33, %s4429_s19  ;;  %3528 = vrot.lane.b32.xlu0 %v4337_v45, %s4429_s19  ;;  %v7933_v27 = vadd.f32 %v3069_v51, %v7823_v46  ;;  %v3087_v13 = vpop.permute.xlu1 %3086  ;;  %v3090_v54 = vsel %vm539_vm4, %v3085_v58, %v3088_v2  ;;  %v4362_v57 = vrot.slane %v3700_v43, 10 }
 0x2e0   :  { %v3089_v61 = vrot.slane %v3087_v13, 4  ;;  %v7948_v38 = vadd.f32 %v3090_v54, %v7849_v20  ;;  %v3107_v29 = vpop.permute.xlu0 %3106  ;;  %v3735_v20 = vstv %s4364_s14 }
 0x2e1   :  { %v3110_v28 = vrot.slane %v3107_v29, 4  ;;  %v3737_v32 = vmul.f32 %v4391_v12, %v3735_v20  ;;  %v3738_v48 = vmul.f32 %v8921_v31, %v3735_v20 }
 0x2e2   :  { %v3091_v46 = vsel %vm539_vm4, %v3087_v13, %v3089_v61 }
 0x2e3   :  { %3678 = vrot.lane.b32.xlu1 %v4356_v1, %s4430_s25  ;;  %3676 = vrot.lane.b32.xlu0 %v4355_v3, %s4430_s25  ;;  %v7945_v60 = vadd.f32 %v3091_v46, %v7847_v9  ;;  %v3109_v62 = vpop.permute.xlu1 %3108  ;;  %v3112_v44 = vsel %vm539_vm4, %v3107_v29, %v3110_v28  ;;  %v4366_v8 = vrot.slane %v3737_v32, 10  ;;  %v4367_v50 = vrot.slane %v3738_v48, 10 }
 0x2e4   :  { %v3111_v19 = vrot.slane %v3109_v62, 4  ;;  %v7960_v7 = vadd.f32 %v3112_v44, %v7873_v15  ;;  %v3129_v26 = vpop.permute.xlu0 %3128 }
 0x2e5   :  { %v3132_v6 = vrot.slane %v3129_v26, 4 }
 0x2e6   :  { %v3113_v9 = vsel %vm539_vm4, %v3109_v62, %v3111_v19 }
 0x2e7   :  { %3682 = vrot.lane.b32.xlu1 %v4358_v23, %s4430_s25  ;;  %3680 = vrot.lane.b32.xlu0 %v4357_v30, %s4430_s25  ;;  %v7957_v56 = vadd.f32 %v3113_v9, %v7871_v34  ;;  %v3131_v63 = vpop.permute.xlu1 %3130  ;;  %v3736_v34 = vmul.f32 %v7378_v14, %v3735_v20  ;;  %v3134_v5 = vsel %vm539_vm4, %v3129_v26, %v3132_v6  ;;  %v4392_v14 = vld [vmem:[%s8180_s0 + $0x14] sm:$0x7] }
 0x2e8   :  { %v3133_v47 = vrot.slane %v3131_v63, 4  ;;  %v3138_v33 = vadd.f32 %v3134_v5, %v7897_v22  ;;  %v3151_v11 = vpop.permute.xlu0 %3150  ;;  %v3739_v17 = vmul.f32 %v4392_v14, %v3735_v20 }
 0x2e9   :  { %v3154_v0 = vrot.slane %v3151_v11, 4  ;;  %v4365_v24 = vrot.slane %v3736_v34, 10 }
 0x2ea   :  { %v3135_v15 = vsel %vm539_vm4, %v3131_v63, %v3133_v47  ;;  %v4368_v16 = vrot.slane %v3739_v17, 10 }
 0x2eb   :  { %3716 = vrot.lane.b32.xlu1 %v4361_v55, %s4430_s25  ;;  %3714 = vrot.lane.b32.xlu0 %v4360_v21, %s4430_s25  ;;  %v3139_v36 = vadd.f32 %v3135_v15, %v7895_v35  ;;  %v3153_v45 = vpop.permute.xlu1 %3152  ;;  %v3156_v22 = vsel %vm539_vm4, %v3151_v11, %v3154_v0 }
 0x2ec   :  { %v3155_v52 = vrot.slane %v3153_v45, 4  ;;  %v3160_v1 = vadd.f32 %v3156_v22, %v7912_v39  ;;  %v3173_v18 = vpop.permute.xlu0 %3172 }
 0x2ed   :  { %v3176_v51 = vrot.slane %v3173_v18, 4 }
 0x2ee   :  { %v3157_v35 = vsel %vm539_vm4, %v3153_v45, %v3155_v52 }
 0x2ef   :  { %3720 = vrot.lane.b32.xlu1 %v4363_v59, %s4430_s25  ;;  %3718 = vrot.lane.b32.xlu0 %v4362_v57, %s4430_s25  ;;  %v3161_v40 = vadd.f32 %v3157_v35, %v7910_v10  ;;  %v3175_v3 = vpop.permute.xlu1 %3174  ;;  %v3178_v13 = vsel %vm539_vm4, %v3173_v18, %v3176_v51 }
 0x2f0   :  { %v3177_v53 = vrot.slane %v3175_v3, 4  ;;  %v3182_v10 = vadd.f32 %v3178_v13, %v7924_v49  ;;  %v3195_v39 = vpop.permute.xlu0 %3194 }
 0x2f1   :  { %v3198_v23 = vrot.slane %v3195_v39, 4 }
 0x2f2   :  { %v3179_v31 = vsel %vm539_vm4, %v3175_v3, %v3177_v53 }
 0x2f3   :  { %3754 = vrot.lane.b32.xlu1 %v4366_v8, %s4430_s25  ;;  %3752 = vrot.lane.b32.xlu0 %v4365_v24, %s4430_s25  ;;  %v3183_v58 = vadd.f32 %v3179_v31, %v7921_v4  ;;  %v3197_v61 = vpop.permute.xlu1 %3196  ;;  %v3200_v37 = vsel %vm648_vm5, %v3195_v39, %v3198_v23 }
 0x2f4   :  { %v3199_v2 = vrot.slane %v3197_v61, 4  ;;  %v3204_v46 = vadd.f32 %v3200_v37, %v7936_v42  ;;  %v3217_v4 = vpop.permute.xlu0 %3216 }
 0x2f5   :  { %v3220_v49 = vrot.slane %v3217_v4, 4 }
 0x2f6   :  { %v3201_v30 = vsel %vm648_vm5, %v3197_v61, %v3199_v2 }
 0x2f7   :  { %3758 = vrot.lane.b32.xlu1 %v4368_v16, %s4430_s25  ;;  %3756 = vrot.lane.b32.xlu0 %v4367_v50, %s4430_s25  ;;  %v3205_v25 = vadd.f32 %v3201_v30, %v7933_v27  ;;  %v3219_v54 = vpop.permute.xlu1 %3218  ;;  %v3222_v19 = vsel %vm648_vm5, %v3217_v4, %v3220_v49 }
 0x2f8   :  { %v3221_v62 = vrot.slane %v3219_v54, 4  ;;  %v3226_v55 = vadd.f32 %v3222_v19, %v7948_v38  ;;  %v3239_v41 = vpop.permute.xlu0 %3238 }
 0x2f9   :  { %v3242_v9 = vrot.slane %v3239_v41, 4 }
 0x2fa   :  { %v3223_v29 = vsel %vm648_vm5, %v3219_v54, %v3221_v62 }
 0x2fb   :  { %v7997_v28 = vadd.f32 %v3223_v29, %v7945_v60  ;;  %v3241_v21 = vpop.permute.xlu1 %3240  ;;  %v3244_v42 = vsel %vm648_vm5, %v3239_v41, %v3242_v9 }
 0x2fc   :  { %v3243_v43 = vrot.slane %v3241_v21, 4  ;;  %v3248_v20 = vadd.f32 %v3244_v42, %v7960_v7  ;;  %v3261_v26 = vpop.permute.xlu0 %3260 }
 0x2fd   :  { %v3264_v60 = vrot.slane %v3261_v26, 4 }
 0x2fe   :  { %v3245_v27 = vsel %vm648_vm5, %v3241_v21, %v3243_v43 }
 0x2ff   :  { %v8003_v44 = vadd.f32 %v3245_v27, %v7957_v56  ;;  %v3263_v63 = vpop.permute.xlu1 %3262  ;;  %v3266_v38 = vsel %vm648_vm5, %v3261_v26, %v3264_v60 }
 0x300   :  { %v3265_v47 = vrot.slane %v3263_v63, 4  ;;  %v8010_v57 = vadd.f32 %v3266_v38, %v3138_v33  ;;  %v3283_v32 = vpop.permute.xlu0 %3282 }
 0x301   :  { %v3286_v15 = vrot.slane %v3283_v32, 4 }
 0x302   :  { %v3267_v6 = vsel %vm648_vm5, %v3263_v63, %v3265_v47 }
 0x303   :  { %v8008_v59 = vadd.f32 %v3267_v6, %v3139_v36  ;;  %v3285_v12 = vpop.permute.xlu1 %3284  ;;  %v3288_v7 = vsel %vm648_vm5, %v3283_v32, %v3286_v15 }
 0x304   :  { %v3287_v34 = vrot.slane %v3285_v12, 4  ;;  %v8016_v45 = vadd.f32 %v3288_v7, %v3160_v1  ;;  %v3305_v52 = vpop.permute.xlu0 %3304  ;;  %v3774_v7 = vlaneseq }
 0x305   :  { %v3308_v8 = vrot.slane %v3305_v52, 4 }
 0x306   :  { %v3289_v56 = vsel %vm648_vm5, %v3285_v12, %v3287_v34 }
 0x307   :  { %v8014_v5 = vadd.f32 %v3289_v56, %v3161_v40  ;;  %v3307_v11 = vpop.permute.xlu1 %3306  ;;  %v3310_v33 = vsel %vm648_vm5, %v3305_v52, %v3308_v8 }
 0x308   :  { %v3309_v0 = vrot.slane %v3307_v11, 4  ;;  %v8022_v14 = vadd.f32 %v3310_v33, %v3182_v10  ;;  %v3335_v48 = vpop.permute.xlu0 %3334  ;;  %v3775_v33 = vshrl.u32 %v3774_v7, 7 }
 0x309   :  { %v3342_v22 = vrot.slane %v3335_v48, 4 }
 0x30a   :  { %v3311_v36 = vsel %vm648_vm5, %v3307_v11, %v3309_v0 }
 0x30b   :  { %v8020_v24 = vadd.f32 %v3311_v36, %v3183_v58  ;;  %v3337_v17 = vpop.permute.xlu1 %3336 }
 0x30c   :  { %v3343_v35 = vrot.slane %v3337_v17, 4  ;;  %v3339_v18 = vpop.permute.xlu0 %3338 }
 0x30d   :  { %v3344_v16 = vrot.slane %v3339_v18, 4 }
 0x30e   :  { %v3346_v40 = vsel %vm767_vm6, %v3342_v22, %v3343_v35 }
 0x30f   :  { %v3347_v1 = vsel %vm769_vm7, %v3335_v48, %v3346_v40  ;;  %v3341_v3 = vpop.permute.xlu1 %3340 }
 0x310   :  { %v3352_v53 = vadd.f32 %v3347_v1, %v3204_v46  ;;  %v3345_v51 = vrot.slane %v3341_v3, 4  ;;  %v3373_v58 = vpop.permute.xlu0 %3372  ;;  %v8053_v1 = vsub.s32 0, %v3775_v33  ;;  %v8055_v3 = vsub.s32 4, %v3775_v33 }
 0x311   :  { %v3380_v39 = vrot.slane %v3373_v58, 4 }
 0x312   :  { %v3348_v50 = vsel %vm767_vm6, %v3344_v16, %v3345_v51 }
 0x313   :  { %v3349_v31 = vsel %vm769_vm7, %v3339_v18, %v3348_v50  ;;  %v3375_v13 = vpop.permute.xlu1 %3374 }
 0x314   :  { %v3353_v10 = vadd.f32 %v3349_v31, %v3205_v25  ;;  %v3381_v61 = vrot.slane %v3375_v13, 4  ;;  %v3377_v37 = vpop.permute.xlu0 %3376 }
 0x315   :  { %v3382_v46 = vrot.slane %v3377_v37, 4 }
 0x316   :  { %v3384_v2 = vsel %vm767_vm6, %v3380_v39, %v3381_v61 }
 0x317   :  { %v3385_v23 = vsel %vm769_vm7, %v3373_v58, %v3384_v2  ;;  %v3379_v30 = vpop.permute.xlu1 %3378 }
 0x318   :  { %v3390_v54 = vadd.f32 %v3385_v23, %v3226_v55  ;;  %v3383_v4 = vrot.slane %v3379_v30, 4  ;;  %v3411_v19 = vpop.permute.xlu0 %3410 }
 0x319   :  { %v3418_v41 = vrot.slane %v3411_v19, 4 }
 0x31a   :  { %v3386_v62 = vsel %vm767_vm6, %v3382_v46, %v3383_v4 }
 0x31b   :  { %v3387_v49 = vsel %vm769_vm7, %v3377_v37, %v3386_v62  ;;  %v3413_v29 = vpop.permute.xlu1 %3412 }
 0x31c   :  { %v3391_v21 = vadd.f32 %v3387_v49, %v7997_v28  ;;  %v3419_v25 = vrot.slane %v3413_v29, 4  ;;  %v3415_v42 = vpop.permute.xlu0 %3414 }
 0x31d   :  { %v3420_v26 = vrot.slane %v3415_v42, 4 }
 0x31e   :  { %v3422_v43 = vsel %vm767_vm6, %v3418_v41, %v3419_v25 }
 0x31f   :  { %v3423_v9 = vsel %vm769_vm7, %v3411_v19, %v3422_v43  ;;  %v3417_v27 = vpop.permute.xlu1 %3416 }
 0x320   :  { %v8035_v63 = vadd.f32 %v3423_v9, %v3248_v20  ;;  %v3421_v55 = vrot.slane %v3417_v27, 4  ;;  %v8041_v38 = vpop.permute.xlu0 %3448 }
 0x322   :  { %v3424_v47 = vsel %vm767_vm6, %v3420_v26, %v3421_v55 }
 0x323   :  { %v3425_v60 = vsel %vm769_vm7, %v3415_v42, %v3424_v47  ;;  %v8039_v6 = vpop.permute.xlu1 %3450 }
 0x324   :  { %v8044_v28 = vadd.f32 %v3425_v60, %v8003_v44  ;;  %v3457_v33 = vrot.slane %v8039_v6, 4 }
 0x325   :  { %v8048_v32 = vpop.permute.xlu0 %3452 }
 0x326   :  { %v3458_v6 = vrot.slane %v8048_v32, 4 }
 0x327   :  { %v8046_v12 = vpop.permute.xlu1 %3454 }
 0x32b   :  { %v3565_v34 = vpop.permute.xlu1 %3564  ;;  %v3563_v20 = vpop.permute.xlu0 %3562 }
 0x32c   :  { %v3571_v15 = vrot.slane %v3565_v34, 4  ;;  %v3570_v56 = vrot.slane %v3563_v20, 4 }
 0x32e   :  { %v3574_v11 = vsel %vm767_vm6, %v3570_v56, %v3571_v15 }
 0x32f   :  { %v3569_v52 = vpop.permute.xlu1 %3568  ;;  %v3567_v0 = vpop.permute.xlu0 %3566  ;;  %v3575_v17 = vsel %vm950_vm8, %v3563_v20, %v3574_v11 }
 0x330   :  { %v3573_v8 = vrot.slane %v3569_v52, 4  ;;  %v3572_v36 = vrot.slane %v3567_v0, 4  ;;  %v3580_v18 = vadd.f32 %v3575_v17, %v3352_v53 }
 0x332   :  { %v3576_v35 = vsel %vm767_vm6, %v3572_v36, %v3573_v8  ;;  %v3777_v2 = vrot.slane %v3580_v18, %v8053_v1  ;;  %v3781_v23 = vrot.slane %v3580_v18, %v8055_v3 }
 0x333   :  { %v3577_v16 = vsel %vm950_vm8, %v3567_v0, %v3576_v35  ;;  %v3456_v35 = vrot.slane %v8041_v38, 4 }
 0x334   :  { %v3603_v44 = vpop.permute.xlu1 %3602  ;;  %v3601_v48 = vpop.permute.xlu0 %3600  ;;  %v3581_v30 = vadd.f32 %v3577_v16, %v3353_v10  ;;  %v3459_v16 = vrot.slane %v8046_v12, 4 }
 0x335   :  { %v3609_v22 = vrot.slane %v3603_v44, 4  ;;  %v3608_v40 = vrot.slane %v3601_v48, 4 }
 0x336   :  { %v3785_v25 = vrot.slane %v3581_v30, %v8053_v1  ;;  %v3789_v10 = vrot.slane %v3581_v30, %v8055_v3 }
 0x337   :  { %v3612_v51 = vsel %vm767_vm6, %v3608_v40, %v3609_v22 }
 0x338   :  { %v3613_v50 = vsel %vm950_vm8, %v3601_v48, %v3612_v51  ;;  %v3607_v31 = vpop.permute.xlu1 %3606  ;;  %v3605_v13 = vpop.permute.xlu0 %3604 }
 0x339   :  { %v3618_v58 = vadd.f32 %v3613_v50, %v3390_v54  ;;  %v3611_v61 = vrot.slane %v3607_v31, 4  ;;  %v3610_v39 = vrot.slane %v3605_v13, 4 }
 0x33b   :  { %v3799_v37 = vrot.slane %v3618_v58, %v8053_v1  ;;  %v3803_v53 = vrot.slane %v3618_v58, %v8055_v3  ;;  %v3614_v4 = vsel %vm767_vm6, %v3610_v39, %v3611_v61  ;;  %v3462_v39 = vsel %vm767_vm6, %v3458_v6, %v3459_v16 }
 0x33c   :  { %v3615_v46 = vsel %vm950_vm8, %v3605_v13, %v3614_v4  ;;  %v3460_v13 = vsel %vm767_vm6, %v3456_v35, %v3457_v33 }
 0x33d   :  { %v3489_v62 = vpop.permute.xlu1 %3488  ;;  %v8066_v49 = vpop.permute.xlu0 %3486  ;;  %v3905_v54 = vsel %vm3904_vm9, %v3777_v2, %v3799_v37  ;;  %v3906_v29 = vsel %vm3904_vm9, %v3781_v23, %v3803_v53  ;;  %v3619_v19 = vadd.f32 %v3615_v46, %v3391_v21  ;;  %v3463_v46 = vsel %vm769_vm7, %v8048_v32, %v3462_v39 }
 0x33e   :  { %v3495_v2 = vrot.slane %v3489_v62, 4  ;;  %v3494_v12 = vrot.slane %v8066_v49, 4 }
 0x33f   :  { %v3807_v41 = vrot.slane %v3619_v19, %v8053_v1  ;;  %v3811_v43 = vrot.slane %v3619_v19, %v8055_v3 }
 0x341   :  { %v8074_v9 = vpop.permute.xlu1 %3492  ;;  %v8076_v27 = vpop.permute.xlu0 %3490  ;;  %v3907_v42 = vsel %vm3904_vm9, %v3785_v25, %v3807_v41  ;;  %v3908_v55 = vsel %vm3904_vm9, %v3789_v10, %v3811_v43 }
 0x342   :  { %v3496_v19 = vrot.slane %v8076_v27, 4 }
 0x345   :  { %v3641_v26 = vpop.permute.xlu1 %3640  ;;  %v3639_v47 = vpop.permute.xlu0 %3638 }
 0x346   :  { %v3647_v60 = vrot.slane %v3641_v26, 4  ;;  %v3646_v21 = vrot.slane %v3639_v47, 4 }
 0x348   :  { %v3650_v34 = vsel %vm767_vm6, %v3646_v21, %v3647_v60 }
 0x349   :  { %v3651_v20 = vsel %vm950_vm8, %v3639_v47, %v3650_v34  ;;  %v3645_v15 = vpop.permute.xlu1 %3644  ;;  %v3643_v56 = vpop.permute.xlu0 %3642 }
 0x34a   :  { %v3656_v7 = vadd.f32 %v3651_v20, %v8035_v63  ;;  %v3649_v11 = vrot.slane %v3645_v15, 4  ;;  %v3648_v52 = vrot.slane %v3643_v56, 4 }
 0x34c   :  { %v3821_v0 = vrot.slane %v3656_v7, %v8053_v1  ;;  %v3825_v8 = vrot.slane %v3656_v7, %v8055_v3  ;;  %v3652_v36 = vsel %vm767_vm6, %v3648_v52, %v3649_v11 }
 0x34d   :  { %v3653_v17 = vsel %vm950_vm8, %v3643_v56, %v3652_v36  ;;  %v3527_v44 = vpop.permute.xlu1 %3526  ;;  %v8088_v48 = vpop.permute.xlu0 %3524 }
 0x34e   :  { %v3910_v63 = vsel %vm3909_vm10, %v3905_v54, %v3821_v0  ;;  %v3911_v22 = vsel %vm3909_vm10, %v3906_v29, %v3825_v8  ;;  %v3657_v40 = vadd.f32 %v3653_v17, %v8044_v28  ;;  %v3461_v28 = vsel %vm769_vm7, %v8041_v38, %v3460_v13 }
 0x34f   :  { %v3466_v4 = vadd.f32 %v3461_v28, %v8010_v57  ;;  %v3498_v29 = vsel %vm767_vm6, %v3494_v12, %v3495_v2  ;;  %v3497_v38 = vrot.slane %v8074_v9, 4  ;;  %v3467_v57 = vadd.f32 %v3463_v46, %v8008_v59 }
 0x350   :  { %v3829_v18 = vrot.slane %v3657_v40, %v8053_v1  ;;  %v3833_v51 = vrot.slane %v3657_v40, %v8055_v3  ;;  %v3499_v32 = vsel %vm769_vm7, %v8066_v49, %v3498_v29  ;;  %v3533_v60 = vrot.slane %v3527_v44, 4 }
 0x351   :  { %v8098_v50 = vpop.permute.xlu1 %3530  ;;  %v8100_v31 = vpop.permute.xlu0 %3528  ;;  %v3500_v47 = vsel %vm767_vm6, %v3496_v19, %v3497_v38  ;;  %v3532_v21 = vrot.slane %v8088_v48, 4  ;;  %v3504_v52 = vadd.f32 %v3499_v32, %v8016_v45 }
 0x352   :  { %v3912_v58 = vsel %vm3909_vm10, %v3907_v42, %v3829_v18  ;;  %v3913_v61 = vsel %vm3909_vm10, %v3908_v55, %v3833_v51  ;;  %v3501_v0 = vsel %vm769_vm7, %v8076_v27, %v3500_v47  ;;  %v3535_v17 = vrot.slane %v8098_v50, 4 }
 0x353   :  { %v3536_v33 = vsel %vm767_vm6, %v3532_v21, %v3533_v60  ;;  %v3534_v44 = vrot.slane %v8100_v31, 4  ;;  %v3505_v6 = vadd.f32 %v3501_v0, %v8014_v5 }
 0x354   :  { %v3537_v50 = vsel %vm769_vm7, %v8088_v48, %v3536_v33 }
 0x355   :  { %v3679_v23 = vpop.permute.xlu1 %3678  ;;  %v3677_v30 = vpop.permute.xlu0 %3676  ;;  %v3542_v48 = vadd.f32 %v3537_v50, %v8022_v14 }
 0x356   :  { %v3685_v37 = vrot.slane %v3679_v23, 4  ;;  %v3684_v53 = vrot.slane %v3677_v30, 4 }
 0x358   :  { %v3688_v54 = vsel %vm767_vm6, %v3684_v53, %v3685_v37 }
 0x359   :  { %v3689_v62 = vsel %vm950_vm8, %v3677_v30, %v3688_v54  ;;  %v3683_v25 = vpop.permute.xlu1 %3682  ;;  %v3681_v10 = vpop.permute.xlu0 %3680 }
 0x35a   :  { %v3694_v41 = vadd.f32 %v3689_v62, %v3466_v4  ;;  %v3687_v43 = vrot.slane %v3683_v25, 4  ;;  %v3686_v42 = vrot.slane %v3681_v10, 4 }
 0x35c   :  { %v3843_v55 = vrot.slane %v3694_v41, %v8053_v1  ;;  %v3847_v26 = vrot.slane %v3694_v41, %v8055_v3  ;;  %v3690_v9 = vsel %vm767_vm6, %v3686_v42, %v3687_v43 }
 0x35d   :  { %v3691_v34 = vsel %vm950_vm8, %v3681_v10, %v3690_v9  ;;  %v3717_v20 = vpop.permute.xlu1 %3716  ;;  %v3715_v15 = vpop.permute.xlu0 %3714 }
 0x35e   :  { %v3915_v59 = vsel %vm3914_vm11, %v3910_v63, %v3843_v55  ;;  %v3916_v56 = vsel %vm3914_vm11, %v3911_v22, %v3847_v26  ;;  %v3695_v49 = vadd.f32 %v3691_v34, %v3467_v57  ;;  %v3723_v7 = vrot.slane %v3717_v20, 4 }
 0x35f   :  { %v3722_v11 = vrot.slane %v3715_v15, 4 }
 0x360   :  { %v3851_v8 = vrot.slane %v3695_v49, %v8053_v1  ;;  %v3855_v36 = vrot.slane %v3695_v49, %v8055_v3 }
 0x361   :  { %v3726_v35 = vsel %vm767_vm6, %v3722_v11, %v3723_v7  ;;  %v3721_v63 = vpop.permute.xlu1 %3720  ;;  %v3719_v22 = vpop.permute.xlu0 %3718 }
 0x362   :  { %v3917_v40 = vsel %vm3914_vm11, %v3912_v58, %v3851_v8  ;;  %v3918_v45 = vsel %vm3914_vm11, %v3913_v61, %v3855_v36  ;;  %v3727_v27 = vsel %vm950_vm8, %v3715_v15, %v3726_v35  ;;  %v3725_v18 = vrot.slane %v3721_v63, 4 }
 0x363   :  { %v3732_v51 = vadd.f32 %v3727_v27, %v3504_v52  ;;  %v3724_v16 = vrot.slane %v3719_v22, 4  ;;  %v3538_v61 = vsel %vm767_vm6, %v3534_v44, %v3535_v17 }
 0x364   :  { %v3539_v46 = vsel %vm769_vm7, %v8100_v31, %v3538_v61 }
 0x365   :  { %v3865_v13 = vrot.slane %v3732_v51, %v8053_v1  ;;  %v3869_v28 = vrot.slane %v3732_v51, %v8055_v3  ;;  %v3728_v39 = vsel %vm767_vm6, %v3724_v16, %v3725_v18  ;;  %v3755_v2 = vpop.permute.xlu1 %3754  ;;  %v3753_v58 = vpop.permute.xlu0 %3752  ;;  %v3543_v42 = vadd.f32 %v3539_v46, %v8020_v24 }
 0x366   :  { %v3729_v12 = vsel %vm950_vm8, %v3719_v22, %v3728_v39  ;;  %v3761_v23 = vrot.slane %v3755_v2, 4  ;;  %v3760_v30 = vrot.slane %v3753_v58, 4 }
 0x367   :  { %v3919_v37 = vsel %vm767_vm6, %v3915_v59, %v3865_v13  ;;  %v3920_v5 = vsel %vm767_vm6, %v3916_v56, %v3869_v28  ;;  %v3733_v53 = vadd.f32 %v3729_v12, %v3505_v6 }
 0x368   :  { %v3764_v4 = vsel %vm767_vm6, %v3760_v30, %v3761_v23 }
 0x369   :  { %v3873_v54 = vrot.slane %v3733_v53, %v8053_v1  ;;  %v3877_v29 = vrot.slane %v3733_v53, %v8055_v3  ;;  %v3765_v38 = vsel %vm950_vm8, %v3753_v58, %v3764_v4  ;;  %v3759_v19 = vpop.permute.xlu1 %3758  ;;  %v3757_v62 = vpop.permute.xlu0 %3756 }
 0x36a   :  { %v3770_v25 = vadd.f32 %v3765_v38, %v3542_v48  ;;  %v3763_v10 = vrot.slane %v3759_v19, 4  ;;  %v3762_v41 = vrot.slane %v3757_v62, 4 }
 0x36b   :  { %v3921_v43 = vsel %vm767_vm6, %v3917_v40, %v3873_v54  ;;  %v3922_v14 = vsel %vm767_vm6, %v3918_v45, %v3877_v29 }
 0x36c   :  { %v3887_v31 = vrot.slane %v3770_v25, %v8053_v1  ;;  %v3891_v57 = vrot.slane %v3770_v25, %v8055_v3  ;;  %v3766_v32 = vsel %vm767_vm6, %v3762_v41, %v3763_v10 }
 0x36d   :  { %v3767_v55 = vsel %vm950_vm8, %v3757_v62, %v3766_v32 }
 0x36e   :  { %v3924_v26 = vsel %vm3923_vm12, %v3919_v37, %v3887_v31  ;;  %v3925_v9 = vsel %vm3923_vm12, %v3920_v5, %v3891_v57  ;;  %v3771_v47 = vadd.f32 %v3767_v55, %v3543_v42 }
 0x36f   :  { %3928 = vst [vmem:[%s8183_s3] sm:$0x3f] %v3924_v26  ;;  %3930 = vst.msk [vmem:[%s8183_s3 + $0x8] sm:$0x3f] %vm3929_vm13, %v3925_v9 }
 0x370   :  { %v3895_v24 = vrot.slane %v3771_v47, %v8053_v1  ;;  %v3899_v60 = vrot.slane %v3771_v47, %v8055_v3 }
 0x372   :  { %v3926_v21 = vsel %vm3923_vm12, %v3921_v43, %v3895_v24  ;;  %v3927_v34 = vsel %vm3923_vm12, %v3922_v14, %v3899_v60 }
 0x373   :  { %3931 = vst [vmem:[%s8183_s3 + $0x10] sm:$0x3f] %v3926_v21  ;;  %3932 = vst.msk [vmem:[%s8183_s3 + $0x18] sm:$0x3f] %vm3929_vm13, %v3927_v34 }
 0x374   :  { %3937 = vsyncpa [#allocation3], 1 }
 0x375   :  { %3938 = vsyncpa [#allocation5], 1 }

</bundles_post_ra>
